<compile_context>
chip_gen: v7x
topology: tpu7x:2x2x1
jax: 0.10.0
libtpu: 0.0.40
codegen_flags: <defaults>
</compile_context>

<pallas_src>
import functools

import jax
import jax.numpy as jnp
from jax.experimental import pallas as pl
from jax.experimental.pallas import tpu as pltpu


# --------------------------------------------------------------------------
# Pallas kernels
# --------------------------------------------------------------------------

def _conv_relu_kernel(x_ref, w_ref, b_ref, o_ref):
    """One row tile of im2col conv: o = relu(x @ w + b).

    x: (TM, 9*Cin) bf16, w: (9*Cin, Cout) bf16, b: (1, Cout) f32.
    """
    y = jnp.dot(x_ref[...], w_ref[...], preferred_element_type=jnp.float32)
    o_ref[...] = jnp.maximum(y + b_ref[...], 0.0).astype(o_ref.dtype)


def _conv_relu_pool_kernel(x_ref, w_ref, b_ref, o_ref):
    """Conv + ReLU + fused 2x2 max-pool.

    x: (4, TM, 9*Cin) bf16 -- leading dim holds the 4 conv-output positions of
    each 2x2 pool window (tap-major layout built by the wrapper).
    relu(max_t(x_t @ w) + b) == max_t(relu(x_t @ w + b)) since relu is
    monotone and the bias is shared, so this matches PyTorch's relu->pool.
    """
    w = w_ref[...]
    y = jnp.dot(x_ref[0], w, preferred_element_type=jnp.float32)
    for t in range(1, 4):  # static unroll over the 4 window taps
        y = jnp.maximum(y, jnp.dot(x_ref[t], w,
                                   preferred_element_type=jnp.float32))
    o_ref[...] = jnp.maximum(y + b_ref[...], 0.0).astype(o_ref.dtype)


def _mlp_kernel(x_ref, w1_ref, b1_ref, w2_ref, b2_ref, w3_ref, b3_ref, o_ref):
    """Fused fc1 -> ReLU -> fc2 -> ReLU -> fc3 -> log_softmax."""
    h = jnp.dot(x_ref[...], w1_ref[...], preferred_element_type=jnp.float32)
    h = jnp.maximum(h + b1_ref[...], 0.0).astype(jnp.bfloat16)
    h = jnp.dot(h, w2_ref[...], preferred_element_type=jnp.float32)
    h = jnp.maximum(h + b2_ref[...], 0.0).astype(jnp.bfloat16)
    y = jnp.dot(h, w3_ref[...], preferred_element_type=jnp.float32)
    y = y + b3_ref[...]
    m = jnp.max(y, axis=-1, keepdims=True)
    z = y - m
    lse = jnp.log(jnp.sum(jnp.exp(z), axis=-1, keepdims=True))
    o_ref[...] = z - lse


# --------------------------------------------------------------------------
# Wrappers (glue: padding, im2col packing, weight repacking)
# --------------------------------------------------------------------------

def _pick_tile_m(m):
    """Largest row tile <= 1024 that divides m with >= 2 grid steps if possible."""
    cap = min(1024, max(m // 2, 8))
    for t in (1024, 512, 256, 128, 64, 32, 16, 8):
        if t <= cap and m % t == 0:
            return t
    return m  # fall back to a single full-array block (always legal)


_CONV_COMPILER_PARAMS = pltpu.CompilerParams(
    dimension_semantics=("parallel",),
    # Budget: 2x double-buffered (TM x 9*Cin) bf16 input + (TM x Cout) output
    # is ~1-2 MiB at TM=1024 -- well inside the 32 MiB scoped default on every
    # generation (v7x scoped default is also 32 MiB of its 64 MiB VMEM).
    vmem_limit_bytes=32 * 1024 * 1024,
)


def conv3x3_relu(x_nhwc, w_oihw, bias, pool=False):
    """relu(conv2d(x, w, b, stride=1, padding=1)), optionally + max_pool2d(2)."""
    N, H, W, Cin = x_nhwc.shape
    Cout = w_oihw.shape[0]
    K = 9 * Cin

    # im2col in one pass: (N, H, W, 9*Cin), tap order (kh, kw), bf16 operands.
    xp = jnp.pad(x_nhwc, ((0, 0), (1, 1), (1, 1), (0, 0))).astype(jnp.bfloat16)
    taps = [xp[:, kh:kh + H, kw:kw + W, :] for kh in range(3) for kw in range(3)]
    patches = jnp.concatenate(taps, axis=-1)

    # Repack weights OIHW -> (kh*3*Cin + kw*Cin + ci, Cout), matching the
    # patch K-ordering above.
    w9 = jnp.transpose(w_oihw, (2, 3, 1, 0)).reshape(K, Cout).astype(jnp.bfloat16)
    b2 = bias.reshape(1, Cout).astype(jnp.float32)

    if not pool:
        M = N * H * W
        patches = patches.reshape(M, K)
        tm = _pick_tile_m(M)
        out = pl.pallas_call(
            _conv_relu_kernel,
            out_shape=jax.ShapeDtypeStruct((M, Cout), jnp.bfloat16),
            grid_spec=pltpu.PrefetchScalarGridSpec(
                num_scalar_prefetch=0,
                grid=(M // tm,),
                in_specs=[
                    pl.BlockSpec((tm, K), lambda i: (i, 0)),
                    pl.BlockSpec((K, Cout), lambda i: (0, 0)),
                    pl.BlockSpec((1, Cout), lambda i: (0, 0)),
                ],
                out_specs=pl.BlockSpec((tm, Cout), lambda i: (i, 0)),
            ),
            compiler_params=_CONV_COMPILER_PARAMS,
        )(patches, w9, b2)
        return out.reshape(N, H, W, Cout)

    # Fused pool path: rearrange rows tap-major so the 4 conv-output rows of
    # each 2x2 pool window sit along a leading dim of size 4.
    Ho, Wo = H // 2, W // 2
    Mo = N * Ho * Wo
    patches = patches.reshape(N, Ho, 2, Wo, 2, K)
    patches = jnp.transpose(patches, (2, 4, 0, 1, 3, 5)).reshape(4, Mo, K)
    tm = _pick_tile_m(Mo)
    out = pl.pallas_call(
        _conv_relu_pool_kernel,
        out_shape=jax.ShapeDtypeStruct((Mo, Cout), jnp.bfloat16),
        grid_spec=pltpu.PrefetchScalarGridSpec(
            num_scalar_prefetch=0,
            grid=(Mo // tm,),
            in_specs=[
                pl.BlockSpec((4, tm, K), lambda i: (0, i, 0)),
                pl.BlockSpec((K, Cout), lambda i: (0, 0)),
                pl.BlockSpec((1, Cout), lambda i: (0, 0)),
            ],
            out_specs=pl.BlockSpec((tm, Cout), lambda i: (i, 0)),
        ),
        compiler_params=_CONV_COMPILER_PARAMS,
    )(patches, w9, b2)
    return out.reshape(N, Ho, Wo, Cout)


def mlp_head(x, fc1, fc2, fc3):
    """Fused fc1->ReLU->fc2->ReLU->fc3->log_softmax. Weights in (in, out)."""
    (w1, b1), (w2, b2), (w3, b3) = fc1, fc2, fc3
    N = x.shape[0]
    out_f = w3.shape[1]
    return pl.pallas_call(
        _mlp_kernel,
        out_shape=jax.ShapeDtypeStruct((N, out_f), jnp.float32),
    )(x.astype(jnp.bfloat16),
      w1.astype(jnp.bfloat16), b1.reshape(1, -1).astype(jnp.float32),
      w2.astype(jnp.bfloat16), b2.reshape(1, -1).astype(jnp.float32),
      w3.astype(jnp.bfloat16), b3.reshape(1, -1).astype(jnp.float32))


# --------------------------------------------------------------------------
# Parameters (deterministic, matching the PyTorch __init__ shapes/inits)
# --------------------------------------------------------------------------

def _init_conv(key, cin, cout, k=3):
    fan_in, fan_out = cin * k * k, cout * k * k
    a = (6.0 / (fan_in + fan_out)) ** 0.5
    return {
        "w_mean": jax.random.uniform(key, (cout, cin, k, k), jnp.float32, -a, a),
        "log_w_sigma": jnp.full((cout, cin, k, k), -3.0, jnp.float32),
        "b_mean": jnp.zeros((cout,), jnp.float32),
        "log_b_sigma": jnp.full((cout,), -3.0, jnp.float32),
    }


def _init_dense(key, fin, fout):
    # Stored in (in, out) layout so no per-forward transpose is needed;
    # xavier bound is symmetric in (fan_in, fan_out) so this is equivalent.
    a = (6.0 / (fin + fout)) ** 0.5
    return {
        "w_mean": jax.random.uniform(key, (fin, fout), jnp.float32, -a, a),
        "log_w_sigma": jnp.full((fin, fout), -3.0, jnp.float32),
        "b_mean": jnp.zeros((fout,), jnp.float32),
        "log_b_sigma": jnp.full((fout,), -3.0, jnp.float32),
    }


def init_params(key):
    ks = jax.random.split(key, 7)
    return {
        "conv1": _init_conv(ks[0], 3, 8),
        "conv2": _init_conv(ks[1], 8, 8),
        "conv3": _init_conv(ks[2], 8, 16),
        "conv4": _init_conv(ks[3], 16, 16),
        "fc1": _init_dense(ks[4], 16 * 8 * 8, 100),
        "fc2": _init_dense(ks[5], 100, 100),
        "fc3": _init_dense(ks[6], 100, 10),
    }


def _sample_layer(layer, kw, kb, stochastic):
    if stochastic:
        w = layer["w_mean"] + jnp.exp(layer["log_w_sigma"]) * jax.random.normal(
            kw, layer["w_mean"].shape, jnp.float32)
        b = layer["b_mean"] + jnp.exp(layer["log_b_sigma"]) * jax.random.normal(
            kb, layer["b_mean"].shape, jnp.float32)
    else:
        w, b = layer["w_mean"], layer["b_mean"]
    return w, b


# --------------------------------------------------------------------------
# Full forward pass (equivalent to BayesianCNN.forward)
# --------------------------------------------------------------------------

def bayesian_cnn_forward(params, x_nchw, sample_key, stochastic=True):
    names = ["conv1", "conv2", "conv3", "conv4", "fc1", "fc2", "fc3"]
    keys = jax.random.split(sample_key, 2 * len(names))
    sampled = {
        n: _sample_layer(params[n], keys[2 * i], keys[2 * i + 1], stochastic)
        for i, n in enumerate(names)
    }

    # NCHW -> NHWC for the conv kernels.
    x = jnp.transpose(x_nchw, (0, 2, 3, 1)).astype(jnp.float32)

    x = conv3x3_relu(x, *sampled["conv1"], pool=False)
    x = conv3x3_relu(x, *sampled["conv2"], pool=True)   # conv2 + relu + maxpool
    x = conv3x3_relu(x, *sampled["conv3"], pool=False)
    x = conv3x3_relu(x, *sampled["conv4"], pool=True)   # conv4 + relu + maxpool

    # Flatten exactly like PyTorch: NCHW order.
    N = x.shape[0]
    x = jnp.transpose(x, (0, 3, 1, 2)).reshape(N, -1)

    return mlp_head(x, sampled["fc1"], sampled["fc2"], sampled["fc3"])


# --------------------------------------------------------------------------

if __name__ == "__main__":
    key = jax.random.PRNGKey(0)
    pkey, xkey, skey = jax.random.split(key, 3)

    params = init_params(pkey)
    # Spatial size 32 is implied by fc1's 16*8*8 input (two 2x2 pools).
    x = jax.random.normal(xkey, (2, 3, 32, 32), jnp.float32)

    fwd = jax.jit(bayesian_cnn_forward, static_argnames=("stochastic",))
    out = fwd(params, x, skey, stochastic=True)
    out = jax.block_until_ready(out)

    assert out.shape == (2, 10), out.shape
    # log_softmax rows should exponentiate to ~1.
    row_sums = jnp.sum(jnp.exp(out), axis=-1)
    assert bool(jnp.all(jnp.abs(row_sums - 1.0) < 1e-3)), row_sums

    print("KERNEL_OK")
</pallas_src>

<mosaic_0001>
module attributes {stable_mosaic.version = 11 : i64} {
  func.func @_conv_relu_kernel(%arg0: i32, %arg1: memref<1024x27xbf16, #tpu.memory_space<vmem>>, %arg2: memref<27x8xbf16, #tpu.memory_space<vmem>>, %arg3: memref<1x8xf32, #tpu.memory_space<vmem>>, %arg4: memref<1024x8xbf16, #tpu.memory_space<vmem>>) attributes {dimension_semantics = [#tpu.dimension_semantics<parallel>], iteration_bounds = array<i64: 2>, scalar_prefetch = 0 : i64, scratch_operands = 0 : i64, tpu.core_type = #tpu.core_type<tc>, window_params = [{transform_indices = @transform_0, window_bounds = array<i64: 1024, 27>}, {pipeline_mode = #tpu.pipeline_mode<synchronous>, transform_indices = @transform_1, window_bounds = array<i64: 27, 8>}, {pipeline_mode = #tpu.pipeline_mode<synchronous>, transform_indices = @transform_2, window_bounds = array<i64: 1, 8>}, {transform_indices = @transform_3, window_bounds = array<i64: 1024, 8>}]} {
    %c0 = arith.constant 0 : index
    %c0_0 = arith.constant 0 : index
    %0 = vector.load %arg1[%c0, %c0_0] : memref<1024x27xbf16, #tpu.memory_space<vmem>>, vector<1024x27xbf16>
    %c0_1 = arith.constant 0 : index
    %c0_2 = arith.constant 0 : index
    %1 = vector.load %arg2[%c0_1, %c0_2] : memref<27x8xbf16, #tpu.memory_space<vmem>>, vector<27x8xbf16>
    %cst = arith.constant dense<0.000000e+00> : vector<1024x8xf32>
    %2 = tpu.matmul %0, %1, %cst {dimension_numbers = #tpu.dot_dimension_numbers<[1], [0], [0], [1], [0, 0, 1, 1], [], []>} : vector<1024x27xbf16>, vector<27x8xbf16>, vector<1024x8xf32> -> vector<1024x8xf32>
    %c0_3 = arith.constant 0 : index
    %c0_4 = arith.constant 0 : index
    %3 = vector.load %arg3[%c0_3, %c0_4] : memref<1x8xf32, #tpu.memory_space<vmem>>, vector<1x8xf32>
    %4 = vector.broadcast %3 : vector<1x8xf32> to vector<1024x8xf32>
    %5 = arith.addf %2, %4 : vector<1024x8xf32>
    %cst_5 = arith.constant 0.000000e+00 : f32
    %6 = vector.broadcast %cst_5 : f32 to vector<1024x8xf32>
    %7 = arith.maximumf %5, %6 : vector<1024x8xf32>
    %8 = arith.truncf %7 : vector<1024x8xf32> to vector<1024x8xbf16>
    %c0_6 = arith.constant 0 : index
    %c0_7 = arith.constant 0 : index
    %9 = vector.load %arg4[%c0_6, %c0_7] : memref<1024x8xbf16, #tpu.memory_space<vmem>>, vector<1024x8xbf16>
    tpu.vector_store %arg4[%c0_6, %c0_7], %8 {strides = array<i32>} : memref<1024x8xbf16, #tpu.memory_space<vmem>>, vector<1024x8xbf16>,
    return
  }
  func.func @transform_0(%arg0: i32) -> (i32, i32) {
    %c0_i32 = arith.constant 0 : i32
    %c0_i32_0 = arith.constant 0 : i32
    return %arg0, %c0_i32 : i32, i32
  }
  func.func @transform_1(%arg0: i32) -> (i32, i32) {
    %c0_i32 = arith.constant 0 : i32
    %c0_i32_0 = arith.constant 0 : i32
    %c0_i32_1 = arith.constant 0 : i32
    return %c0_i32, %c0_i32_0 : i32, i32
  }
  func.func @transform_2(%arg0: i32) -> (i32, i32) {
    %c0_i32 = arith.constant 0 : i32
    %c0_i32_0 = arith.constant 0 : i32
    %c0_i32_1 = arith.constant 0 : i32
    return %c0_i32, %c0_i32_0 : i32, i32
  }
  func.func @transform_3(%arg0: i32) -> (i32, i32) {
    %c0_i32 = arith.constant 0 : i32
    %c0_i32_0 = arith.constant 0 : i32
    return %arg0, %c0_i32 : i32, i32
  }
}

module attributes {stable_mosaic.version = 11 : i64} {
  func.func @_conv_relu_pool_kernel(%arg0: i32, %arg1: memref<4x256x72xbf16, #tpu.memory_space<vmem>>, %arg2: memref<72x8xbf16, #tpu.memory_space<vmem>>, %arg3: memref<1x8xf32, #tpu.memory_space<vmem>>, %arg4: memref<256x8xbf16, #tpu.memory_space<vmem>>) attributes {dimension_semantics = [#tpu.dimension_semantics<parallel>], iteration_bounds = array<i64: 2>, scalar_prefetch = 0 : i64, scratch_operands = 0 : i64, tpu.core_type = #tpu.core_type<tc>, window_params = [{transform_indices = @transform_0, window_bounds = array<i64: 4, 256, 72>}, {pipeline_mode = #tpu.pipeline_mode<synchronous>, transform_indices = @transform_1, window_bounds = array<i64: 72, 8>}, {pipeline_mode = #tpu.pipeline_mode<synchronous>, transform_indices = @transform_2, window_bounds = array<i64: 1, 8>}, {transform_indices = @transform_3, window_bounds = array<i64: 256, 8>}]} {
    %c0 = arith.constant 0 : index
    %c0_0 = arith.constant 0 : index
    %0 = vector.load %arg2[%c0, %c0_0] : memref<72x8xbf16, #tpu.memory_space<vmem>>, vector<72x8xbf16>
    %c0_1 = arith.constant 0 : index
    %c0_2 = arith.constant 0 : index
    %c0_3 = arith.constant 0 : index
    %1 = vector.load %arg1[%c0_1, %c0_2, %c0_3] : memref<4x256x72xbf16, #tpu.memory_space<vmem>>, vector<1x256x72xbf16>
    %2 = vector.shape_cast %1 : vector<1x256x72xbf16> to vector<256x72xbf16>
    %cst = arith.constant dense<0.000000e+00> : vector<256x8xf32>
    %3 = tpu.matmul %2, %0, %cst {dimension_numbers = #tpu.dot_dimension_numbers<[1], [0], [0], [1], [0, 0, 1, 1], [], []>} : vector<256x72xbf16>, vector<72x8xbf16>, vector<256x8xf32> -> vector<256x8xf32>
    %c1 = arith.constant 1 : index
    %c0_4 = arith.constant 0 : index
    %c0_5 = arith.constant 0 : index
    %4 = vector.load %arg1[%c1, %c0_4, %c0_5] : memref<4x256x72xbf16, #tpu.memory_space<vmem>>, vector<1x256x72xbf16>
    %5 = vector.shape_cast %4 : vector<1x256x72xbf16> to vector<256x72xbf16>
    %cst_6 = arith.constant dense<0.000000e+00> : vector<256x8xf32>
    %6 = tpu.matmul %5, %0, %cst_6 {dimension_numbers = #tpu.dot_dimension_numbers<[1], [0], [0], [1], [0, 0, 1, 1], [], []>} : vector<256x72xbf16>, vector<72x8xbf16>, vector<256x8xf32> -> vector<256x8xf32>
    %7 = arith.maximumf %3, %6 : vector<256x8xf32>
    %c2 = arith.constant 2 : index
    %c0_7 = arith.constant 0 : index
    %c0_8 = arith.constant 0 : index
    %8 = vector.load %arg1[%c2, %c0_7, %c0_8] : memref<4x256x72xbf16, #tpu.memory_space<vmem>>, vector<1x256x72xbf16>
    %9 = vector.shape_cast %8 : vector<1x256x72xbf16> to vector<256x72xbf16>
    %cst_9 = arith.constant dense<0.000000e+00> : vector<256x8xf32>
    %10 = tpu.matmul %9, %0, %cst_9 {dimension_numbers = #tpu.dot_dimension_numbers<[1], [0], [0], [1], [0, 0, 1, 1], [], []>} : vector<256x72xbf16>, vector<72x8xbf16>, vector<256x8xf32> -> vector<256x8xf32>
    %11 = arith.maximumf %7, %10 : vector<256x8xf32>
    %c3 = arith.constant 3 : index
    %c0_10 = arith.constant 0 : index
    %c0_11 = arith.constant 0 : index
    %12 = vector.load %arg1[%c3, %c0_10, %c0_11] : memref<4x256x72xbf16, #tpu.memory_space<vmem>>, vector<1x256x72xbf16>
    %13 = vector.shape_cast %12 : vector<1x256x72xbf16> to vector<256x72xbf16>
    %cst_12 = arith.constant dense<0.000000e+00> : vector<256x8xf32>
    %14 = tpu.matmul %13, %0, %cst_12 {dimension_numbers = #tpu.dot_dimension_numbers<[1], [0], [0], [1], [0, 0, 1, 1], [], []>} : vector<256x72xbf16>, vector<72x8xbf16>, vector<256x8xf32> -> vector<256x8xf32>
    %15 = arith.maximumf %11, %14 : vector<256x8xf32>
    %c0_13 = arith.constant 0 : index
    %c0_14 = arith.constant 0 : index
    %16 = vector.load %arg3[%c0_13, %c0_14] : memref<1x8xf32, #tpu.memory_space<vmem>>, vector<1x8xf32>
    %17 = vector.broadcast %16 : vector<1x8xf32> to vector<256x8xf32>
    %18 = arith.addf %15, %17 : vector<256x8xf32>
    %cst_15 = arith.constant 0.000000e+00 : f32
    %19 = vector.broadcast %cst_15 : f32 to vector<256x8xf32>
    %20 = arith.maximumf %18, %19 : vector<256x8xf32>
    %21 = arith.truncf %20 : vector<256x8xf32> to vector<256x8xbf16>
    %c0_16 = arith.constant 0 : index
    %c0_17 = arith.constant 0 : index
    %22 = vector.load %arg4[%c0_16, %c0_17] : memref<256x8xbf16, #tpu.memory_space<vmem>>, vector<256x8xbf16>
    tpu.vector_store %arg4[%c0_16, %c0_17], %21 {strides = array<i32>} : memref<256x8xbf16, #tpu.memory_space<vmem>>, vector<256x8xbf16>,
    return
  }
  func.func @transform_0(%arg0: i32) -> (i32, i32, i32) {
    %c0_i32 = arith.constant 0 : i32
    %c0_i32_0 = arith.constant 0 : i32
    %c0_i32_1 = arith.constant 0 : i32
    return %c0_i32, %arg0, %c0_i32_0 : i32, i32, i32
  }
  func.func @transform_1(%arg0: i32) -> (i32, i32) {
    %c0_i32 = arith.constant 0 : i32
    %c0_i32_0 = arith.constant 0 : i32
    %c0_i32_1 = arith.constant 0 : i32
    return %c0_i32, %c0_i32_0 : i32, i32
  }
  func.func @transform_2(%arg0: i32) -> (i32, i32) {
    %c0_i32 = arith.constant 0 : i32
    %c0_i32_0 = arith.constant 0 : i32
    %c0_i32_1 = arith.constant 0 : i32
    return %c0_i32, %c0_i32_0 : i32, i32
  }
  func.func @transform_3(%arg0: i32) -> (i32, i32) {
    %c0_i32 = arith.constant 0 : i32
    %c0_i32_0 = arith.constant 0 : i32
    return %arg0, %c0_i32 : i32, i32
  }
}

module attributes {stable_mosaic.version = 11 : i64} {
  func.func @_conv_relu_kernel(%arg0: i32, %arg1: memref<256x72xbf16, #tpu.memory_space<vmem>>, %arg2: memref<72x16xbf16, #tpu.memory_space<vmem>>, %arg3: memref<1x16xf32, #tpu.memory_space<vmem>>, %arg4: memref<256x16xbf16, #tpu.memory_space<vmem>>) attributes {dimension_semantics = [#tpu.dimension_semantics<parallel>], iteration_bounds = array<i64: 2>, scalar_prefetch = 0 : i64, scratch_operands = 0 : i64, tpu.core_type = #tpu.core_type<tc>, window_params = [{transform_indices = @transform_0, window_bounds = array<i64: 256, 72>}, {pipeline_mode = #tpu.pipeline_mode<synchronous>, transform_indices = @transform_1, window_bounds = array<i64: 72, 16>}, {pipeline_mode = #tpu.pipeline_mode<synchronous>, transform_indices = @transform_2, window_bounds = array<i64: 1, 16>}, {transform_indices = @transform_3, window_bounds = array<i64: 256, 16>}]} {
    %c0 = arith.constant 0 : index
    %c0_0 = arith.constant 0 : index
    %0 = vector.load %arg1[%c0, %c0_0] : memref<256x72xbf16, #tpu.memory_space<vmem>>, vector<256x72xbf16>
    %c0_1 = arith.constant 0 : index
    %c0_2 = arith.constant 0 : index
    %1 = vector.load %arg2[%c0_1, %c0_2] : memref<72x16xbf16, #tpu.memory_space<vmem>>, vector<72x16xbf16>
    %cst = arith.constant dense<0.000000e+00> : vector<256x16xf32>
    %2 = tpu.matmul %0, %1, %cst {dimension_numbers = #tpu.dot_dimension_numbers<[1], [0], [0], [1], [0, 0, 1, 1], [], []>} : vector<256x72xbf16>, vector<72x16xbf16>, vector<256x16xf32> -> vector<256x16xf32>
    %c0_3 = arith.constant 0 : index
    %c0_4 = arith.constant 0 : index
    %3 = vector.load %arg3[%c0_3, %c0_4] : memref<1x16xf32, #tpu.memory_space<vmem>>, vector<1x16xf32>
    %4 = vector.broadcast %3 : vector<1x16xf32> to vector<256x16xf32>
    %5 = arith.addf %2, %4 : vector<256x16xf32>
    %cst_5 = arith.constant 0.000000e+00 : f32
    %6 = vector.broadcast %cst_5 : f32 to vector<256x16xf32>
    %7 = arith.maximumf %5, %6 : vector<256x16xf32>
    %8 = arith.truncf %7 : vector<256x16xf32> to vector<256x16xbf16>
    %c0_6 = arith.constant 0 : index
    %c0_7 = arith.constant 0 : index
    %9 = vector.load %arg4[%c0_6, %c0_7] : memref<256x16xbf16, #tpu.memory_space<vmem>>, vector<256x16xbf16>
    tpu.vector_store %arg4[%c0_6, %c0_7], %8 {strides = array<i32>} : memref<256x16xbf16, #tpu.memory_space<vmem>>, vector<256x16xbf16>,
    return
  }
  func.func @transform_0(%arg0: i32) -> (i32, i32) {
    %c0_i32 = arith.constant 0 : i32
    %c0_i32_0 = arith.constant 0 : i32
    return %arg0, %c0_i32 : i32, i32
  }
  func.func @transform_1(%arg0: i32) -> (i32, i32) {
    %c0_i32 = arith.constant 0 : i32
    %c0_i32_0 = arith.constant 0 : i32
    %c0_i32_1 = arith.constant 0 : i32
    return %c0_i32, %c0_i32_0 : i32, i32
  }
  func.func @transform_2(%arg0: i32) -> (i32, i32) {
    %c0_i32 = arith.constant 0 : i32
    %c0_i32_0 = arith.constant 0 : i32
    %c0_i32_1 = arith.constant 0 : i32
    return %c0_i32, %c0_i32_0 : i32, i32
  }
  func.func @transform_3(%arg0: i32) -> (i32, i32) {
    %c0_i32 = arith.constant 0 : i32
    %c0_i32_0 = arith.constant 0 : i32
    return %arg0, %c0_i32 : i32, i32
  }
}

module attributes {stable_mosaic.version = 11 : i64} {
  func.func @_conv_relu_pool_kernel(%arg0: i32, %arg1: memref<4x64x144xbf16, #tpu.memory_space<vmem>>, %arg2: memref<144x16xbf16, #tpu.memory_space<vmem>>, %arg3: memref<1x16xf32, #tpu.memory_space<vmem>>, %arg4: memref<64x16xbf16, #tpu.memory_space<vmem>>) attributes {dimension_semantics = [#tpu.dimension_semantics<parallel>], iteration_bounds = array<i64: 2>, scalar_prefetch = 0 : i64, scratch_operands = 0 : i64, tpu.core_type = #tpu.core_type<tc>, window_params = [{transform_indices = @transform_0, window_bounds = array<i64: 4, 64, 144>}, {pipeline_mode = #tpu.pipeline_mode<synchronous>, transform_indices = @transform_1, window_bounds = array<i64: 144, 16>}, {pipeline_mode = #tpu.pipeline_mode<synchronous>, transform_indices = @transform_2, window_bounds = array<i64: 1, 16>}, {transform_indices = @transform_3, window_bounds = array<i64: 64, 16>}]} {
    %c0 = arith.constant 0 : index
    %c0_0 = arith.constant 0 : index
    %0 = vector.load %arg2[%c0, %c0_0] : memref<144x16xbf16, #tpu.memory_space<vmem>>, vector<144x16xbf16>
    %c0_1 = arith.constant 0 : index
    %c0_2 = arith.constant 0 : index
    %c0_3 = arith.constant 0 : index
    %1 = vector.load %arg1[%c0_1, %c0_2, %c0_3] : memref<4x64x144xbf16, #tpu.memory_space<vmem>>, vector<1x64x144xbf16>
    %2 = vector.shape_cast %1 : vector<1x64x144xbf16> to vector<64x144xbf16>
    %cst = arith.constant dense<0.000000e+00> : vector<64x16xf32>
    %3 = tpu.matmul %2, %0, %cst {dimension_numbers = #tpu.dot_dimension_numbers<[1], [0], [0], [1], [0, 0, 1, 1], [], []>} : vector<64x144xbf16>, vector<144x16xbf16>, vector<64x16xf32> -> vector<64x16xf32>
    %c1 = arith.constant 1 : index
    %c0_4 = arith.constant 0 : index
    %c0_5 = arith.constant 0 : index
    %4 = vector.load %arg1[%c1, %c0_4, %c0_5] : memref<4x64x144xbf16, #tpu.memory_space<vmem>>, vector<1x64x144xbf16>
    %5 = vector.shape_cast %4 : vector<1x64x144xbf16> to vector<64x144xbf16>
    %cst_6 = arith.constant dense<0.000000e+00> : vector<64x16xf32>
    %6 = tpu.matmul %5, %0, %cst_6 {dimension_numbers = #tpu.dot_dimension_numbers<[1], [0], [0], [1], [0, 0, 1, 1], [], []>} : vector<64x144xbf16>, vector<144x16xbf16>, vector<64x16xf32> -> vector<64x16xf32>
    %7 = arith.maximumf %3, %6 : vector<64x16xf32>
    %c2 = arith.constant 2 : index
    %c0_7 = arith.constant 0 : index
    %c0_8 = arith.constant 0 : index
    %8 = vector.load %arg1[%c2, %c0_7, %c0_8] : memref<4x64x144xbf16, #tpu.memory_space<vmem>>, vector<1x64x144xbf16>
    %9 = vector.shape_cast %8 : vector<1x64x144xbf16> to vector<64x144xbf16>
    %cst_9 = arith.constant dense<0.000000e+00> : vector<64x16xf32>
    %10 = tpu.matmul %9, %0, %cst_9 {dimension_numbers = #tpu.dot_dimension_numbers<[1], [0], [0], [1], [0, 0, 1, 1], [], []>} : vector<64x144xbf16>, vector<144x16xbf16>, vector<64x16xf32> -> vector<64x16xf32>
    %11 = arith.maximumf %7, %10 : vector<64x16xf32>
    %c3 = arith.constant 3 : index
    %c0_10 = arith.constant 0 : index
    %c0_11 = arith.constant 0 : index
    %12 = vector.load %arg1[%c3, %c0_10, %c0_11] : memref<4x64x144xbf16, #tpu.memory_space<vmem>>, vector<1x64x144xbf16>
    %13 = vector.shape_cast %12 : vector<1x64x144xbf16> to vector<64x144xbf16>
    %cst_12 = arith.constant dense<0.000000e+00> : vector<64x16xf32>
    %14 = tpu.matmul %13, %0, %cst_12 {dimension_numbers = #tpu.dot_dimension_numbers<[1], [0], [0], [1], [0, 0, 1, 1], [], []>} : vector<64x144xbf16>, vector<144x16xbf16>, vector<64x16xf32> -> vector<64x16xf32>
    %15 = arith.maximumf %11, %14 : vector<64x16xf32>
    %c0_13 = arith.constant 0 : index
    %c0_14 = arith.constant 0 : index
    %16 = vector.load %arg3[%c0_13, %c0_14] : memref<1x16xf32, #tpu.memory_space<vmem>>, vector<1x16xf32>
    %17 = vector.broadcast %16 : vector<1x16xf32> to vector<64x16xf32>
    %18 = arith.addf %15, %17 : vector<64x16xf32>
    %cst_15 = arith.constant 0.000000e+00 : f32
    %19 = vector.broadcast %cst_15 : f32 to vector<64x16xf32>
    %20 = arith.maximumf %18, %19 : vector<64x16xf32>
    %21 = arith.truncf %20 : vector<64x16xf32> to vector<64x16xbf16>
    %c0_16 = arith.constant 0 : index
    %c0_17 = arith.constant 0 : index
    %22 = vector.load %arg4[%c0_16, %c0_17] : memref<64x16xbf16, #tpu.memory_space<vmem>>, vector<64x16xbf16>
    tpu.vector_store %arg4[%c0_16, %c0_17], %21 {strides = array<i32>} : memref<64x16xbf16, #tpu.memory_space<vmem>>, vector<64x16xbf16>,
    return
  }
  func.func @transform_0(%arg0: i32) -> (i32, i32, i32) {
    %c0_i32 = arith.constant 0 : i32
    %c0_i32_0 = arith.constant 0 : i32
    %c0_i32_1 = arith.constant 0 : i32
    return %c0_i32, %arg0, %c0_i32_0 : i32, i32, i32
  }
  func.func @transform_1(%arg0: i32) -> (i32, i32) {
    %c0_i32 = arith.constant 0 : i32
    %c0_i32_0 = arith.constant 0 : i32
    %c0_i32_1 = arith.constant 0 : i32
    return %c0_i32, %c0_i32_0 : i32, i32
  }
  func.func @transform_2(%arg0: i32) -> (i32, i32) {
    %c0_i32 = arith.constant 0 : i32
    %c0_i32_0 = arith.constant 0 : i32
    %c0_i32_1 = arith.constant 0 : i32
    return %c0_i32, %c0_i32_0 : i32, i32
  }
  func.func @transform_3(%arg0: i32) -> (i32, i32) {
    %c0_i32 = arith.constant 0 : i32
    %c0_i32_0 = arith.constant 0 : i32
    return %arg0, %c0_i32 : i32, i32
  }
}

module attributes {stable_mosaic.version = 11 : i64} {
  func.func @_mlp_kernel(%arg0: memref<2x1024xbf16, #tpu.memory_space<vmem>>, %arg1: memref<1024x100xbf16, #tpu.memory_space<vmem>>, %arg2: memref<1x100xf32, #tpu.memory_space<vmem>>, %arg3: memref<100x100xbf16, #tpu.memory_space<vmem>>, %arg4: memref<1x100xf32, #tpu.memory_space<vmem>>, %arg5: memref<100x10xbf16, #tpu.memory_space<vmem>>, %arg6: memref<1x10xf32, #tpu.memory_space<vmem>>, %arg7: memref<2x10xf32, #tpu.memory_space<vmem>>) attributes {dimension_semantics = [], scalar_prefetch = 0 : i64, scratch_operands = 0 : i64, tpu.core_type = #tpu.core_type<tc>} {
    %c0 = arith.constant 0 : index
    %c0_0 = arith.constant 0 : index
    %0 = vector.load %arg0[%c0, %c0_0] : memref<2x1024xbf16, #tpu.memory_space<vmem>>, vector<2x1024xbf16>
    %c0_1 = arith.constant 0 : index
    %c0_2 = arith.constant 0 : index
    %1 = vector.load %arg1[%c0_1, %c0_2] : memref<1024x100xbf16, #tpu.memory_space<vmem>>, vector<1024x100xbf16>
    %cst = arith.constant dense<0.000000e+00> : vector<2x100xf32>
    %2 = tpu.matmul %0, %1, %cst {dimension_numbers = #tpu.dot_dimension_numbers<[1], [0], [0], [1], [0, 0, 1, 1], [], []>} : vector<2x1024xbf16>, vector<1024x100xbf16>, vector<2x100xf32> -> vector<2x100xf32>
    %c0_3 = arith.constant 0 : index
    %c0_4 = arith.constant 0 : index
    %3 = vector.load %arg2[%c0_3, %c0_4] : memref<1x100xf32, #tpu.memory_space<vmem>>, vector<1x100xf32>
    %4 = vector.broadcast %3 : vector<1x100xf32> to vector<2x100xf32>
    %5 = arith.addf %2, %4 : vector<2x100xf32>
    %cst_5 = arith.constant 0.000000e+00 : f32
    %6 = vector.broadcast %cst_5 : f32 to vector<2x100xf32>
    %7 = arith.maximumf %5, %6 : vector<2x100xf32>
    %8 = arith.truncf %7 : vector<2x100xf32> to vector<2x100xbf16>
    %c0_6 = arith.constant 0 : index
    %c0_7 = arith.constant 0 : index
    %9 = vector.load %arg3[%c0_6, %c0_7] : memref<100x100xbf16, #tpu.memory_space<vmem>>, vector<100x100xbf16>
    %cst_8 = arith.constant dense<0.000000e+00> : vector<2x100xf32>
    %10 = tpu.matmul %8, %9, %cst_8 {dimension_numbers = #tpu.dot_dimension_numbers<[1], [0], [0], [1], [0, 0, 1, 1], [], []>} : vector<2x100xbf16>, vector<100x100xbf16>, vector<2x100xf32> -> vector<2x100xf32>
    %c0_9 = arith.constant 0 : index
    %c0_10 = arith.constant 0 : index
    %11 = vector.load %arg4[%c0_9, %c0_10] : memref<1x100xf32, #tpu.memory_space<vmem>>, vector<1x100xf32>
    %12 = vector.broadcast %11 : vector<1x100xf32> to vector<2x100xf32>
    %13 = arith.addf %10, %12 : vector<2x100xf32>
    %cst_11 = arith.constant 0.000000e+00 : f32
    %14 = vector.broadcast %cst_11 : f32 to vector<2x100xf32>
    %15 = arith.maximumf %13, %14 : vector<2x100xf32>
    %16 = arith.truncf %15 : vector<2x100xf32> to vector<2x100xbf16>
    %c0_12 = arith.constant 0 : index
    %c0_13 = arith.constant 0 : index
    %17 = vector.load %arg5[%c0_12, %c0_13] : memref<100x10xbf16, #tpu.memory_space<vmem>>, vector<100x10xbf16>
    %cst_14 = arith.constant dense<0.000000e+00> : vector<2x10xf32>
    %18 = tpu.matmul %16, %17, %cst_14 {dimension_numbers = #tpu.dot_dimension_numbers<[1], [0], [0], [1], [0, 0, 1, 1], [], []>} : vector<2x100xbf16>, vector<100x10xbf16>, vector<2x10xf32> -> vector<2x10xf32>
    %c0_15 = arith.constant 0 : index
    %c0_16 = arith.constant 0 : index
    %19 = vector.load %arg6[%c0_15, %c0_16] : memref<1x10xf32, #tpu.memory_space<vmem>>, vector<1x10xf32>
    %20 = vector.broadcast %19 : vector<1x10xf32> to vector<2x10xf32>
    %21 = arith.addf %18, %20 : vector<2x10xf32>
    %cst_17 = arith.constant dense<0xFF800000> : vector<2xf32>
    %22 = vector.multi_reduction <maximumf>, %21, %cst_17 [1] : vector<2x10xf32> to vector<2xf32>
    %23 = vector.shape_cast %22 : vector<2xf32> to vector<2x1xf32>
    %24 = vector.broadcast %23 : vector<2x1xf32> to vector<2x10xf32>
    %25 = arith.subf %21, %24 : vector<2x10xf32>
    %26 = math.exp %25 : vector<2x10xf32>
    %cst_18 = arith.constant dense<0.000000e+00> : vector<2xf32>
    %27 = vector.multi_reduction <add>, %26, %cst_18 [1] : vector<2x10xf32> to vector<2xf32>
    %28 = vector.shape_cast %27 : vector<2xf32> to vector<2x1xf32>
    %29 = math.log %28 : vector<2x1xf32>
    %30 = vector.broadcast %29 : vector<2x1xf32> to vector<2x10xf32>
    %31 = arith.subf %25, %30 : vector<2x10xf32>
    %c0_19 = arith.constant 0 : index
    %c0_20 = arith.constant 0 : index
    %32 = vector.load %arg7[%c0_19, %c0_20] : memref<2x10xf32, #tpu.memory_space<vmem>>, vector<2x10xf32>
    tpu.vector_store %arg7[%c0_19, %c0_20], %31 {strides = array<i32>} : memref<2x10xf32, #tpu.memory_space<vmem>>, vector<2x10xf32>,
    return
  }
}

</mosaic_0001>

<bundles_post_ra>
// kernel: bayesian_cnn_forward.7
= control target key start
LH: loop header
LB: loop body
LE: loop exit
PB: predicated region body
PF: predicated region fallthrough
CT: control target
= control target key end

     0   :  { %s2920_s12 = smov 0   ;;  %s3476_s0 = inlined_call_operand.vmem [shape: bf16[2048,27], index: 0, kind: input, shape index: {}]   ;;  %s3477_s1 = inlined_call_operand.vmem [shape: bf16[27,8], index: 1, kind: input, shape index: {}]   ;;  %s3478_s2 = inlined_call_operand.vmem [shape: f32[1,8], index: 2, kind: input, shape index: {}]   ;;  %s3479_s3 = inlined_call_operand.vmem [shape: bf16[2048,8], index: 3, kind: output, shape index: {}]  }
   0x1 LB: > { %s2215_s13 = sadd.s32 4294967295, %s2897_s12   ;;  %p2219_p0 = scmp.ge.s32.totalorder %s2897_s12, 1  ;;  %s2897_s12 = sphi %s2920_s12, %s13_s12  }
   0x2   : > { %p138_p1 = scmp.lt.s32.totalorder %s2897_s12, 3 }
   0x4   : > { %p139_p2 = pnand %p2219_p0, %p138_p1 }
   0x5   : > { %v2824_v0 = vld [vmem:[%s3477_s1] sm:$0xff] (!%p139_p2)   ;;  %vm838_vm0 = vcmask (!%p139_p2), 1044480   ;;  %v2825_v1 = vld [vmem:[%s3477_s1 + $0x8] sm:$0x3f] (!%p139_p2)   ;;  %vm839_vm1 = vcmask (!%p139_p2), 1045504   ;;  %s2220_s18 = sshll.u32 (!%p139_p2), %s2215_s13, 7 }
   0x6   : > { %142 = sbr.rel (%p139_p2) target bundleno = 361 (0x169), region = 32  ;;  %2679 = vmatprep.subr.bf16.mxu0 (!%p139_p2), %v2824_v0  ;;  %2811 = vmatprep.subr.bf16.mxu1 (!%p139_p2), %v2824_v0  ;;  %v2899_v2 = vmov (!%p139_p2), 65535   ;;  %p163_p3 = scmp.lt.s32.totalorder (!%p139_p2), %s2220_s18, 255  ;;  %vm645_vm2 = vcmask (!%p139_p2), 220160   ;;  %vm2030_vm3 = vcmask (!%p139_p2), 60416  }
   0x7   : > { %2680 = vmatpush3.bf16.msra.mxu0 (!%p139_p2), %v2824_v0  ;;  %2813 = vmatpush3.bf16.msra.mxu1 (!%p139_p2), %v2824_v0  ;;  %v840_v3 = vsel (!%p139_p2), %vm838_vm0, 4294967295, %v2899_v2 }
   0x8   : > { %v841_v4 = vsel (!%p139_p2), %vm839_vm1, %v840_v3, 0 }
   0x9   : > { %v843_v5 = vand.u32 (!%p139_p2), %v2825_v1, %v841_v4 }
   0xb   : > { %2681 = vmatprep.subr.bf16.mxu0 (!%p139_p2), %v843_v5  ;;  %2812 = vmatprep.subr.bf16.mxu1 (!%p139_p2), %v843_v5 }
   0xc   : > { %2682 = vmatpush3.bf16.msra.mxu0 (!%p139_p2), %v843_v5  ;;  %2814 = vmatpush3.bf16.msra.mxu1 (!%p139_p2), %v843_v5 }
   0xd   : > { %s3481_s18 = smov (!%p163_p3, %s2220_s18), 255 }
   0xe   : > { %s2221_s19 = sshll.u32 %s3481_s18, 2 }
   0xf   : > { %s2942_s22 = scalar_lea.vmem %s3476_s0, %s2221_s19  ;;  %s3087_s27 = scalar_lea.vmem %s3479_s3, %s2221_s19 }
  0x10   : > { %v2826_v6 = vld [vmem:[%s2942_s22] sm:$0xff]   ;;  %v2828_v8 = vld [vmem:[%s2942_s22 + $0x8] sm:$0xff]   ;;  %v2830_v10 = vld [vmem:[%s2942_s22 + $0x10] sm:$0xff]  }
  0x11   : > { %v2827_v7 = vld [vmem:[%s2942_s22 + $0x100] sm:$0xff]   ;;  %2683 = vmatprep.mubr.msk.bf16.mxu0 %vm645_vm2, %v2826_v6  ;;  %v2829_v9 = vld [vmem:[%s2942_s22 + $0x108] sm:$0xff]   ;;  %v2831_v11 = vld [vmem:[%s2942_s22 + $0x110] sm:$0xff]  }
  0x12   : > { %2747 = vmatprep.mubr.msk.bf16.mxu1 %vm645_vm2, %v2827_v7  ;;  %2684 = vmatmul.mubr.msk.bf16.vlgmr.msra.gmra.mrb[0].mxu0 %vm645_vm2, %v2828_v8  ;;  %v2832_v12 = vld [vmem:[%s2942_s22 + $0x18] sm:$0xff]   ;;  %v2834_v14 = vld [vmem:[%s2942_s22 + $0x20] sm:$0xff]   ;;  %v2836_v16 = vld [vmem:[%s2942_s22 + $0x28] sm:$0xff]  }
  0x13   : > { %2748 = vmatmul.mubr.msk.bf16.vlgmr.msra.gmra.mrb[0].mxu1 %vm645_vm2, %v2829_v9  ;;  %2687 = vmatprep.mubr.msk.bf16.mxu0 %vm645_vm2, %v2830_v10  ;;  %v2833_v13 = vld [vmem:[%s2942_s22 + $0x118] sm:$0xff]   ;;  %v2835_v15 = vld [vmem:[%s2942_s22 + $0x120] sm:$0xff]   ;;  %v2837_v17 = vld [vmem:[%s2942_s22 + $0x128] sm:$0xff]  }
  0x14   : > { %2751 = vmatprep.mubr.msk.bf16.mxu1 %vm645_vm2, %v2831_v11  ;;  %v2838_v18 = vld [vmem:[%s2942_s22 + $0x30] sm:$0xff]   ;;  %v2840_v20 = vld [vmem:[%s2942_s22 + $0x38] sm:$0xff]   ;;  %v2842_v22 = vld [vmem:[%s2942_s22 + $0x40] sm:$0xff]  }
  0x15   : > { %v2839_v19 = vld [vmem:[%s2942_s22 + $0x130] sm:$0xff]   ;;  %v2841_v21 = vld [vmem:[%s2942_s22 + $0x138] sm:$0xff]   ;;  %v2843_v23 = vld [vmem:[%s2942_s22 + $0x140] sm:$0xff]  }
  0x16   : > { %v2844_v24 = vld [vmem:[%s2942_s22 + $0x48] sm:$0xff]   ;;  %v2846_v26 = vld [vmem:[%s2942_s22 + $0x50] sm:$0xff]   ;;  %v2848_v28 = vld [vmem:[%s2942_s22 + $0x58] sm:$0xff]  }
  0x17   : > { %v2845_v25 = vld [vmem:[%s2942_s22 + $0x148] sm:$0xff]   ;;  %v2847_v27 = vld [vmem:[%s2942_s22 + $0x150] sm:$0xff]   ;;  %v2849_v29 = vld [vmem:[%s2942_s22 + $0x158] sm:$0xff]  }
  0x18   : > { %v2850_v30 = vld [vmem:[%s2942_s22 + $0x60] sm:$0xff]   ;;  %v2852_v32 = vld [vmem:[%s2942_s22 + $0x68] sm:$0xff]   ;;  %v2854_v34 = vld [vmem:[%s2942_s22 + $0x70] sm:$0xff]  }
  0x19   : > { %v2851_v31 = vld [vmem:[%s2942_s22 + $0x160] sm:$0xff]   ;;  %v2853_v33 = vld [vmem:[%s2942_s22 + $0x168] sm:$0xff]   ;;  %v2855_v35 = vld [vmem:[%s2942_s22 + $0x170] sm:$0xff]  }
  0x1a   : > { %2688 = vmatmul.mubr.msk.bf16.gmra.mrb[4].mxu0 %vm645_vm2, %v2832_v12  ;;  %v2856_v36 = vld [vmem:[%s2942_s22 + $0x78] sm:$0xff]   ;;  %v2858_v38 = vld [vmem:[%s2942_s22 + $0x80] sm:$0xff]   ;;  %v2860_v40 = vld [vmem:[%s2942_s22 + $0x88] sm:$0xff]  }
  0x1b   : > { %2752 = vmatmul.mubr.msk.bf16.gmra.mrb[4].mxu1 %vm645_vm2, %v2833_v13  ;;  %2691 = vmatprep.mubr.msk.bf16.mxu0 %vm645_vm2, %v2834_v14  ;;  %v2857_v37 = vld [vmem:[%s2942_s22 + $0x178] sm:$0xff]   ;;  %v2859_v39 = vld [vmem:[%s2942_s22 + $0x180] sm:$0xff]   ;;  %v2861_v41 = vld [vmem:[%s2942_s22 + $0x188] sm:$0xff]  }
  0x1c   : > { %2755 = vmatprep.mubr.msk.bf16.mxu1 %vm645_vm2, %v2835_v15  ;;  %v2862_v42 = vld [vmem:[%s2942_s22 + $0x90] sm:$0xff]   ;;  %v2864_v44 = vld [vmem:[%s2942_s22 + $0x98] sm:$0xff]   ;;  %v2866_v46 = vld [vmem:[%s2942_s22 + $0xa0] sm:$0xff]  }
  0x1d   : > { %v2863_v43 = vld [vmem:[%s2942_s22 + $0x190] sm:$0xff]   ;;  %v2865_v45 = vld [vmem:[%s2942_s22 + $0x198] sm:$0xff]   ;;  %v2867_v47 = vld [vmem:[%s2942_s22 + $0x1a0] sm:$0xff]  }
  0x1e   : > { %v2868_v48 = vld [vmem:[%s2942_s22 + $0xa8] sm:$0xff]   ;;  %v2870_v50 = vld [vmem:[%s2942_s22 + $0xb0] sm:$0xff]   ;;  %v2872_v52 = vld [vmem:[%s2942_s22 + $0xb8] sm:$0xff]  }
  0x1f   : > { %v2869_v49 = vld [vmem:[%s2942_s22 + $0x1a8] sm:$0xff]   ;;  %v2871_v51 = vld [vmem:[%s2942_s22 + $0x1b0] sm:$0xff]   ;;  %v2873_v53 = vld [vmem:[%s2942_s22 + $0x1b8] sm:$0xff]  }
  0x20   : > { %v2874_v54 = vld [vmem:[%s2942_s22 + $0xc0] sm:$0xff]   ;;  %v2876_v56 = vld [vmem:[%s2942_s22 + $0xc8] sm:$0xff]   ;;  %v2878_v58 = vld [vmem:[%s2942_s22 + $0xd0] sm:$0xff]  }
  0x21   : > { %v2875_v55 = vld [vmem:[%s2942_s22 + $0x1c0] sm:$0xff]   ;;  %v2877_v57 = vld [vmem:[%s2942_s22 + $0x1c8] sm:$0xff]   ;;  %v2879_v59 = vld [vmem:[%s2942_s22 + $0x1d0] sm:$0xff]  }
  0x22   : > { %2692 = vmatmul.mubr.msk.bf16.gmra.mrb[8].mxu0 %vm645_vm2, %v2836_v16  ;;  %v2880_v60 = vld [vmem:[%s2942_s22 + $0xd8] sm:$0xff]   ;;  %v2882_v62 = vld [vmem:[%s2942_s22 + $0xe0] sm:$0xff]   ;;  %v2884_v0 = vld [vmem:[%s2942_s22 + $0xe8] sm:$0xff]  }
  0x23   : > { %2756 = vmatmul.mubr.msk.bf16.gmra.mrb[8].mxu1 %vm645_vm2, %v2837_v17  ;;  %2695 = vmatprep.mubr.msk.bf16.mxu0 %vm645_vm2, %v2838_v18  ;;  %v2881_v61 = vld [vmem:[%s2942_s22 + $0x1d8] sm:$0xff]   ;;  %v2883_v63 = vld [vmem:[%s2942_s22 + $0x1e0] sm:$0xff]   ;;  %v2885_v1 = vld [vmem:[%s2942_s22 + $0x1e8] sm:$0xff]  }
  0x24   : > { %2759 = vmatprep.mubr.msk.bf16.mxu1 %vm645_vm2, %v2839_v19  ;;  %v2886_v2 = vld [vmem:[%s2942_s22 + $0xf0] sm:$0xff]   ;;  %v2888_v4 = vld [vmem:[%s2942_s22 + $0xf8] sm:$0xff]   ;;  %v3075_v6 = vld [vmem:[%s3478_s2] ss:$0 sm:$0xff] }
  0x25   : > { %v2887_v3 = vld [vmem:[%s2942_s22 + $0x1f0] sm:$0xff]   ;;  %v2889_v5 = vld [vmem:[%s2942_s22 + $0x1f8] sm:$0xff]  }
  0x2a   : > { %2696 = vmatmul.mubr.msk.bf16.gmra.mrb[12].mxu0 %vm645_vm2, %v2840_v20 }
  0x2b   : > { %2760 = vmatmul.mubr.msk.bf16.gmra.mrb[12].mxu1 %vm645_vm2, %v2841_v21  ;;  %2699 = vmatprep.mubr.msk.bf16.mxu0 %vm645_vm2, %v2842_v22 }
  0x2c   : > { %2763 = vmatprep.mubr.msk.bf16.mxu1 %vm645_vm2, %v2843_v23 }
  0x32   : > { %2700 = vmatmul.mubr.msk.bf16.gmra.mrb[16].mxu0 %vm645_vm2, %v2844_v24 }
  0x33   : > { %2764 = vmatmul.mubr.msk.bf16.gmra.mrb[16].mxu1 %vm645_vm2, %v2845_v25  ;;  %2703 = vmatprep.mubr.msk.bf16.mxu0 %vm645_vm2, %v2846_v26 }
  0x34   : > { %2767 = vmatprep.mubr.msk.bf16.mxu1 %vm645_vm2, %v2847_v27 }
  0x3a   : > { %2704 = vmatmul.mubr.msk.bf16.gmra.mrb[20].mxu0 %vm645_vm2, %v2848_v28 }
  0x3b   : > { %2768 = vmatmul.mubr.msk.bf16.gmra.mrb[20].mxu1 %vm645_vm2, %v2849_v29  ;;  %2707 = vmatprep.mubr.msk.bf16.mxu0 %vm645_vm2, %v2850_v30 }
  0x3c   : > { %2771 = vmatprep.mubr.msk.bf16.mxu1 %vm645_vm2, %v2851_v31 }
  0x42   : > { %2708 = vmatmul.mubr.msk.bf16.gmra.mrb[24].mxu0 %vm645_vm2, %v2852_v32 }
  0x43   : > { %2772 = vmatmul.mubr.msk.bf16.gmra.mrb[24].mxu1 %vm645_vm2, %v2853_v33  ;;  %2711 = vmatprep.mubr.msk.bf16.mxu0 %vm645_vm2, %v2854_v34 }
  0x44   : > { %2775 = vmatprep.mubr.msk.bf16.mxu1 %vm645_vm2, %v2855_v35 }
  0x4a   : > { %2712 = vmatmul.mubr.msk.bf16.gmra.mrb[28].mxu0 %vm645_vm2, %v2856_v36 }
  0x4b   : > { %2776 = vmatmul.mubr.msk.bf16.gmra.mrb[28].mxu1 %vm645_vm2, %v2857_v37  ;;  %2715 = vmatprep.mubr.msk.bf16.mxu0 %vm645_vm2, %v2858_v38 }
  0x4c   : > { %2779 = vmatprep.mubr.msk.bf16.mxu1 %vm645_vm2, %v2859_v39 }
  0x52   : > { %2716 = vmatmul.mubr.msk.bf16.gmra.mrb[32].mxu0 %vm645_vm2, %v2860_v40 }
  0x53   : > { %2780 = vmatmul.mubr.msk.bf16.gmra.mrb[32].mxu1 %vm645_vm2, %v2861_v41  ;;  %2719 = vmatprep.mubr.msk.bf16.mxu0 %vm645_vm2, %v2862_v42 }
  0x54   : > { %2783 = vmatprep.mubr.msk.bf16.mxu1 %vm645_vm2, %v2863_v43 }
  0x5a   : > { %2720 = vmatmul.mubr.msk.bf16.gmra.mrb[36].mxu0 %vm645_vm2, %v2864_v44 }
  0x5b   : > { %2784 = vmatmul.mubr.msk.bf16.gmra.mrb[36].mxu1 %vm645_vm2, %v2865_v45  ;;  %2723 = vmatprep.mubr.msk.bf16.mxu0 %vm645_vm2, %v2866_v46 }
  0x5c   : > { %2787 = vmatprep.mubr.msk.bf16.mxu1 %vm645_vm2, %v2867_v47 }
  0x62   : > { %2724 = vmatmul.mubr.msk.bf16.gmra.mrb[40].mxu0 %vm645_vm2, %v2868_v48 }
  0x63   : > { %2788 = vmatmul.mubr.msk.bf16.gmra.mrb[40].mxu1 %vm645_vm2, %v2869_v49  ;;  %2727 = vmatprep.mubr.msk.bf16.mxu0 %vm645_vm2, %v2870_v50 }
  0x64   : > { %2791 = vmatprep.mubr.msk.bf16.mxu1 %vm645_vm2, %v2871_v51 }
  0x6a   : > { %2728 = vmatmul.mubr.msk.bf16.gmra.mrb[44].mxu0 %vm645_vm2, %v2872_v52 }
  0x6b   : > { %2792 = vmatmul.mubr.msk.bf16.gmra.mrb[44].mxu1 %vm645_vm2, %v2873_v53  ;;  %2731 = vmatprep.mubr.msk.bf16.mxu0 %vm645_vm2, %v2874_v54 }
  0x6c   : > { %2795 = vmatprep.mubr.msk.bf16.mxu1 %vm645_vm2, %v2875_v55 }
  0x72   : > { %2732 = vmatmul.mubr.msk.bf16.gmra.mrb[48].mxu0 %vm645_vm2, %v2876_v56 }
  0x73   : > { %2796 = vmatmul.mubr.msk.bf16.gmra.mrb[48].mxu1 %vm645_vm2, %v2877_v57  ;;  %2735 = vmatprep.mubr.msk.bf16.mxu0 %vm645_vm2, %v2878_v58 }
  0x74   : > { %2799 = vmatprep.mubr.msk.bf16.mxu1 %vm645_vm2, %v2879_v59 }
  0x7a   : > { %2736 = vmatmul.mubr.msk.bf16.gmra.mrb[52].mxu0 %vm645_vm2, %v2880_v60 }
  0x7b   : > { %2800 = vmatmul.mubr.msk.bf16.gmra.mrb[52].mxu1 %vm645_vm2, %v2881_v61  ;;  %2739 = vmatprep.mubr.msk.bf16.mxu0 %vm645_vm2, %v2882_v62 }
  0x7c   : > { %2803 = vmatprep.mubr.msk.bf16.mxu1 %vm645_vm2, %v2883_v63 }
  0x82   : > { %2740 = vmatmul.mubr.msk.bf16.gmra.mrb[56].mxu0 %vm645_vm2, %v2884_v0 }
  0x83   : > { %2804 = vmatmul.mubr.msk.bf16.gmra.mrb[56].mxu1 %vm645_vm2, %v2885_v1  ;;  %2743 = vmatprep.mubr.msk.bf16.mxu0 %vm645_vm2, %v2886_v2 }
  0x84   : > { %2807 = vmatprep.mubr.msk.bf16.mxu1 %vm645_vm2, %v2887_v3 }
  0x8a   : > { %2744 = vmatmul.mubr.msk.bf16.gmra.mrb[60].mxu0 %vm645_vm2, %v2888_v4 }
  0x8b   : > { %2808 = vmatmul.mubr.msk.bf16.gmra.mrb[60].mxu1 %vm645_vm2, %v2889_v5 }
  0xe5   : > { %v2685_v7 = vpop.f32.mrb[0].mxu0 }
  0xe6   : > { %v888_v8 = vadd.f32 %v2685_v7, %v3075_v6  ;;  %v2749_v9 = vpop.f32.mrb[0].mxu1  ;;  %v879_v10 = vpop.f32.mrb[1].mxu0 }
  0xe7   : > { %v1144_v11 = vadd.f32 %v2749_v9, %v3075_v6  ;;  %v880_v12 = vadd.f32 %v3075_v6, %v879_v10  ;;  %v1135_v13 = vpop.f32.mrb[1].mxu1  ;;  %v2686_v14 = vpop.f32.mrb[2].mxu0 }
  0xe8   : > { %v1392_v15 = vmax.f32 %v888_v8, 0.0  ;;  %v1136_v16 = vadd.f32 %v3075_v6, %v1135_v13  ;;  %v891_v17 = vadd.f32 %v2686_v14, %v3075_v6  ;;  %v2750_v18 = vpop.f32.mrb[2].mxu1  ;;  %v882_v19 = vpop.f32.mrb[3].mxu0 }
  0xe9   : > { %v1456_v20 = vmax.f32 %v1144_v11, 0.0  ;;  %v1390_v21 = vmax.f32 %v880_v12, 0.0  ;;  %v1147_v22 = vadd.f32 %v2750_v18, %v3075_v6  ;;  %v883_v23 = vadd.f32 %v3075_v6, %v882_v19  ;;  %v1138_v24 = vpop.f32.mrb[3].mxu1 }
  0xea   : > { %v2487_v25 = vpack.c.bf16 %v1392_v15, %v1392_v15  ;;  %v1454_v26 = vmax.f32 %v1136_v16, 0.0  ;;  %v1393_v27 = vmax.f32 %v891_v17, 0.0  ;;  %v1139_v28 = vadd.f32 %v3075_v6, %v1138_v24 }
  0xeb   : > { %v2551_v29 = vpack.c.bf16 %v1456_v20, %v1456_v20  ;;  %v2485_v30 = vpack.c.bf16 %v1390_v21, %v1390_v21  ;;  %v1457_v31 = vmax.f32 %v1147_v22, 0.0  ;;  %v1391_v32 = vmax.f32 %v883_v23, 0.0 }
  0xec   : > { %2033 = vst.msk [vmem:[%s3087_s27 + $0x8] sm:$0xf] %vm2030_vm3, %v2487_v25  ;;  %v2549_v33 = vpack.c.bf16 %v1454_v26, %v1454_v26  ;;  %v2488_v34 = vpack.c.bf16 %v1393_v27, %v1393_v27  ;;  %v1455_v35 = vmax.f32 %v1139_v28, 0.0 }
  0xed   : > { %2097 = vst.msk [vmem:[%s3087_s27 + $0x108] sm:$0xf] %vm2030_vm3, %v2551_v29  ;;  %2031 = vst.msk [vmem:[%s3087_s27] sm:$0xf] %vm2030_vm3, %v2485_v30  ;;  %v2552_v36 = vpack.c.bf16 %v1457_v31, %v1457_v31  ;;  %v2486_v37 = vpack.c.bf16 %v1391_v32, %v1391_v32  ;;  %v2689_v38 = vpop.f32.mrb[4].mxu0 }
  0xee   : > { %2095 = vst.msk [vmem:[%s3087_s27 + $0x100] sm:$0xf] %vm2030_vm3, %v2549_v33  ;;  %2034 = vst.msk [vmem:[%s3087_s27 + $0xc] sm:$0xf] %vm2030_vm3, %v2488_v34  ;;  %v2550_v39 = vpack.c.bf16 %v1455_v35, %v1455_v35  ;;  %v904_v40 = vadd.f32 %v2689_v38, %v3075_v6  ;;  %v2753_v41 = vpop.f32.mrb[4].mxu1  ;;  %v895_v42 = vpop.f32.mrb[5].mxu0 }
  0xef   : > { %2098 = vst.msk [vmem:[%s3087_s27 + $0x10c] sm:$0xf] %vm2030_vm3, %v2552_v36  ;;  %2032 = vst.msk [vmem:[%s3087_s27 + $0x4] sm:$0xf] %vm2030_vm3, %v2486_v37  ;;  %v1160_v43 = vadd.f32 %v2753_v41, %v3075_v6  ;;  %v896_v44 = vadd.f32 %v3075_v6, %v895_v42  ;;  %v1151_v45 = vpop.f32.mrb[5].mxu1  ;;  %v2690_v46 = vpop.f32.mrb[6].mxu0 }
  0xf0   : > { %2096 = vst.msk [vmem:[%s3087_s27 + $0x104] sm:$0xf] %vm2030_vm3, %v2550_v39  ;;  %v1396_v47 = vmax.f32 %v904_v40, 0.0  ;;  %v1152_v48 = vadd.f32 %v3075_v6, %v1151_v45  ;;  %v907_v49 = vadd.f32 %v2690_v46, %v3075_v6  ;;  %v2754_v50 = vpop.f32.mrb[6].mxu1  ;;  %v898_v51 = vpop.f32.mrb[7].mxu0 }
  0xf1   : > { %v1460_v52 = vmax.f32 %v1160_v43, 0.0  ;;  %v1394_v53 = vmax.f32 %v896_v44, 0.0  ;;  %v1163_v54 = vadd.f32 %v2754_v50, %v3075_v6  ;;  %v899_v55 = vadd.f32 %v3075_v6, %v898_v51  ;;  %v1154_v56 = vpop.f32.mrb[7].mxu1 }
  0xf2   : > { %v2491_v57 = vpack.c.bf16 %v1396_v47, %v1396_v47  ;;  %v1458_v58 = vmax.f32 %v1152_v48, 0.0  ;;  %v1397_v59 = vmax.f32 %v907_v49, 0.0  ;;  %v1155_v60 = vadd.f32 %v3075_v6, %v1154_v56 }
  0xf3   : > { %v2555_v61 = vpack.c.bf16 %v1460_v52, %v1460_v52  ;;  %v2489_v62 = vpack.c.bf16 %v1394_v53, %v1394_v53  ;;  %v1461_v63 = vmax.f32 %v1163_v54, 0.0  ;;  %v1395_v0 = vmax.f32 %v899_v55, 0.0 }
  0xf4   : > { %2037 = vst.msk [vmem:[%s3087_s27 + $0x18] sm:$0xf] %vm2030_vm3, %v2491_v57  ;;  %v2553_v1 = vpack.c.bf16 %v1458_v58, %v1458_v58  ;;  %v2492_v2 = vpack.c.bf16 %v1397_v59, %v1397_v59  ;;  %v1459_v3 = vmax.f32 %v1155_v60, 0.0 }
  0xf5   : > { %2101 = vst.msk [vmem:[%s3087_s27 + $0x118] sm:$0xf] %vm2030_vm3, %v2555_v61  ;;  %2035 = vst.msk [vmem:[%s3087_s27 + $0x10] sm:$0xf] %vm2030_vm3, %v2489_v62  ;;  %v2556_v4 = vpack.c.bf16 %v1461_v63, %v1461_v63  ;;  %v2490_v5 = vpack.c.bf16 %v1395_v0, %v1395_v0  ;;  %v2693_v7 = vpop.f32.mrb[8].mxu0 }
  0xf6   : > { %2099 = vst.msk [vmem:[%s3087_s27 + $0x110] sm:$0xf] %vm2030_vm3, %v2553_v1  ;;  %2038 = vst.msk [vmem:[%s3087_s27 + $0x1c] sm:$0xf] %vm2030_vm3, %v2492_v2  ;;  %v2554_v8 = vpack.c.bf16 %v1459_v3, %v1459_v3  ;;  %v920_v9 = vadd.f32 %v2693_v7, %v3075_v6  ;;  %v2757_v10 = vpop.f32.mrb[8].mxu1  ;;  %v911_v11 = vpop.f32.mrb[9].mxu0 }
  0xf7   : > { %2102 = vst.msk [vmem:[%s3087_s27 + $0x11c] sm:$0xf] %vm2030_vm3, %v2556_v4  ;;  %2036 = vst.msk [vmem:[%s3087_s27 + $0x14] sm:$0xf] %vm2030_vm3, %v2490_v5  ;;  %v1176_v12 = vadd.f32 %v2757_v10, %v3075_v6  ;;  %v912_v13 = vadd.f32 %v3075_v6, %v911_v11  ;;  %v1167_v14 = vpop.f32.mrb[9].mxu1  ;;  %v2694_v15 = vpop.f32.mrb[10].mxu0 }
  0xf8   : > { %2100 = vst.msk [vmem:[%s3087_s27 + $0x114] sm:$0xf] %vm2030_vm3, %v2554_v8  ;;  %v1400_v16 = vmax.f32 %v920_v9, 0.0  ;;  %v1168_v17 = vadd.f32 %v3075_v6, %v1167_v14  ;;  %v923_v18 = vadd.f32 %v2694_v15, %v3075_v6  ;;  %v2758_v19 = vpop.f32.mrb[10].mxu1  ;;  %v914_v20 = vpop.f32.mrb[11].mxu0 }
  0xf9   : > { %v1464_v21 = vmax.f32 %v1176_v12, 0.0  ;;  %v1398_v22 = vmax.f32 %v912_v13, 0.0  ;;  %v1179_v23 = vadd.f32 %v2758_v19, %v3075_v6  ;;  %v915_v24 = vadd.f32 %v3075_v6, %v914_v20  ;;  %v1170_v25 = vpop.f32.mrb[11].mxu1 }
  0xfa   : > { %v2495_v26 = vpack.c.bf16 %v1400_v16, %v1400_v16  ;;  %v1462_v27 = vmax.f32 %v1168_v17, 0.0  ;;  %v1401_v28 = vmax.f32 %v923_v18, 0.0  ;;  %v1171_v29 = vadd.f32 %v3075_v6, %v1170_v25 }
  0xfb   : > { %v2559_v30 = vpack.c.bf16 %v1464_v21, %v1464_v21  ;;  %v2493_v31 = vpack.c.bf16 %v1398_v22, %v1398_v22  ;;  %v1465_v32 = vmax.f32 %v1179_v23, 0.0  ;;  %v1399_v33 = vmax.f32 %v915_v24, 0.0 }
  0xfc   : > { %2041 = vst.msk [vmem:[%s3087_s27 + $0x28] sm:$0xf] %vm2030_vm3, %v2495_v26  ;;  %v2557_v34 = vpack.c.bf16 %v1462_v27, %v1462_v27  ;;  %v2496_v35 = vpack.c.bf16 %v1401_v28, %v1401_v28  ;;  %v1463_v36 = vmax.f32 %v1171_v29, 0.0 }
  0xfd   : > { %2105 = vst.msk [vmem:[%s3087_s27 + $0x128] sm:$0xf] %vm2030_vm3, %v2559_v30  ;;  %2039 = vst.msk [vmem:[%s3087_s27 + $0x20] sm:$0xf] %vm2030_vm3, %v2493_v31  ;;  %v2560_v37 = vpack.c.bf16 %v1465_v32, %v1465_v32  ;;  %v2494_v38 = vpack.c.bf16 %v1399_v33, %v1399_v33  ;;  %v2697_v39 = vpop.f32.mrb[12].mxu0 }
  0xfe   : > { %2103 = vst.msk [vmem:[%s3087_s27 + $0x120] sm:$0xf] %vm2030_vm3, %v2557_v34  ;;  %2042 = vst.msk [vmem:[%s3087_s27 + $0x2c] sm:$0xf] %vm2030_vm3, %v2496_v35  ;;  %v2558_v40 = vpack.c.bf16 %v1463_v36, %v1463_v36  ;;  %v936_v41 = vadd.f32 %v2697_v39, %v3075_v6  ;;  %v2761_v42 = vpop.f32.mrb[12].mxu1  ;;  %v927_v43 = vpop.f32.mrb[13].mxu0 }
  0xff   : > { %2106 = vst.msk [vmem:[%s3087_s27 + $0x12c] sm:$0xf] %vm2030_vm3, %v2560_v37  ;;  %2040 = vst.msk [vmem:[%s3087_s27 + $0x24] sm:$0xf] %vm2030_vm3, %v2494_v38  ;;  %v1192_v44 = vadd.f32 %v2761_v42, %v3075_v6  ;;  %v928_v45 = vadd.f32 %v3075_v6, %v927_v43  ;;  %v1183_v46 = vpop.f32.mrb[13].mxu1  ;;  %v2698_v47 = vpop.f32.mrb[14].mxu0 }
 0x100   : > { %2104 = vst.msk [vmem:[%s3087_s27 + $0x124] sm:$0xf] %vm2030_vm3, %v2558_v40  ;;  %v1404_v48 = vmax.f32 %v936_v41, 0.0  ;;  %v1184_v49 = vadd.f32 %v3075_v6, %v1183_v46  ;;  %v939_v50 = vadd.f32 %v2698_v47, %v3075_v6  ;;  %v2762_v51 = vpop.f32.mrb[14].mxu1  ;;  %v930_v52 = vpop.f32.mrb[15].mxu0 }
 0x101   : > { %v1468_v53 = vmax.f32 %v1192_v44, 0.0  ;;  %v1402_v54 = vmax.f32 %v928_v45, 0.0  ;;  %v1195_v55 = vadd.f32 %v2762_v51, %v3075_v6  ;;  %v931_v56 = vadd.f32 %v3075_v6, %v930_v52  ;;  %v1186_v57 = vpop.f32.mrb[15].mxu1 }
 0x102   : > { %v2499_v58 = vpack.c.bf16 %v1404_v48, %v1404_v48  ;;  %v1466_v59 = vmax.f32 %v1184_v49, 0.0  ;;  %v1405_v60 = vmax.f32 %v939_v50, 0.0  ;;  %v1187_v61 = vadd.f32 %v3075_v6, %v1186_v57 }
 0x103   : > { %v2563_v62 = vpack.c.bf16 %v1468_v53, %v1468_v53  ;;  %v2497_v63 = vpack.c.bf16 %v1402_v54, %v1402_v54  ;;  %v1469_v0 = vmax.f32 %v1195_v55, 0.0  ;;  %v1403_v1 = vmax.f32 %v931_v56, 0.0 }
 0x104   : > { %2045 = vst.msk [vmem:[%s3087_s27 + $0x38] sm:$0xf] %vm2030_vm3, %v2499_v58  ;;  %v2561_v2 = vpack.c.bf16 %v1466_v59, %v1466_v59  ;;  %v2500_v3 = vpack.c.bf16 %v1405_v60, %v1405_v60  ;;  %v1467_v4 = vmax.f32 %v1187_v61, 0.0 }
 0x105   : > { %2109 = vst.msk [vmem:[%s3087_s27 + $0x138] sm:$0xf] %vm2030_vm3, %v2563_v62  ;;  %2043 = vst.msk [vmem:[%s3087_s27 + $0x30] sm:$0xf] %vm2030_vm3, %v2497_v63  ;;  %v2564_v5 = vpack.c.bf16 %v1469_v0, %v1469_v0  ;;  %v2498_v7 = vpack.c.bf16 %v1403_v1, %v1403_v1  ;;  %v2701_v8 = vpop.f32.mrb[16].mxu0 }
 0x106   : > { %2107 = vst.msk [vmem:[%s3087_s27 + $0x130] sm:$0xf] %vm2030_vm3, %v2561_v2  ;;  %2046 = vst.msk [vmem:[%s3087_s27 + $0x3c] sm:$0xf] %vm2030_vm3, %v2500_v3  ;;  %v2562_v9 = vpack.c.bf16 %v1467_v4, %v1467_v4  ;;  %v952_v10 = vadd.f32 %v2701_v8, %v3075_v6  ;;  %v2765_v11 = vpop.f32.mrb[16].mxu1  ;;  %v943_v12 = vpop.f32.mrb[17].mxu0 }
 0x107   : > { %2110 = vst.msk [vmem:[%s3087_s27 + $0x13c] sm:$0xf] %vm2030_vm3, %v2564_v5  ;;  %2044 = vst.msk [vmem:[%s3087_s27 + $0x34] sm:$0xf] %vm2030_vm3, %v2498_v7  ;;  %v1208_v13 = vadd.f32 %v2765_v11, %v3075_v6  ;;  %v944_v14 = vadd.f32 %v3075_v6, %v943_v12  ;;  %v1199_v15 = vpop.f32.mrb[17].mxu1  ;;  %v2702_v16 = vpop.f32.mrb[18].mxu0 }
 0x108   : > { %2108 = vst.msk [vmem:[%s3087_s27 + $0x134] sm:$0xf] %vm2030_vm3, %v2562_v9  ;;  %v1408_v17 = vmax.f32 %v952_v10, 0.0  ;;  %v1200_v18 = vadd.f32 %v3075_v6, %v1199_v15  ;;  %v955_v19 = vadd.f32 %v2702_v16, %v3075_v6  ;;  %v2766_v20 = vpop.f32.mrb[18].mxu1  ;;  %v946_v21 = vpop.f32.mrb[19].mxu0 }
 0x109   : > { %v1472_v22 = vmax.f32 %v1208_v13, 0.0  ;;  %v1406_v23 = vmax.f32 %v944_v14, 0.0  ;;  %v1211_v24 = vadd.f32 %v2766_v20, %v3075_v6  ;;  %v947_v25 = vadd.f32 %v3075_v6, %v946_v21  ;;  %v1202_v26 = vpop.f32.mrb[19].mxu1 }
 0x10a   : > { %v2503_v27 = vpack.c.bf16 %v1408_v17, %v1408_v17  ;;  %v1470_v28 = vmax.f32 %v1200_v18, 0.0  ;;  %v1409_v29 = vmax.f32 %v955_v19, 0.0  ;;  %v1203_v30 = vadd.f32 %v3075_v6, %v1202_v26 }
 0x10b   : > { %v2567_v31 = vpack.c.bf16 %v1472_v22, %v1472_v22  ;;  %v2501_v32 = vpack.c.bf16 %v1406_v23, %v1406_v23  ;;  %v1473_v33 = vmax.f32 %v1211_v24, 0.0  ;;  %v1407_v34 = vmax.f32 %v947_v25, 0.0 }
 0x10c   : > { %2049 = vst.msk [vmem:[%s3087_s27 + $0x48] sm:$0xf] %vm2030_vm3, %v2503_v27  ;;  %v2565_v35 = vpack.c.bf16 %v1470_v28, %v1470_v28  ;;  %v2504_v36 = vpack.c.bf16 %v1409_v29, %v1409_v29  ;;  %v1471_v37 = vmax.f32 %v1203_v30, 0.0 }
 0x10d   : > { %2113 = vst.msk [vmem:[%s3087_s27 + $0x148] sm:$0xf] %vm2030_vm3, %v2567_v31  ;;  %2047 = vst.msk [vmem:[%s3087_s27 + $0x40] sm:$0xf] %vm2030_vm3, %v2501_v32  ;;  %v2568_v38 = vpack.c.bf16 %v1473_v33, %v1473_v33  ;;  %v2502_v39 = vpack.c.bf16 %v1407_v34, %v1407_v34  ;;  %v2705_v40 = vpop.f32.mrb[20].mxu0 }
 0x10e   : > { %2111 = vst.msk [vmem:[%s3087_s27 + $0x140] sm:$0xf] %vm2030_vm3, %v2565_v35  ;;  %2050 = vst.msk [vmem:[%s3087_s27 + $0x4c] sm:$0xf] %vm2030_vm3, %v2504_v36  ;;  %v2566_v41 = vpack.c.bf16 %v1471_v37, %v1471_v37  ;;  %v968_v42 = vadd.f32 %v2705_v40, %v3075_v6  ;;  %v2769_v43 = vpop.f32.mrb[20].mxu1  ;;  %v959_v44 = vpop.f32.mrb[21].mxu0 }
 0x10f   : > { %2114 = vst.msk [vmem:[%s3087_s27 + $0x14c] sm:$0xf] %vm2030_vm3, %v2568_v38  ;;  %2048 = vst.msk [vmem:[%s3087_s27 + $0x44] sm:$0xf] %vm2030_vm3, %v2502_v39  ;;  %v1224_v45 = vadd.f32 %v2769_v43, %v3075_v6  ;;  %v960_v46 = vadd.f32 %v3075_v6, %v959_v44  ;;  %v1215_v47 = vpop.f32.mrb[21].mxu1  ;;  %v2706_v48 = vpop.f32.mrb[22].mxu0 }
 0x110   : > { %2112 = vst.msk [vmem:[%s3087_s27 + $0x144] sm:$0xf] %vm2030_vm3, %v2566_v41  ;;  %v1412_v49 = vmax.f32 %v968_v42, 0.0  ;;  %v1216_v50 = vadd.f32 %v3075_v6, %v1215_v47  ;;  %v971_v51 = vadd.f32 %v2706_v48, %v3075_v6  ;;  %v2770_v52 = vpop.f32.mrb[22].mxu1  ;;  %v962_v53 = vpop.f32.mrb[23].mxu0 }
 0x111   : > { %v1476_v54 = vmax.f32 %v1224_v45, 0.0  ;;  %v1410_v55 = vmax.f32 %v960_v46, 0.0  ;;  %v1227_v56 = vadd.f32 %v2770_v52, %v3075_v6  ;;  %v963_v57 = vadd.f32 %v3075_v6, %v962_v53  ;;  %v1218_v58 = vpop.f32.mrb[23].mxu1 }
 0x112   : > { %v2507_v59 = vpack.c.bf16 %v1412_v49, %v1412_v49  ;;  %v1474_v60 = vmax.f32 %v1216_v50, 0.0  ;;  %v1413_v61 = vmax.f32 %v971_v51, 0.0  ;;  %v1219_v62 = vadd.f32 %v3075_v6, %v1218_v58 }
 0x113   : > { %v2571_v63 = vpack.c.bf16 %v1476_v54, %v1476_v54  ;;  %v2505_v0 = vpack.c.bf16 %v1410_v55, %v1410_v55  ;;  %v1477_v1 = vmax.f32 %v1227_v56, 0.0  ;;  %v1411_v2 = vmax.f32 %v963_v57, 0.0 }
 0x114   : > { %2053 = vst.msk [vmem:[%s3087_s27 + $0x58] sm:$0xf] %vm2030_vm3, %v2507_v59  ;;  %v2569_v3 = vpack.c.bf16 %v1474_v60, %v1474_v60  ;;  %v2508_v4 = vpack.c.bf16 %v1413_v61, %v1413_v61  ;;  %v1475_v5 = vmax.f32 %v1219_v62, 0.0 }
 0x115   : > { %2117 = vst.msk [vmem:[%s3087_s27 + $0x158] sm:$0xf] %vm2030_vm3, %v2571_v63  ;;  %2051 = vst.msk [vmem:[%s3087_s27 + $0x50] sm:$0xf] %vm2030_vm3, %v2505_v0  ;;  %v2572_v7 = vpack.c.bf16 %v1477_v1, %v1477_v1  ;;  %v2506_v8 = vpack.c.bf16 %v1411_v2, %v1411_v2  ;;  %v2709_v9 = vpop.f32.mrb[24].mxu0 }
 0x116   : > { %2115 = vst.msk [vmem:[%s3087_s27 + $0x150] sm:$0xf] %vm2030_vm3, %v2569_v3  ;;  %2054 = vst.msk [vmem:[%s3087_s27 + $0x5c] sm:$0xf] %vm2030_vm3, %v2508_v4  ;;  %v2570_v10 = vpack.c.bf16 %v1475_v5, %v1475_v5  ;;  %v984_v11 = vadd.f32 %v2709_v9, %v3075_v6  ;;  %v2773_v12 = vpop.f32.mrb[24].mxu1  ;;  %v975_v13 = vpop.f32.mrb[25].mxu0 }
 0x117   : > { %2118 = vst.msk [vmem:[%s3087_s27 + $0x15c] sm:$0xf] %vm2030_vm3, %v2572_v7  ;;  %2052 = vst.msk [vmem:[%s3087_s27 + $0x54] sm:$0xf] %vm2030_vm3, %v2506_v8  ;;  %v1240_v14 = vadd.f32 %v2773_v12, %v3075_v6  ;;  %v976_v15 = vadd.f32 %v3075_v6, %v975_v13  ;;  %v1231_v16 = vpop.f32.mrb[25].mxu1  ;;  %v2710_v17 = vpop.f32.mrb[26].mxu0 }
 0x118   : > { %2116 = vst.msk [vmem:[%s3087_s27 + $0x154] sm:$0xf] %vm2030_vm3, %v2570_v10  ;;  %v1416_v18 = vmax.f32 %v984_v11, 0.0  ;;  %v1232_v19 = vadd.f32 %v3075_v6, %v1231_v16  ;;  %v987_v20 = vadd.f32 %v2710_v17, %v3075_v6  ;;  %v2774_v21 = vpop.f32.mrb[26].mxu1  ;;  %v978_v22 = vpop.f32.mrb[27].mxu0 }
 0x119   : > { %v1480_v23 = vmax.f32 %v1240_v14, 0.0  ;;  %v1414_v24 = vmax.f32 %v976_v15, 0.0  ;;  %v1243_v25 = vadd.f32 %v2774_v21, %v3075_v6  ;;  %v979_v26 = vadd.f32 %v3075_v6, %v978_v22  ;;  %v1234_v27 = vpop.f32.mrb[27].mxu1 }
 0x11a   : > { %v2511_v28 = vpack.c.bf16 %v1416_v18, %v1416_v18  ;;  %v1478_v29 = vmax.f32 %v1232_v19, 0.0  ;;  %v1417_v30 = vmax.f32 %v987_v20, 0.0  ;;  %v1235_v31 = vadd.f32 %v3075_v6, %v1234_v27 }
 0x11b   : > { %v2575_v32 = vpack.c.bf16 %v1480_v23, %v1480_v23  ;;  %v2509_v33 = vpack.c.bf16 %v1414_v24, %v1414_v24  ;;  %v1481_v34 = vmax.f32 %v1243_v25, 0.0  ;;  %v1415_v35 = vmax.f32 %v979_v26, 0.0 }
 0x11c   : > { %2057 = vst.msk [vmem:[%s3087_s27 + $0x68] sm:$0xf] %vm2030_vm3, %v2511_v28  ;;  %v2573_v36 = vpack.c.bf16 %v1478_v29, %v1478_v29  ;;  %v2512_v37 = vpack.c.bf16 %v1417_v30, %v1417_v30  ;;  %v1479_v38 = vmax.f32 %v1235_v31, 0.0 }
 0x11d   : > { %2121 = vst.msk [vmem:[%s3087_s27 + $0x168] sm:$0xf] %vm2030_vm3, %v2575_v32  ;;  %2055 = vst.msk [vmem:[%s3087_s27 + $0x60] sm:$0xf] %vm2030_vm3, %v2509_v33  ;;  %v2576_v39 = vpack.c.bf16 %v1481_v34, %v1481_v34  ;;  %v2510_v40 = vpack.c.bf16 %v1415_v35, %v1415_v35  ;;  %v2713_v41 = vpop.f32.mrb[28].mxu0 }
 0x11e   : > { %2119 = vst.msk [vmem:[%s3087_s27 + $0x160] sm:$0xf] %vm2030_vm3, %v2573_v36  ;;  %2058 = vst.msk [vmem:[%s3087_s27 + $0x6c] sm:$0xf] %vm2030_vm3, %v2512_v37  ;;  %v2574_v42 = vpack.c.bf16 %v1479_v38, %v1479_v38  ;;  %v1000_v43 = vadd.f32 %v2713_v41, %v3075_v6  ;;  %v2777_v44 = vpop.f32.mrb[28].mxu1  ;;  %v991_v45 = vpop.f32.mrb[29].mxu0 }
 0x11f   : > { %2122 = vst.msk [vmem:[%s3087_s27 + $0x16c] sm:$0xf] %vm2030_vm3, %v2576_v39  ;;  %2056 = vst.msk [vmem:[%s3087_s27 + $0x64] sm:$0xf] %vm2030_vm3, %v2510_v40  ;;  %v1256_v46 = vadd.f32 %v2777_v44, %v3075_v6  ;;  %v992_v47 = vadd.f32 %v3075_v6, %v991_v45  ;;  %v1247_v48 = vpop.f32.mrb[29].mxu1  ;;  %v2714_v49 = vpop.f32.mrb[30].mxu0 }
 0x120   : > { %2120 = vst.msk [vmem:[%s3087_s27 + $0x164] sm:$0xf] %vm2030_vm3, %v2574_v42  ;;  %v1420_v50 = vmax.f32 %v1000_v43, 0.0  ;;  %v1248_v51 = vadd.f32 %v3075_v6, %v1247_v48  ;;  %v1003_v52 = vadd.f32 %v2714_v49, %v3075_v6  ;;  %v2778_v53 = vpop.f32.mrb[30].mxu1  ;;  %v994_v54 = vpop.f32.mrb[31].mxu0 }
 0x121   : > { %v1484_v55 = vmax.f32 %v1256_v46, 0.0  ;;  %v1418_v56 = vmax.f32 %v992_v47, 0.0  ;;  %v1259_v57 = vadd.f32 %v2778_v53, %v3075_v6  ;;  %v995_v58 = vadd.f32 %v3075_v6, %v994_v54  ;;  %v1250_v59 = vpop.f32.mrb[31].mxu1 }
 0x122   : > { %v2515_v60 = vpack.c.bf16 %v1420_v50, %v1420_v50  ;;  %v1482_v61 = vmax.f32 %v1248_v51, 0.0  ;;  %v1421_v62 = vmax.f32 %v1003_v52, 0.0  ;;  %v1251_v63 = vadd.f32 %v3075_v6, %v1250_v59 }
 0x123   : > { %v2579_v0 = vpack.c.bf16 %v1484_v55, %v1484_v55  ;;  %v2513_v1 = vpack.c.bf16 %v1418_v56, %v1418_v56  ;;  %v1485_v2 = vmax.f32 %v1259_v57, 0.0  ;;  %v1419_v3 = vmax.f32 %v995_v58, 0.0 }
 0x124   : > { %2061 = vst.msk [vmem:[%s3087_s27 + $0x78] sm:$0xf] %vm2030_vm3, %v2515_v60  ;;  %v2577_v4 = vpack.c.bf16 %v1482_v61, %v1482_v61  ;;  %v2516_v5 = vpack.c.bf16 %v1421_v62, %v1421_v62  ;;  %v1483_v7 = vmax.f32 %v1251_v63, 0.0 }
 0x125   : > { %2125 = vst.msk [vmem:[%s3087_s27 + $0x178] sm:$0xf] %vm2030_vm3, %v2579_v0  ;;  %2059 = vst.msk [vmem:[%s3087_s27 + $0x70] sm:$0xf] %vm2030_vm3, %v2513_v1  ;;  %v2580_v8 = vpack.c.bf16 %v1485_v2, %v1485_v2  ;;  %v2514_v9 = vpack.c.bf16 %v1419_v3, %v1419_v3  ;;  %v2717_v10 = vpop.f32.mrb[32].mxu0 }
 0x126   : > { %2123 = vst.msk [vmem:[%s3087_s27 + $0x170] sm:$0xf] %vm2030_vm3, %v2577_v4  ;;  %2062 = vst.msk [vmem:[%s3087_s27 + $0x7c] sm:$0xf] %vm2030_vm3, %v2516_v5  ;;  %v2578_v11 = vpack.c.bf16 %v1483_v7, %v1483_v7  ;;  %v1016_v12 = vadd.f32 %v2717_v10, %v3075_v6  ;;  %v2781_v13 = vpop.f32.mrb[32].mxu1  ;;  %v1007_v14 = vpop.f32.mrb[33].mxu0 }
 0x127   : > { %2126 = vst.msk [vmem:[%s3087_s27 + $0x17c] sm:$0xf] %vm2030_vm3, %v2580_v8  ;;  %2060 = vst.msk [vmem:[%s3087_s27 + $0x74] sm:$0xf] %vm2030_vm3, %v2514_v9  ;;  %v1272_v15 = vadd.f32 %v2781_v13, %v3075_v6  ;;  %v1008_v16 = vadd.f32 %v3075_v6, %v1007_v14  ;;  %v1263_v17 = vpop.f32.mrb[33].mxu1  ;;  %v2718_v18 = vpop.f32.mrb[34].mxu0 }
 0x128   : > { %2124 = vst.msk [vmem:[%s3087_s27 + $0x174] sm:$0xf] %vm2030_vm3, %v2578_v11  ;;  %v1424_v19 = vmax.f32 %v1016_v12, 0.0  ;;  %v1264_v20 = vadd.f32 %v3075_v6, %v1263_v17  ;;  %v1019_v21 = vadd.f32 %v2718_v18, %v3075_v6  ;;  %v2782_v22 = vpop.f32.mrb[34].mxu1  ;;  %v1010_v23 = vpop.f32.mrb[35].mxu0 }
 0x129   : > { %v1488_v24 = vmax.f32 %v1272_v15, 0.0  ;;  %v1422_v25 = vmax.f32 %v1008_v16, 0.0  ;;  %v1275_v26 = vadd.f32 %v2782_v22, %v3075_v6  ;;  %v1011_v27 = vadd.f32 %v3075_v6, %v1010_v23  ;;  %v1266_v28 = vpop.f32.mrb[35].mxu1 }
 0x12a   : > { %v2519_v29 = vpack.c.bf16 %v1424_v19, %v1424_v19  ;;  %v1486_v30 = vmax.f32 %v1264_v20, 0.0  ;;  %v1425_v31 = vmax.f32 %v1019_v21, 0.0  ;;  %v1267_v32 = vadd.f32 %v3075_v6, %v1266_v28 }
 0x12b   : > { %v2583_v33 = vpack.c.bf16 %v1488_v24, %v1488_v24  ;;  %v2517_v34 = vpack.c.bf16 %v1422_v25, %v1422_v25  ;;  %v1489_v35 = vmax.f32 %v1275_v26, 0.0  ;;  %v1423_v36 = vmax.f32 %v1011_v27, 0.0 }
 0x12c   : > { %2065 = vst.msk [vmem:[%s3087_s27 + $0x88] sm:$0xf] %vm2030_vm3, %v2519_v29  ;;  %v2581_v37 = vpack.c.bf16 %v1486_v30, %v1486_v30  ;;  %v2520_v38 = vpack.c.bf16 %v1425_v31, %v1425_v31  ;;  %v1487_v39 = vmax.f32 %v1267_v32, 0.0 }
 0x12d   : > { %2129 = vst.msk [vmem:[%s3087_s27 + $0x188] sm:$0xf] %vm2030_vm3, %v2583_v33  ;;  %2063 = vst.msk [vmem:[%s3087_s27 + $0x80] sm:$0xf] %vm2030_vm3, %v2517_v34  ;;  %v2584_v40 = vpack.c.bf16 %v1489_v35, %v1489_v35  ;;  %v2518_v41 = vpack.c.bf16 %v1423_v36, %v1423_v36  ;;  %v2721_v42 = vpop.f32.mrb[36].mxu0 }
 0x12e   : > { %2127 = vst.msk [vmem:[%s3087_s27 + $0x180] sm:$0xf] %vm2030_vm3, %v2581_v37  ;;  %2066 = vst.msk [vmem:[%s3087_s27 + $0x8c] sm:$0xf] %vm2030_vm3, %v2520_v38  ;;  %v2582_v43 = vpack.c.bf16 %v1487_v39, %v1487_v39  ;;  %v1032_v44 = vadd.f32 %v2721_v42, %v3075_v6  ;;  %v2785_v45 = vpop.f32.mrb[36].mxu1  ;;  %v1023_v46 = vpop.f32.mrb[37].mxu0 }
 0x12f   : > { %2130 = vst.msk [vmem:[%s3087_s27 + $0x18c] sm:$0xf] %vm2030_vm3, %v2584_v40  ;;  %2064 = vst.msk [vmem:[%s3087_s27 + $0x84] sm:$0xf] %vm2030_vm3, %v2518_v41  ;;  %v1288_v47 = vadd.f32 %v2785_v45, %v3075_v6  ;;  %v1024_v48 = vadd.f32 %v3075_v6, %v1023_v46  ;;  %v1279_v49 = vpop.f32.mrb[37].mxu1  ;;  %v2722_v50 = vpop.f32.mrb[38].mxu0 }
 0x130   : > { %2128 = vst.msk [vmem:[%s3087_s27 + $0x184] sm:$0xf] %vm2030_vm3, %v2582_v43  ;;  %v1428_v51 = vmax.f32 %v1032_v44, 0.0  ;;  %v1280_v52 = vadd.f32 %v3075_v6, %v1279_v49  ;;  %v1035_v53 = vadd.f32 %v2722_v50, %v3075_v6  ;;  %v2786_v54 = vpop.f32.mrb[38].mxu1  ;;  %v1026_v55 = vpop.f32.mrb[39].mxu0 }
 0x131   : > { %v1492_v56 = vmax.f32 %v1288_v47, 0.0  ;;  %v1426_v57 = vmax.f32 %v1024_v48, 0.0  ;;  %v1291_v58 = vadd.f32 %v2786_v54, %v3075_v6  ;;  %v1027_v59 = vadd.f32 %v3075_v6, %v1026_v55  ;;  %v1282_v60 = vpop.f32.mrb[39].mxu1 }
 0x132   : > { %v2523_v61 = vpack.c.bf16 %v1428_v51, %v1428_v51  ;;  %v1490_v62 = vmax.f32 %v1280_v52, 0.0  ;;  %v1429_v63 = vmax.f32 %v1035_v53, 0.0  ;;  %v1283_v0 = vadd.f32 %v3075_v6, %v1282_v60 }
 0x133   : > { %v2587_v1 = vpack.c.bf16 %v1492_v56, %v1492_v56  ;;  %v2521_v2 = vpack.c.bf16 %v1426_v57, %v1426_v57  ;;  %v1493_v3 = vmax.f32 %v1291_v58, 0.0  ;;  %v1427_v4 = vmax.f32 %v1027_v59, 0.0 }
 0x134   : > { %2069 = vst.msk [vmem:[%s3087_s27 + $0x98] sm:$0xf] %vm2030_vm3, %v2523_v61  ;;  %v2585_v5 = vpack.c.bf16 %v1490_v62, %v1490_v62  ;;  %v2524_v7 = vpack.c.bf16 %v1429_v63, %v1429_v63  ;;  %v1491_v8 = vmax.f32 %v1283_v0, 0.0 }
 0x135   : > { %2133 = vst.msk [vmem:[%s3087_s27 + $0x198] sm:$0xf] %vm2030_vm3, %v2587_v1  ;;  %2067 = vst.msk [vmem:[%s3087_s27 + $0x90] sm:$0xf] %vm2030_vm3, %v2521_v2  ;;  %v2588_v9 = vpack.c.bf16 %v1493_v3, %v1493_v3  ;;  %v2522_v10 = vpack.c.bf16 %v1427_v4, %v1427_v4  ;;  %v2725_v11 = vpop.f32.mrb[40].mxu0 }
 0x136   : > { %2131 = vst.msk [vmem:[%s3087_s27 + $0x190] sm:$0xf] %vm2030_vm3, %v2585_v5  ;;  %2070 = vst.msk [vmem:[%s3087_s27 + $0x9c] sm:$0xf] %vm2030_vm3, %v2524_v7  ;;  %v2586_v12 = vpack.c.bf16 %v1491_v8, %v1491_v8  ;;  %v1048_v13 = vadd.f32 %v2725_v11, %v3075_v6  ;;  %v2789_v14 = vpop.f32.mrb[40].mxu1  ;;  %v1039_v15 = vpop.f32.mrb[41].mxu0 }
 0x137   : > { %2134 = vst.msk [vmem:[%s3087_s27 + $0x19c] sm:$0xf] %vm2030_vm3, %v2588_v9  ;;  %2068 = vst.msk [vmem:[%s3087_s27 + $0x94] sm:$0xf] %vm2030_vm3, %v2522_v10  ;;  %v1304_v16 = vadd.f32 %v2789_v14, %v3075_v6  ;;  %v1040_v17 = vadd.f32 %v3075_v6, %v1039_v15  ;;  %v1295_v18 = vpop.f32.mrb[41].mxu1  ;;  %v2726_v19 = vpop.f32.mrb[42].mxu0 }
 0x138   : > { %2132 = vst.msk [vmem:[%s3087_s27 + $0x194] sm:$0xf] %vm2030_vm3, %v2586_v12  ;;  %v1432_v20 = vmax.f32 %v1048_v13, 0.0  ;;  %v1296_v21 = vadd.f32 %v3075_v6, %v1295_v18  ;;  %v1051_v22 = vadd.f32 %v2726_v19, %v3075_v6  ;;  %v2790_v23 = vpop.f32.mrb[42].mxu1  ;;  %v1042_v24 = vpop.f32.mrb[43].mxu0 }
 0x139   : > { %v1496_v25 = vmax.f32 %v1304_v16, 0.0  ;;  %v1430_v26 = vmax.f32 %v1040_v17, 0.0  ;;  %v1307_v27 = vadd.f32 %v2790_v23, %v3075_v6  ;;  %v1043_v28 = vadd.f32 %v3075_v6, %v1042_v24  ;;  %v1298_v29 = vpop.f32.mrb[43].mxu1 }
 0x13a   : > { %v2527_v30 = vpack.c.bf16 %v1432_v20, %v1432_v20  ;;  %v1494_v31 = vmax.f32 %v1296_v21, 0.0  ;;  %v1433_v32 = vmax.f32 %v1051_v22, 0.0  ;;  %v1299_v33 = vadd.f32 %v3075_v6, %v1298_v29 }
 0x13b   : > { %v2591_v34 = vpack.c.bf16 %v1496_v25, %v1496_v25  ;;  %v2525_v35 = vpack.c.bf16 %v1430_v26, %v1430_v26  ;;  %v1497_v36 = vmax.f32 %v1307_v27, 0.0  ;;  %v1431_v37 = vmax.f32 %v1043_v28, 0.0 }
 0x13c   : > { %2073 = vst.msk [vmem:[%s3087_s27 + $0xa8] sm:$0xf] %vm2030_vm3, %v2527_v30  ;;  %v2589_v38 = vpack.c.bf16 %v1494_v31, %v1494_v31  ;;  %v2528_v39 = vpack.c.bf16 %v1433_v32, %v1433_v32  ;;  %v1495_v40 = vmax.f32 %v1299_v33, 0.0 }
 0x13d   : > { %2137 = vst.msk [vmem:[%s3087_s27 + $0x1a8] sm:$0xf] %vm2030_vm3, %v2591_v34  ;;  %2071 = vst.msk [vmem:[%s3087_s27 + $0xa0] sm:$0xf] %vm2030_vm3, %v2525_v35  ;;  %v2592_v41 = vpack.c.bf16 %v1497_v36, %v1497_v36  ;;  %v2526_v42 = vpack.c.bf16 %v1431_v37, %v1431_v37  ;;  %v2729_v43 = vpop.f32.mrb[44].mxu0 }
 0x13e   : > { %2135 = vst.msk [vmem:[%s3087_s27 + $0x1a0] sm:$0xf] %vm2030_vm3, %v2589_v38  ;;  %2074 = vst.msk [vmem:[%s3087_s27 + $0xac] sm:$0xf] %vm2030_vm3, %v2528_v39  ;;  %v2590_v44 = vpack.c.bf16 %v1495_v40, %v1495_v40  ;;  %v1064_v45 = vadd.f32 %v2729_v43, %v3075_v6  ;;  %v2793_v46 = vpop.f32.mrb[44].mxu1  ;;  %v1055_v47 = vpop.f32.mrb[45].mxu0 }
 0x13f   : > { %2138 = vst.msk [vmem:[%s3087_s27 + $0x1ac] sm:$0xf] %vm2030_vm3, %v2592_v41  ;;  %2072 = vst.msk [vmem:[%s3087_s27 + $0xa4] sm:$0xf] %vm2030_vm3, %v2526_v42  ;;  %v1320_v48 = vadd.f32 %v2793_v46, %v3075_v6  ;;  %v1056_v49 = vadd.f32 %v3075_v6, %v1055_v47  ;;  %v1311_v50 = vpop.f32.mrb[45].mxu1  ;;  %v2730_v51 = vpop.f32.mrb[46].mxu0 }
 0x140   : > { %2136 = vst.msk [vmem:[%s3087_s27 + $0x1a4] sm:$0xf] %vm2030_vm3, %v2590_v44  ;;  %v1436_v52 = vmax.f32 %v1064_v45, 0.0  ;;  %v1312_v53 = vadd.f32 %v3075_v6, %v1311_v50  ;;  %v1067_v54 = vadd.f32 %v2730_v51, %v3075_v6  ;;  %v2794_v55 = vpop.f32.mrb[46].mxu1  ;;  %v1058_v56 = vpop.f32.mrb[47].mxu0 }
 0x141   : > { %v1500_v57 = vmax.f32 %v1320_v48, 0.0  ;;  %v1434_v58 = vmax.f32 %v1056_v49, 0.0  ;;  %v1323_v59 = vadd.f32 %v2794_v55, %v3075_v6  ;;  %v1059_v60 = vadd.f32 %v3075_v6, %v1058_v56  ;;  %v1314_v61 = vpop.f32.mrb[47].mxu1  ;;  %v3393_v45 = vld [vmem:[%s3478_s2] ss:$0 sm:$0xff] }
 0x142   : > { %v2531_v62 = vpack.c.bf16 %v1436_v52, %v1436_v52  ;;  %v1498_v63 = vmax.f32 %v1312_v53, 0.0  ;;  %v1437_v0 = vmax.f32 %v1067_v54, 0.0  ;;  %v1315_v1 = vadd.f32 %v3075_v6, %v1314_v61 }
 0x143   : > { %v2595_v2 = vpack.c.bf16 %v1500_v57, %v1500_v57  ;;  %v2529_v3 = vpack.c.bf16 %v1434_v58, %v1434_v58  ;;  %v1501_v4 = vmax.f32 %v1323_v59, 0.0  ;;  %v1435_v5 = vmax.f32 %v1059_v60, 0.0 }
 0x144   : > { %2077 = vst.msk [vmem:[%s3087_s27 + $0xb8] sm:$0xf] %vm2030_vm3, %v2531_v62  ;;  %v2593_v7 = vpack.c.bf16 %v1498_v63, %v1498_v63  ;;  %v2532_v8 = vpack.c.bf16 %v1437_v0, %v1437_v0  ;;  %v1499_v9 = vmax.f32 %v1315_v1, 0.0 }
 0x145   : > { %2141 = vst.msk [vmem:[%s3087_s27 + $0x1b8] sm:$0xf] %vm2030_vm3, %v2595_v2  ;;  %2075 = vst.msk [vmem:[%s3087_s27 + $0xb0] sm:$0xf] %vm2030_vm3, %v2529_v3  ;;  %v2596_v10 = vpack.c.bf16 %v1501_v4, %v1501_v4  ;;  %v2530_v11 = vpack.c.bf16 %v1435_v5, %v1435_v5  ;;  %v2733_v12 = vpop.f32.mrb[48].mxu0 }
 0x146   : > { %2139 = vst.msk [vmem:[%s3087_s27 + $0x1b0] sm:$0xf] %vm2030_vm3, %v2593_v7  ;;  %2078 = vst.msk [vmem:[%s3087_s27 + $0xbc] sm:$0xf] %vm2030_vm3, %v2532_v8  ;;  %v2594_v13 = vpack.c.bf16 %v1499_v9, %v1499_v9  ;;  %v1080_v14 = vadd.f32 %v2733_v12, %v3075_v6  ;;  %v2797_v15 = vpop.f32.mrb[48].mxu1  ;;  %v1071_v16 = vpop.f32.mrb[49].mxu0 }
 0x147   : > { %2142 = vst.msk [vmem:[%s3087_s27 + $0x1bc] sm:$0xf] %vm2030_vm3, %v2596_v10  ;;  %2076 = vst.msk [vmem:[%s3087_s27 + $0xb4] sm:$0xf] %vm2030_vm3, %v2530_v11  ;;  %v1336_v17 = vadd.f32 %v2797_v15, %v3075_v6  ;;  %v1072_v18 = vadd.f32 %v3075_v6, %v1071_v16  ;;  %v1327_v19 = vpop.f32.mrb[49].mxu1  ;;  %v2734_v20 = vpop.f32.mrb[50].mxu0 }
 0x148   : > { %2140 = vst.msk [vmem:[%s3087_s27 + $0x1b4] sm:$0xf] %vm2030_vm3, %v2594_v13  ;;  %v1440_v21 = vmax.f32 %v1080_v14, 0.0  ;;  %v1328_v22 = vadd.f32 %v3075_v6, %v1327_v19  ;;  %v1083_v23 = vadd.f32 %v2734_v20, %v3075_v6  ;;  %v2798_v24 = vpop.f32.mrb[50].mxu1  ;;  %v1074_v25 = vpop.f32.mrb[51].mxu0 }
 0x149   : > { %v1504_v26 = vmax.f32 %v1336_v17, 0.0  ;;  %v1438_v27 = vmax.f32 %v1072_v18, 0.0  ;;  %v1339_v28 = vadd.f32 %v2798_v24, %v3075_v6  ;;  %v1075_v29 = vadd.f32 %v3075_v6, %v1074_v25  ;;  %v1330_v30 = vpop.f32.mrb[51].mxu1 }
 0x14a   : > { %v2535_v31 = vpack.c.bf16 %v1440_v21, %v1440_v21  ;;  %v1502_v32 = vmax.f32 %v1328_v22, 0.0  ;;  %v1441_v33 = vmax.f32 %v1083_v23, 0.0  ;;  %v1331_v34 = vadd.f32 %v3075_v6, %v1330_v30 }
 0x14b   : > { %v2599_v35 = vpack.c.bf16 %v1504_v26, %v1504_v26  ;;  %v2533_v36 = vpack.c.bf16 %v1438_v27, %v1438_v27  ;;  %v1505_v37 = vmax.f32 %v1339_v28, 0.0  ;;  %v1439_v38 = vmax.f32 %v1075_v29, 0.0 }
 0x14c   : > { %2081 = vst.msk [vmem:[%s3087_s27 + $0xc8] sm:$0xf] %vm2030_vm3, %v2535_v31  ;;  %v2597_v39 = vpack.c.bf16 %v1502_v32, %v1502_v32  ;;  %v2536_v40 = vpack.c.bf16 %v1441_v33, %v1441_v33  ;;  %v1503_v41 = vmax.f32 %v1331_v34, 0.0 }
 0x14d   : > { %2145 = vst.msk [vmem:[%s3087_s27 + $0x1c8] sm:$0xf] %vm2030_vm3, %v2599_v35  ;;  %2079 = vst.msk [vmem:[%s3087_s27 + $0xc0] sm:$0xf] %vm2030_vm3, %v2533_v36  ;;  %v2600_v42 = vpack.c.bf16 %v1505_v37, %v1505_v37  ;;  %v2534_v43 = vpack.c.bf16 %v1439_v38, %v1439_v38  ;;  %v2737_v44 = vpop.f32.mrb[52].mxu0 }
 0x14e   : > { %2143 = vst.msk [vmem:[%s3087_s27 + $0x1c0] sm:$0xf] %vm2030_vm3, %v2597_v39  ;;  %2082 = vst.msk [vmem:[%s3087_s27 + $0xcc] sm:$0xf] %vm2030_vm3, %v2536_v40  ;;  %v2598_v6 = vpack.c.bf16 %v1503_v41, %v1503_v41  ;;  %v1096_v46 = vadd.f32 %v3393_v45, %v2737_v44  ;;  %v2801_v47 = vpop.f32.mrb[52].mxu1  ;;  %v1087_v48 = vpop.f32.mrb[53].mxu0 }
 0x14f   : > { %2146 = vst.msk [vmem:[%s3087_s27 + $0x1cc] sm:$0xf] %vm2030_vm3, %v2600_v42  ;;  %2080 = vst.msk [vmem:[%s3087_s27 + $0xc4] sm:$0xf] %vm2030_vm3, %v2534_v43  ;;  %v1352_v49 = vadd.f32 %v3393_v45, %v2801_v47  ;;  %v1088_v50 = vadd.f32 %v3393_v45, %v1087_v48  ;;  %v1343_v51 = vpop.f32.mrb[53].mxu1  ;;  %v2738_v52 = vpop.f32.mrb[54].mxu0 }
 0x150   : > { %2144 = vst.msk [vmem:[%s3087_s27 + $0x1c4] sm:$0xf] %vm2030_vm3, %v2598_v6  ;;  %v1444_v53 = vmax.f32 %v1096_v46, 0.0  ;;  %v1344_v54 = vadd.f32 %v3393_v45, %v1343_v51  ;;  %v1099_v55 = vadd.f32 %v3393_v45, %v2738_v52  ;;  %v2802_v56 = vpop.f32.mrb[54].mxu1  ;;  %v1090_v57 = vpop.f32.mrb[55].mxu0 }
 0x151   : > { %v1508_v58 = vmax.f32 %v1352_v49, 0.0  ;;  %v1442_v59 = vmax.f32 %v1088_v50, 0.0  ;;  %v1355_v60 = vadd.f32 %v3393_v45, %v2802_v56  ;;  %v1091_v61 = vadd.f32 %v3393_v45, %v1090_v57  ;;  %v1346_v62 = vpop.f32.mrb[55].mxu1 }
 0x152   : > { %v2539_v63 = vpack.c.bf16 %v1444_v53, %v1444_v53  ;;  %v1506_v0 = vmax.f32 %v1344_v54, 0.0  ;;  %v1445_v1 = vmax.f32 %v1099_v55, 0.0  ;;  %v1347_v2 = vadd.f32 %v3393_v45, %v1346_v62 }
 0x153   : > { %v2603_v3 = vpack.c.bf16 %v1508_v58, %v1508_v58  ;;  %v2537_v4 = vpack.c.bf16 %v1442_v59, %v1442_v59  ;;  %v1509_v5 = vmax.f32 %v1355_v60, 0.0  ;;  %v1443_v7 = vmax.f32 %v1091_v61, 0.0 }
 0x154   : > { %2085 = vst.msk [vmem:[%s3087_s27 + $0xd8] sm:$0xf] %vm2030_vm3, %v2539_v63  ;;  %v2601_v8 = vpack.c.bf16 %v1506_v0, %v1506_v0  ;;  %v2540_v9 = vpack.c.bf16 %v1445_v1, %v1445_v1  ;;  %v1507_v10 = vmax.f32 %v1347_v2, 0.0 }
 0x155   : > { %2149 = vst.msk [vmem:[%s3087_s27 + $0x1d8] sm:$0xf] %vm2030_vm3, %v2603_v3  ;;  %2083 = vst.msk [vmem:[%s3087_s27 + $0xd0] sm:$0xf] %vm2030_vm3, %v2537_v4  ;;  %v2604_v11 = vpack.c.bf16 %v1509_v5, %v1509_v5  ;;  %v2538_v12 = vpack.c.bf16 %v1443_v7, %v1443_v7  ;;  %v2741_v13 = vpop.f32.mrb[56].mxu0 }
 0x156   : > { %2147 = vst.msk [vmem:[%s3087_s27 + $0x1d0] sm:$0xf] %vm2030_vm3, %v2601_v8  ;;  %2086 = vst.msk [vmem:[%s3087_s27 + $0xdc] sm:$0xf] %vm2030_vm3, %v2540_v9  ;;  %v2602_v14 = vpack.c.bf16 %v1507_v10, %v1507_v10  ;;  %v1112_v15 = vadd.f32 %v3393_v45, %v2741_v13  ;;  %v2805_v16 = vpop.f32.mrb[56].mxu1  ;;  %v1103_v17 = vpop.f32.mrb[57].mxu0 }
 0x157   : > { %2150 = vst.msk [vmem:[%s3087_s27 + $0x1dc] sm:$0xf] %vm2030_vm3, %v2604_v11  ;;  %2084 = vst.msk [vmem:[%s3087_s27 + $0xd4] sm:$0xf] %vm2030_vm3, %v2538_v12  ;;  %v1368_v18 = vadd.f32 %v3393_v45, %v2805_v16  ;;  %v1104_v19 = vadd.f32 %v3393_v45, %v1103_v17  ;;  %v1359_v20 = vpop.f32.mrb[57].mxu1  ;;  %v2742_v21 = vpop.f32.mrb[58].mxu0 }
 0x158   : > { %2148 = vst.msk [vmem:[%s3087_s27 + $0x1d4] sm:$0xf] %vm2030_vm3, %v2602_v14  ;;  %v1448_v22 = vmax.f32 %v1112_v15, 0.0  ;;  %v1360_v23 = vadd.f32 %v3393_v45, %v1359_v20  ;;  %v1115_v24 = vadd.f32 %v3393_v45, %v2742_v21  ;;  %v2806_v25 = vpop.f32.mrb[58].mxu1  ;;  %v1106_v26 = vpop.f32.mrb[59].mxu0 }
 0x159   : > { %v1512_v27 = vmax.f32 %v1368_v18, 0.0  ;;  %v1446_v28 = vmax.f32 %v1104_v19, 0.0  ;;  %v1371_v29 = vadd.f32 %v3393_v45, %v2806_v25  ;;  %v1107_v30 = vadd.f32 %v3393_v45, %v1106_v26  ;;  %v1362_v31 = vpop.f32.mrb[59].mxu1 }
 0x15a   : > { %v2543_v32 = vpack.c.bf16 %v1448_v22, %v1448_v22  ;;  %v1510_v33 = vmax.f32 %v1360_v23, 0.0  ;;  %v1449_v34 = vmax.f32 %v1115_v24, 0.0  ;;  %v1363_v35 = vadd.f32 %v3393_v45, %v1362_v31 }
 0x15b   : > { %v2607_v36 = vpack.c.bf16 %v1512_v27, %v1512_v27  ;;  %v2541_v37 = vpack.c.bf16 %v1446_v28, %v1446_v28  ;;  %v1513_v38 = vmax.f32 %v1371_v29, 0.0  ;;  %v1447_v39 = vmax.f32 %v1107_v30, 0.0 }
 0x15c   : > { %2089 = vst.msk [vmem:[%s3087_s27 + $0xe8] sm:$0xf] %vm2030_vm3, %v2543_v32  ;;  %v2605_v40 = vpack.c.bf16 %v1510_v33, %v1510_v33  ;;  %v2544_v41 = vpack.c.bf16 %v1449_v34, %v1449_v34  ;;  %v1511_v42 = vmax.f32 %v1363_v35, 0.0 }
 0x15d   : > { %2153 = vst.msk [vmem:[%s3087_s27 + $0x1e8] sm:$0xf] %vm2030_vm3, %v2607_v36  ;;  %2087 = vst.msk [vmem:[%s3087_s27 + $0xe0] sm:$0xf] %vm2030_vm3, %v2541_v37  ;;  %v2608_v43 = vpack.c.bf16 %v1513_v38, %v1513_v38  ;;  %v2542_v44 = vpack.c.bf16 %v1447_v39, %v1447_v39  ;;  %v2745_v6 = vpop.f32.mrb[60].mxu0 }
 0x15e   : > { %2151 = vst.msk [vmem:[%s3087_s27 + $0x1e0] sm:$0xf] %vm2030_vm3, %v2605_v40  ;;  %2090 = vst.msk [vmem:[%s3087_s27 + $0xec] sm:$0xf] %vm2030_vm3, %v2544_v41  ;;  %v2606_v46 = vpack.c.bf16 %v1511_v42, %v1511_v42  ;;  %v1128_v47 = vadd.f32 %v3393_v45, %v2745_v6  ;;  %v2809_v48 = vpop.f32.mrb[60].mxu1  ;;  %v1119_v49 = vpop.f32.mrb[61].mxu0 }
 0x15f   : > { %2154 = vst.msk [vmem:[%s3087_s27 + $0x1ec] sm:$0xf] %vm2030_vm3, %v2608_v43  ;;  %2088 = vst.msk [vmem:[%s3087_s27 + $0xe4] sm:$0xf] %vm2030_vm3, %v2542_v44  ;;  %v1384_v50 = vadd.f32 %v3393_v45, %v2809_v48  ;;  %v1120_v51 = vadd.f32 %v3393_v45, %v1119_v49  ;;  %v1375_v52 = vpop.f32.mrb[61].mxu1  ;;  %v2746_v53 = vpop.f32.mrb[62].mxu0 }
 0x160   : > { %2152 = vst.msk [vmem:[%s3087_s27 + $0x1e4] sm:$0xf] %vm2030_vm3, %v2606_v46  ;;  %v1452_v54 = vmax.f32 %v1128_v47, 0.0  ;;  %v1376_v55 = vadd.f32 %v3393_v45, %v1375_v52  ;;  %v1131_v56 = vadd.f32 %v3393_v45, %v2746_v53  ;;  %v2810_v57 = vpop.f32.mrb[62].mxu1  ;;  %v1122_v58 = vpop.f32.mrb[63].mxu0 }
 0x161   : > { %v1516_v59 = vmax.f32 %v1384_v50, 0.0  ;;  %v1450_v60 = vmax.f32 %v1120_v51, 0.0  ;;  %v1387_v61 = vadd.f32 %v3393_v45, %v2810_v57  ;;  %v1123_v62 = vadd.f32 %v3393_v45, %v1122_v58  ;;  %v1378_v63 = vpop.f32.mrb[63].mxu1 }
 0x162   : > { %v2547_v0 = vpack.c.bf16 %v1452_v54, %v1452_v54  ;;  %v1514_v1 = vmax.f32 %v1376_v55, 0.0  ;;  %v1453_v2 = vmax.f32 %v1131_v56, 0.0  ;;  %v1379_v3 = vadd.f32 %v3393_v45, %v1378_v63 }
 0x163   : > { %v2611_v4 = vpack.c.bf16 %v1516_v59, %v1516_v59  ;;  %v2545_v5 = vpack.c.bf16 %v1450_v60, %v1450_v60  ;;  %v1517_v7 = vmax.f32 %v1387_v61, 0.0  ;;  %v1451_v8 = vmax.f32 %v1123_v62, 0.0 }
 0x164   : > { %2093 = vst.msk [vmem:[%s3087_s27 + $0xf8] sm:$0xf] %vm2030_vm3, %v2547_v0  ;;  %v2609_v9 = vpack.c.bf16 %v1514_v1, %v1514_v1  ;;  %v2548_v10 = vpack.c.bf16 %v1453_v2, %v1453_v2  ;;  %v1515_v11 = vmax.f32 %v1379_v3, 0.0 }
 0x165   : > { %2157 = vst.msk [vmem:[%s3087_s27 + $0x1f8] sm:$0xf] %vm2030_vm3, %v2611_v4  ;;  %2091 = vst.msk [vmem:[%s3087_s27 + $0xf0] sm:$0xf] %vm2030_vm3, %v2545_v5  ;;  %v2612_v12 = vpack.c.bf16 %v1517_v7, %v1517_v7  ;;  %v2546_v13 = vpack.c.bf16 %v1451_v8, %v1451_v8 }
 0x166   : > { %2155 = vst.msk [vmem:[%s3087_s27 + $0x1f0] sm:$0xf] %vm2030_vm3, %v2609_v9  ;;  %2094 = vst.msk [vmem:[%s3087_s27 + $0xfc] sm:$0xf] %vm2030_vm3, %v2548_v10  ;;  %v2610_v45 = vpack.c.bf16 %v1515_v11, %v1515_v11 }
 0x167   : > { %2158 = vst.msk [vmem:[%s3087_s27 + $0x1fc] sm:$0xf] %vm2030_vm3, %v2612_v12  ;;  %2092 = vst.msk [vmem:[%s3087_s27 + $0xf4] sm:$0xf] %vm2030_vm3, %v2546_v13 }
 0x168   : > { %2156 = vst.msk [vmem:[%s3087_s27 + $0x1f4] sm:$0xf] %vm2030_vm3, %v2610_v45 }
 0x169 PF: > { %s13_s12 = sadd.s32 1, %s2897_s12  }
 0x16a   : > { %p10_p4 = scmp.ge.s32.totalorder %s13_s12, 4  }
 0x16c   :  { %12 = sbr.rel (!%p10_p4) target bundleno = 1 (0x1), region = 62 }

// kernel: bayesian_cnn_forward.8
= control target key start
LH: loop header
LB: loop body
LE: loop exit
PB: predicated region body
PF: predicated region fallthrough
CT: control target
= control target key end

     0   :  { %s3143_s12 = smov 0   ;;  %s3145_s13 = smov 0   ;;  %s3868_s0 = inlined_call_operand.vmem [shape: bf16[4,512,72], index: 0, kind: input, shape index: {}]   ;;  %s3869_s1 = inlined_call_operand.vmem [shape: bf16[72,8], index: 1, kind: input, shape index: {}]   ;;  %s3870_s2 = inlined_call_operand.vmem [shape: f32[1,8], index: 2, kind: input, shape index: {}]   ;;  %s3871_s3 = inlined_call_operand.vmem [shape: bf16[512,8], index: 3, kind: output, shape index: {}]  }
   0x1   :  { %s3147_s14 = smov 0  }
   0x2 LB: > { %s2442_s15 = sadd.s32 4294967295, %s3121_s14   ;;  %s3160_s16 = sadd.s32 1, %s3121_s14   ;;  %s3121_s14 = sphi %s3147_s14, %s3957_s14   ;;  %s3117_s13 = sphi %s3145_s13, %s3956_s13   ;;  %s3113_s12 = sphi %s3143_s12, %s3955_s12  }
   0x3   : > { %s17_s17 = ssub.s32 %s3121_s14, %s3160_s16  ;;  %s20_s18 = sadd.s32 1, %s3117_s13 }
   0x4   : > { %p18_p0 = scmp.eq.s32.totalorder %s17_s17, 0  ;;  %p27_p1 = scmp.ne.s32.totalorder %s3117_s13, %s3113_s12 }
   0x5   : > { %p28_p2 = scmp.eq.s32.totalorder %s3121_s14, 0  ;;  %p2445_p4 = scmp.ge.s32.totalorder %s3121_s14, 2 }
   0x6   : > { %s3169_s19 = scalar_select %p18_p0, %s3117_s13, %s20_s18  }
   0x7   : > { %p29_p3 = por %p28_p2, %p27_p1  ;;  %127 = sbr.rel (%p2445_p4) target bundleno = 50 (0x32), region = 24 }
   0xe   : > { %130 = sbr.rel (!%p29_p3) target bundleno = 50 (0x32), region = 28  ;;  %s132_s20 = sand.u32 (%p29_p3), 1, %s3117_s13  }
   0xf   : > { %s2717_s21 = sshll.u32 (%p29_p3), %s3121_s14, 7  ;;  %s2446_s22 = sshll.u32 (%p29_p3), %s132_s20, 9 }
  0x10   : > { %s3177_s25 = scalar_lea.vmem (%p29_p3), %s3868_s0, %s2717_s21  ;;  %s3182_s26 = scalar_lea.vmem (%p29_p3), [#allocation2], %s2446_s22 }
  0x11   : > { %v153_v0 = vld [vmem:[%s3177_s25] sm:$0xff] (%p29_p3)   ;;  %v157_v1 = vld [vmem:[%s3177_s25 + $0x8] sm:$0xff] (%p29_p3)   ;;  %v161_v2 = vld [vmem:[%s3177_s25 + $0x10] sm:$0xff] (%p29_p3)  }
  0x12   : > { %154 = vst [vmem:[%s3182_s26] sm:$0xff] (%p29_p3), %v153_v0   ;;  %158 = vst [vmem:[%s3182_s26 + $0x8] sm:$0xff] (%p29_p3), %v157_v1   ;;  %v165_v3 = vld [vmem:[%s3177_s25 + $0x18] sm:$0xff] (%p29_p3)   ;;  %v169_v4 = vld [vmem:[%s3177_s25 + $0x20] sm:$0xff] (%p29_p3)  }
  0x13   : > { %162 = vst [vmem:[%s3182_s26 + $0x10] sm:$0xff] (%p29_p3), %v161_v2   ;;  %v173_v5 = vld [vmem:[%s3177_s25 + $0x28] sm:$0xff] (%p29_p3)   ;;  %166 = vst [vmem:[%s3182_s26 + $0x18] sm:$0xff] (%p29_p3), %v165_v3   ;;  %v177_v6 = vld [vmem:[%s3177_s25 + $0x30] sm:$0xff] (%p29_p3)  }
  0x14   : > { %170 = vst [vmem:[%s3182_s26 + $0x20] sm:$0xff] (%p29_p3), %v169_v4   ;;  %174 = vst [vmem:[%s3182_s26 + $0x28] sm:$0xff] (%p29_p3), %v173_v5   ;;  %v181_v7 = vld [vmem:[%s3177_s25 + $0x38] sm:$0xff] (%p29_p3)   ;;  %v185_v8 = vld [vmem:[%s3177_s25 + $0x40] sm:$0xff] (%p29_p3)  }
  0x15   : > { %178 = vst [vmem:[%s3182_s26 + $0x30] sm:$0xff] %v177_v6   ;;  %182 = vst [vmem:[%s3182_s26 + $0x38] sm:$0xff] %v181_v7   ;;  %v189_v9 = vld [vmem:[%s3177_s25 + $0x48] sm:$0xff]   ;;  %v193_v10 = vld [vmem:[%s3177_s25 + $0x50] sm:$0xff]  }
  0x16   : > { %186 = vst [vmem:[%s3182_s26 + $0x40] sm:$0xff] %v185_v8   ;;  %v197_v11 = vld [vmem:[%s3177_s25 + $0x58] sm:$0xff]   ;;  %190 = vst [vmem:[%s3182_s26 + $0x48] sm:$0xff] %v189_v9   ;;  %v201_v12 = vld [vmem:[%s3177_s25 + $0x60] sm:$0xff]  }
  0x17   : > { %194 = vst [vmem:[%s3182_s26 + $0x50] sm:$0xff] %v193_v10   ;;  %198 = vst [vmem:[%s3182_s26 + $0x58] sm:$0xff] %v197_v11   ;;  %v205_v13 = vld [vmem:[%s3177_s25 + $0x68] sm:$0xff]   ;;  %v209_v14 = vld [vmem:[%s3177_s25 + $0x70] sm:$0xff]  }
  0x18   : > { %202 = vst [vmem:[%s3182_s26 + $0x60] sm:$0xff] %v201_v12   ;;  %206 = vst [vmem:[%s3182_s26 + $0x68] sm:$0xff] %v205_v13   ;;  %v213_v15 = vld [vmem:[%s3177_s25 + $0x78] sm:$0xff]   ;;  %v217_v16 = vld [vmem:[%s3177_s25 + $0x100] sm:$0xff]  }
  0x19   : > { %210 = vst [vmem:[%s3182_s26 + $0x70] sm:$0xff] %v209_v14   ;;  %v221_v17 = vld [vmem:[%s3177_s25 + $0x108] sm:$0xff]   ;;  %214 = vst [vmem:[%s3182_s26 + $0x78] sm:$0xff] %v213_v15   ;;  %v225_v18 = vld [vmem:[%s3177_s25 + $0x110] sm:$0xff]  }
  0x1a   : > { %218 = vst [vmem:[%s3182_s26 + $0x80] sm:$0xff] %v217_v16   ;;  %222 = vst [vmem:[%s3182_s26 + $0x88] sm:$0xff] %v221_v17   ;;  %v229_v19 = vld [vmem:[%s3177_s25 + $0x118] sm:$0xff]   ;;  %v233_v20 = vld [vmem:[%s3177_s25 + $0x120] sm:$0xff]  }
  0x1b   : > { %226 = vst [vmem:[%s3182_s26 + $0x90] sm:$0xff] %v225_v18   ;;  %230 = vst [vmem:[%s3182_s26 + $0x98] sm:$0xff] %v229_v19   ;;  %v237_v21 = vld [vmem:[%s3177_s25 + $0x128] sm:$0xff]   ;;  %v241_v22 = vld [vmem:[%s3177_s25 + $0x130] sm:$0xff]  }
  0x1c   : > { %234 = vst [vmem:[%s3182_s26 + $0xa0] sm:$0xff] %v233_v20   ;;  %v245_v23 = vld [vmem:[%s3177_s25 + $0x138] sm:$0xff]   ;;  %238 = vst [vmem:[%s3182_s26 + $0xa8] sm:$0xff] %v237_v21   ;;  %v249_v24 = vld [vmem:[%s3177_s25 + $0x140] sm:$0xff]  }
  0x1d   : > { %242 = vst [vmem:[%s3182_s26 + $0xb0] sm:$0xff] %v241_v22   ;;  %246 = vst [vmem:[%s3182_s26 + $0xb8] sm:$0xff] %v245_v23   ;;  %v253_v25 = vld [vmem:[%s3177_s25 + $0x148] sm:$0xff]   ;;  %v257_v26 = vld [vmem:[%s3177_s25 + $0x150] sm:$0xff]  }
  0x1e   : > { %250 = vst [vmem:[%s3182_s26 + $0xc0] sm:$0xff] %v249_v24   ;;  %254 = vst [vmem:[%s3182_s26 + $0xc8] sm:$0xff] %v253_v25   ;;  %v261_v27 = vld [vmem:[%s3177_s25 + $0x158] sm:$0xff]   ;;  %v265_v28 = vld [vmem:[%s3177_s25 + $0x160] sm:$0xff]  }
  0x1f   : > { %258 = vst [vmem:[%s3182_s26 + $0xd0] sm:$0xff] %v257_v26   ;;  %v269_v29 = vld [vmem:[%s3177_s25 + $0x168] sm:$0xff]   ;;  %262 = vst [vmem:[%s3182_s26 + $0xd8] sm:$0xff] %v261_v27   ;;  %v273_v30 = vld [vmem:[%s3177_s25 + $0x170] sm:$0xff]  }
  0x20   : > { %266 = vst [vmem:[%s3182_s26 + $0xe0] sm:$0xff] %v265_v28   ;;  %270 = vst [vmem:[%s3182_s26 + $0xe8] sm:$0xff] %v269_v29   ;;  %v277_v31 = vld [vmem:[%s3177_s25 + $0x178] sm:$0xff]   ;;  %v281_v32 = vld [vmem:[%s3177_s25 + $0x200] sm:$0xff]  }
  0x21   : > { %274 = vst [vmem:[%s3182_s26 + $0xf0] sm:$0xff] %v273_v30   ;;  %278 = vst [vmem:[%s3182_s26 + $0xf8] sm:$0xff] %v277_v31   ;;  %v285_v33 = vld [vmem:[%s3177_s25 + $0x208] sm:$0xff]   ;;  %v289_v34 = vld [vmem:[%s3177_s25 + $0x210] sm:$0xff]  }
  0x22   : > { %282 = vst [vmem:[%s3182_s26 + $0x100] sm:$0xff] %v281_v32   ;;  %v293_v35 = vld [vmem:[%s3177_s25 + $0x218] sm:$0xff]   ;;  %286 = vst [vmem:[%s3182_s26 + $0x108] sm:$0xff] %v285_v33   ;;  %v297_v36 = vld [vmem:[%s3177_s25 + $0x220] sm:$0xff]  }
  0x23   : > { %290 = vst [vmem:[%s3182_s26 + $0x110] sm:$0xff] %v289_v34   ;;  %294 = vst [vmem:[%s3182_s26 + $0x118] sm:$0xff] %v293_v35   ;;  %v301_v37 = vld [vmem:[%s3177_s25 + $0x228] sm:$0xff]   ;;  %v305_v38 = vld [vmem:[%s3177_s25 + $0x230] sm:$0xff]  }
  0x24   : > { %298 = vst [vmem:[%s3182_s26 + $0x120] sm:$0xff] %v297_v36   ;;  %302 = vst [vmem:[%s3182_s26 + $0x128] sm:$0xff] %v301_v37   ;;  %v309_v39 = vld [vmem:[%s3177_s25 + $0x238] sm:$0xff]   ;;  %v313_v40 = vld [vmem:[%s3177_s25 + $0x240] sm:$0xff]  }
  0x25   : > { %306 = vst [vmem:[%s3182_s26 + $0x130] sm:$0xff] %v305_v38   ;;  %v317_v41 = vld [vmem:[%s3177_s25 + $0x248] sm:$0xff]   ;;  %310 = vst [vmem:[%s3182_s26 + $0x138] sm:$0xff] %v309_v39   ;;  %v321_v42 = vld [vmem:[%s3177_s25 + $0x250] sm:$0xff]  }
  0x26   : > { %314 = vst [vmem:[%s3182_s26 + $0x140] sm:$0xff] %v313_v40   ;;  %318 = vst [vmem:[%s3182_s26 + $0x148] sm:$0xff] %v317_v41   ;;  %v325_v43 = vld [vmem:[%s3177_s25 + $0x258] sm:$0xff]   ;;  %v329_v44 = vld [vmem:[%s3177_s25 + $0x260] sm:$0xff]  }
  0x27   : > { %322 = vst [vmem:[%s3182_s26 + $0x150] sm:$0xff] %v321_v42   ;;  %326 = vst [vmem:[%s3182_s26 + $0x158] sm:$0xff] %v325_v43   ;;  %v333_v45 = vld [vmem:[%s3177_s25 + $0x268] sm:$0xff]   ;;  %v337_v46 = vld [vmem:[%s3177_s25 + $0x270] sm:$0xff]  }
  0x28   : > { %330 = vst [vmem:[%s3182_s26 + $0x160] sm:$0xff] %v329_v44   ;;  %v341_v47 = vld [vmem:[%s3177_s25 + $0x278] sm:$0xff]   ;;  %334 = vst [vmem:[%s3182_s26 + $0x168] sm:$0xff] %v333_v45   ;;  %v345_v48 = vld [vmem:[%s3177_s25 + $0x300] sm:$0xff]  }
  0x29   : > { %338 = vst [vmem:[%s3182_s26 + $0x170] sm:$0xff] %v337_v46   ;;  %342 = vst [vmem:[%s3182_s26 + $0x178] sm:$0xff] %v341_v47   ;;  %v349_v49 = vld [vmem:[%s3177_s25 + $0x308] sm:$0xff]   ;;  %v353_v50 = vld [vmem:[%s3177_s25 + $0x310] sm:$0xff]  }
  0x2a   : > { %346 = vst [vmem:[%s3182_s26 + $0x180] sm:$0xff] %v345_v48   ;;  %350 = vst [vmem:[%s3182_s26 + $0x188] sm:$0xff] %v349_v49   ;;  %v357_v51 = vld [vmem:[%s3177_s25 + $0x318] sm:$0xff]   ;;  %v361_v52 = vld [vmem:[%s3177_s25 + $0x320] sm:$0xff]  }
  0x2b   : > { %354 = vst [vmem:[%s3182_s26 + $0x190] sm:$0xff] %v353_v50   ;;  %v365_v53 = vld [vmem:[%s3177_s25 + $0x328] sm:$0xff]   ;;  %358 = vst [vmem:[%s3182_s26 + $0x198] sm:$0xff] %v357_v51   ;;  %v369_v54 = vld [vmem:[%s3177_s25 + $0x330] sm:$0xff]  }
  0x2c   : > { %362 = vst [vmem:[%s3182_s26 + $0x1a0] sm:$0xff] %v361_v52   ;;  %366 = vst [vmem:[%s3182_s26 + $0x1a8] sm:$0xff] %v365_v53   ;;  %v373_v55 = vld [vmem:[%s3177_s25 + $0x338] sm:$0xff]   ;;  %v377_v56 = vld [vmem:[%s3177_s25 + $0x340] sm:$0xff]  }
  0x2d   : > { %370 = vst [vmem:[%s3182_s26 + $0x1b0] sm:$0xff] %v369_v54   ;;  %374 = vst [vmem:[%s3182_s26 + $0x1b8] sm:$0xff] %v373_v55   ;;  %v381_v57 = vld [vmem:[%s3177_s25 + $0x348] sm:$0xff]   ;;  %v385_v58 = vld [vmem:[%s3177_s25 + $0x350] sm:$0xff]  }
  0x2e   : > { %378 = vst [vmem:[%s3182_s26 + $0x1c0] sm:$0xff] %v377_v56   ;;  %v389_v59 = vld [vmem:[%s3177_s25 + $0x358] sm:$0xff]   ;;  %382 = vst [vmem:[%s3182_s26 + $0x1c8] sm:$0xff] %v381_v57   ;;  %v393_v60 = vld [vmem:[%s3177_s25 + $0x360] sm:$0xff]  }
  0x2f   : > { %386 = vst [vmem:[%s3182_s26 + $0x1d0] sm:$0xff] %v385_v58   ;;  %390 = vst [vmem:[%s3182_s26 + $0x1d8] sm:$0xff] %v389_v59   ;;  %v397_v61 = vld [vmem:[%s3177_s25 + $0x368] sm:$0xff]   ;;  %v401_v62 = vld [vmem:[%s3177_s25 + $0x370] sm:$0xff]  }
  0x30   : > { %394 = vst [vmem:[%s3182_s26 + $0x1e0] sm:$0xff] %v393_v60   ;;  %398 = vst [vmem:[%s3182_s26 + $0x1e8] sm:$0xff] %v397_v61   ;;  %v405_v63 = vld [vmem:[%s3177_s25 + $0x378] sm:$0xff]  }
  0x31   : > { %402 = vst [vmem:[%s3182_s26 + $0x1f0] sm:$0xff] %v401_v62   ;;  %406 = vst [vmem:[%s3182_s26 + $0x1f8] sm:$0xff] %v405_v63  }
  0x32 PF: > { %p2449_p5 = scmp.ge.s32.totalorder %s3121_s14, 1  ;;  %p686_p6 = scmp.lt.s32.totalorder %s3121_s14, 3 }
  0x34   : > { %p687_p7 = pnand %p2449_p5, %p686_p6 }
  0x36   : > { %690 = sbr.rel (%p687_p7) target bundleno = 428 (0x1ac), region = 69 }
  0x3d   : > { %v3030_v0 = vld [vmem:[%s3869_s1] sm:$0xff]   ;;  %v3031_v1 = vld [vmem:[%s3869_s1 + $0x8] sm:$0xff]   ;;  %s693_s4 = sand.u32 1, %s3113_s12   ;;  %v3032_v2 = vld [vmem:[%s3869_s1 + $0x10] sm:$0xff]   ;;  %vm872_vm0 = vcmask 588800   ;;  %vm921_vm1 = vcmask 1043456  }
  0x3e   : > { %2834 = vmatprep.subr.bf16.mxu0 %v3030_v0  ;;  %2876 = vmatprep.subr.bf16.mxu1 %v3030_v0  ;;  %s2450_s5 = sshll.u32 %s693_s4, 9  ;;  %v3033_v5 = vld [vmem:[%s3869_s1 + $0x18] sm:$0xff]   ;;  %v3034_v6 = vld [vmem:[%s3869_s1 + $0x20] ss:$0 sps:$4 sm:$0xff]   ;;  %s2451_s17 = sshll.u32 %s2442_s15, 5  ;;  %vm2347_vm2 = vcmask 60416  }
  0x3f   : > { %2835 = vmatpush3.bf16.msra.mxu0 %v3030_v0  ;;  %2877 = vmatpush3.bf16.msra.mxu1 %v3030_v0  ;;  %s3321_s8 = scalar_lea.vmem [#allocation2], %s2450_s5  ;;  %v923_v7 = vsel %vm921_vm1, %v3034_v6, 0  ;;  %p718_p8 = scmp.lt.s32.totalorder %s2451_s17, 63 }
  0x40   : > { %2836 = vmatprep.subr.bf16.mxu0 %v3031_v1  ;;  %2878 = vmatprep.subr.bf16.mxu1 %v3031_v1  ;;  %v3035_v3 = vld [vmem:[%s3321_s8] sm:$0xff]   ;;  %v3037_v8 = vld [vmem:[%s3321_s8 + $0x8] sm:$0xff]   ;;  %v3039_v10 = vld [vmem:[%s3321_s8 + $0x10] sm:$0xff]  }
  0x41   : > { %v3036_v4 = vld [vmem:[%s3321_s8 + $0x80] sm:$0xff]   ;;  %2844 = vmatprep.mubr.msk.bf16.mxu0 %vm872_vm0, %v3035_v3  ;;  %v3038_v9 = vld [vmem:[%s3321_s8 + $0x88] sm:$0xff]   ;;  %v3040_v11 = vld [vmem:[%s3321_s8 + $0x90] sm:$0xff]   ;;  %s3959_s17 = smov (!%p718_p8, %s2451_s17), 63 }
  0x42   : > { %2886 = vmatprep.mubr.msk.bf16.mxu1 %vm872_vm0, %v3036_v4  ;;  %v3041_v12 = vld [vmem:[%s3321_s8 + $0x18] sm:$0xff]   ;;  %v3043_v14 = vld [vmem:[%s3321_s8 + $0x20] sm:$0xff]   ;;  %v3045_v16 = vld [vmem:[%s3321_s8 + $0x28] sm:$0xff]   ;;  %s2452_s18 = sshll.u32 %s3959_s17, 2 }
  0x43   : > { %2837 = vmatpush3.bf16.msra.mxu0 %v3031_v1  ;;  %2879 = vmatpush3.bf16.msra.mxu1 %v3031_v1  ;;  %v3042_v13 = vld [vmem:[%s3321_s8 + $0x98] sm:$0xff]   ;;  %v3044_v15 = vld [vmem:[%s3321_s8 + $0xa0] sm:$0xff]   ;;  %v3046_v17 = vld [vmem:[%s3321_s8 + $0xa8] sm:$0xff]   ;;  %s3679_s22 = scalar_lea.vmem %s3871_s3, %s2452_s18 }
  0x44   : > { %2838 = vmatprep.subr.bf16.mxu0 %v3032_v2  ;;  %2880 = vmatprep.subr.bf16.mxu1 %v3032_v2  ;;  %v3047_v18 = vld [vmem:[%s3321_s8 + $0x30] sm:$0xff]   ;;  %v3049_v20 = vld [vmem:[%s3321_s8 + $0x38] sm:$0xff]   ;;  %v3051_v22 = vld [vmem:[%s3321_s8 + $0x40] sm:$0xff]  }
  0x45   : > { %v3048_v19 = vld [vmem:[%s3321_s8 + $0xb0] sm:$0xff]   ;;  %v3050_v21 = vld [vmem:[%s3321_s8 + $0xb8] sm:$0xff]   ;;  %v3052_v23 = vld [vmem:[%s3321_s8 + $0xc0] sm:$0xff]  }
  0x46   : > { %v3053_v24 = vld [vmem:[%s3321_s8 + $0x48] sm:$0xff]   ;;  %v3055_v26 = vld [vmem:[%s3321_s8 + $0x50] sm:$0xff]   ;;  %v3057_v28 = vld [vmem:[%s3321_s8 + $0x58] sm:$0xff]  }
  0x47   : > { %2839 = vmatpush3.bf16.msra.mxu0 %v3032_v2  ;;  %2881 = vmatpush3.bf16.msra.mxu1 %v3032_v2  ;;  %v3054_v25 = vld [vmem:[%s3321_s8 + $0xc8] sm:$0xff]   ;;  %v3056_v27 = vld [vmem:[%s3321_s8 + $0xd0] sm:$0xff]   ;;  %v3058_v29 = vld [vmem:[%s3321_s8 + $0xd8] sm:$0xff]  }
  0x48   : > { %2840 = vmatprep.subr.bf16.mxu0 %v3033_v5  ;;  %2882 = vmatprep.subr.bf16.mxu1 %v3033_v5  ;;  %v3059_v30 = vld [vmem:[%s3321_s8 + $0x60] sm:$0xff]   ;;  %v3061_v32 = vld [vmem:[%s3321_s8 + $0x68] sm:$0xff]   ;;  %v3063_v34 = vld [vmem:[%s3321_s8 + $0x70] sm:$0xff]  }
  0x49   : > { %v3060_v31 = vld [vmem:[%s3321_s8 + $0xe0] sm:$0xff]   ;;  %v3062_v33 = vld [vmem:[%s3321_s8 + $0xe8] sm:$0xff]   ;;  %v3064_v35 = vld [vmem:[%s3321_s8 + $0xf0] sm:$0xff]  }
  0x4a   : > { %v3065_v36 = vld [vmem:[%s3321_s8 + $0x78] sm:$0xff]   ;;  %v3067_v38 = vld [vmem:[%s3321_s8 + $0x100] sm:$0xff]   ;;  %v3069_v40 = vld [vmem:[%s3321_s8 + $0x108] sm:$0xff]  }
  0x4b   : > { %2841 = vmatpush3.bf16.msra.mxu0 %v3033_v5  ;;  %2883 = vmatpush3.bf16.msra.mxu1 %v3033_v5  ;;  %v3066_v37 = vld [vmem:[%s3321_s8 + $0xf8] sm:$0xff]   ;;  %v3068_v39 = vld [vmem:[%s3321_s8 + $0x180] sm:$0xff]   ;;  %v3070_v41 = vld [vmem:[%s3321_s8 + $0x188] sm:$0xff]  }
  0x4c   : > { %3002 = vmatprep.subr.msk.bf16.mxu0 %vm921_vm1, %v3034_v6  ;;  %3003 = vmatprep.subr.msk.bf16.mxu1 %vm921_vm1, %v3034_v6  ;;  %v3071_v42 = vld [vmem:[%s3321_s8 + $0x110] sm:$0xff]   ;;  %v3073_v44 = vld [vmem:[%s3321_s8 + $0x118] sm:$0xff]   ;;  %v3075_v46 = vld [vmem:[%s3321_s8 + $0x120] sm:$0xff]  }
  0x4d   : > { %v3072_v43 = vld [vmem:[%s3321_s8 + $0x190] sm:$0xff]   ;;  %v3074_v45 = vld [vmem:[%s3321_s8 + $0x198] sm:$0xff]   ;;  %v3076_v47 = vld [vmem:[%s3321_s8 + $0x1a0] sm:$0xff]  }
  0x4e   : > { %v3077_v48 = vld [vmem:[%s3321_s8 + $0x128] sm:$0xff]   ;;  %v3079_v50 = vld [vmem:[%s3321_s8 + $0x130] sm:$0xff]   ;;  %v3081_v52 = vld [vmem:[%s3321_s8 + $0x138] sm:$0xff]  }
  0x4f   : > { %2843 = vmatpush3.bf16.msra.mxu0 %v923_v7  ;;  %2885 = vmatpush3.bf16.msra.mxu1 %v923_v7  ;;  %v3078_v49 = vld [vmem:[%s3321_s8 + $0x1a8] sm:$0xff]   ;;  %v3080_v51 = vld [vmem:[%s3321_s8 + $0x1b0] sm:$0xff]   ;;  %v3082_v53 = vld [vmem:[%s3321_s8 + $0x1b8] sm:$0xff]  }
  0x50   : > { %2918 = vmatprep.subr.bf16.mxu0 %v3030_v0  ;;  %2960 = vmatprep.subr.bf16.mxu1 %v3030_v0  ;;  %v3083_v54 = vld [vmem:[%s3321_s8 + $0x140] sm:$0xff]   ;;  %v3085_v56 = vld [vmem:[%s3321_s8 + $0x148] sm:$0xff]   ;;  %v3087_v58 = vld [vmem:[%s3321_s8 + $0x150] sm:$0xff]  }
  0x51   : > { %v3084_v55 = vld [vmem:[%s3321_s8 + $0x1c0] sm:$0xff]   ;;  %v3086_v57 = vld [vmem:[%s3321_s8 + $0x1c8] sm:$0xff]   ;;  %v3088_v59 = vld [vmem:[%s3321_s8 + $0x1d0] sm:$0xff]  }
  0x52   : > { %2845 = vmatmul.mubr.msk.bf16.vlgmr.msra.gmra.mrb[0].mxu0 %vm872_vm0, %v3037_v8  ;;  %2887 = vmatmul.mubr.msk.bf16.vlgmr.msra.gmra.mrb[0].mxu1 %vm872_vm0, %v3038_v9  ;;  %v3089_v60 = vld [vmem:[%s3321_s8 + $0x158] sm:$0xff]   ;;  %v3091_v62 = vld [vmem:[%s3321_s8 + $0x160] sm:$0xff]   ;;  %v3096_v3 = vld [vmem:[%s3321_s8 + $0x1f0] sm:$0xff]  }
  0x53   : > { %2919 = vmatpush3.bf16.msra.mxu0 %v3030_v0  ;;  %2961 = vmatpush3.bf16.msra.mxu1 %v3030_v0  ;;  %v3090_v61 = vld [vmem:[%s3321_s8 + $0x1d8] sm:$0xff]   ;;  %v3092_v63 = vld [vmem:[%s3321_s8 + $0x1e0] sm:$0xff]   ;;  %v3093_v0 = vld [vmem:[%s3321_s8 + $0x168] sm:$0xff]  }
  0x54   : > { %2848 = vmatprep.mubr.msk.bf16.mxu0 %vm872_vm0, %v3039_v10  ;;  %2890 = vmatprep.mubr.msk.bf16.mxu1 %vm872_vm0, %v3040_v11  ;;  %v3097_v4 = vld [vmem:[%s3321_s8 + $0x178] sm:$0xff]  }
  0x55   : > { %2920 = vmatprep.subr.bf16.mxu0 %v3031_v1  ;;  %2962 = vmatprep.subr.bf16.mxu1 %v3031_v1 }
  0x57   : > { %2921 = vmatpush3.bf16.msra.mxu0 %v3031_v1  ;;  %2963 = vmatpush3.bf16.msra.mxu1 %v3031_v1  ;;  %v3094_v1 = vld [vmem:[%s3321_s8 + $0x1e8] sm:$0xff]  }
  0x58   : > { %2922 = vmatprep.subr.bf16.mxu0 %v3032_v2  ;;  %2964 = vmatprep.subr.bf16.mxu1 %v3032_v2 }
  0x5a   : > { %2849 = vmatmul.mubr.msk.bf16.gmra.mrb[4].mxu0 %vm872_vm0, %v3041_v12  ;;  %2891 = vmatmul.mubr.msk.bf16.gmra.mrb[4].mxu1 %vm872_vm0, %v3042_v13 }
  0x5b   : > { %2852 = vmatprep.mubr.msk.bf16.mxu0 %vm872_vm0, %v3043_v14  ;;  %2894 = vmatprep.mubr.msk.bf16.mxu1 %vm872_vm0, %v3044_v15 }
  0x5c   : > { %2923 = vmatpush3.bf16.msra.mxu0 %v3032_v2  ;;  %2965 = vmatpush3.bf16.msra.mxu1 %v3032_v2  ;;  %v3095_v2 = vld [vmem:[%s3321_s8 + $0x170] sm:$0xff]  }
  0x5d   : > { %2924 = vmatprep.subr.bf16.mxu0 %v3033_v5  ;;  %2966 = vmatprep.subr.bf16.mxu1 %v3033_v5 }
  0x60   : > { %2925 = vmatpush3.bf16.msra.mxu0 %v3033_v5  ;;  %2967 = vmatpush3.bf16.msra.mxu1 %v3033_v5  ;;  %v3098_v5 = vld [vmem:[%s3321_s8 + $0x1f8] sm:$0xff]  }
  0x61   : > { %3004 = vmatprep.subr.msk.bf16.mxu0 %vm921_vm1, %v3034_v6  ;;  %3005 = vmatprep.subr.msk.bf16.mxu1 %vm921_vm1, %v3034_v6 }
  0x62   : > { %2853 = vmatmul.mubr.msk.bf16.gmra.mrb[8].mxu0 %vm872_vm0, %v3045_v16  ;;  %2895 = vmatmul.mubr.msk.bf16.gmra.mrb[8].mxu1 %vm872_vm0, %v3046_v17 }
  0x63   : > { %2856 = vmatprep.mubr.msk.bf16.mxu0 %vm872_vm0, %v3047_v18  ;;  %2898 = vmatprep.mubr.msk.bf16.mxu1 %vm872_vm0, %v3048_v19 }
  0x64   : > { %2927 = vmatpush3.bf16.msra.mxu0 %v923_v7  ;;  %2969 = vmatpush3.bf16.msra.mxu1 %v923_v7 }
  0x6a   : > { %2857 = vmatmul.mubr.msk.bf16.gmra.mrb[12].mxu0 %vm872_vm0, %v3049_v20  ;;  %2899 = vmatmul.mubr.msk.bf16.gmra.mrb[12].mxu1 %vm872_vm0, %v3050_v21 }
  0x6b   : > { %2860 = vmatprep.mubr.msk.bf16.mxu0 %vm872_vm0, %v3051_v22  ;;  %2902 = vmatprep.mubr.msk.bf16.mxu1 %vm872_vm0, %v3052_v23 }
  0x72   : > { %2861 = vmatmul.mubr.msk.bf16.gmra.mrb[16].mxu0 %vm872_vm0, %v3053_v24  ;;  %2903 = vmatmul.mubr.msk.bf16.gmra.mrb[16].mxu1 %vm872_vm0, %v3054_v25 }
  0x73   : > { %2864 = vmatprep.mubr.msk.bf16.mxu0 %vm872_vm0, %v3055_v26  ;;  %2906 = vmatprep.mubr.msk.bf16.mxu1 %vm872_vm0, %v3056_v27 }
  0x7a   : > { %2865 = vmatmul.mubr.msk.bf16.gmra.mrb[20].mxu0 %vm872_vm0, %v3057_v28  ;;  %2907 = vmatmul.mubr.msk.bf16.gmra.mrb[20].mxu1 %vm872_vm0, %v3058_v29 }
  0x7b   : > { %2868 = vmatprep.mubr.msk.bf16.mxu0 %vm872_vm0, %v3059_v30  ;;  %2910 = vmatprep.mubr.msk.bf16.mxu1 %vm872_vm0, %v3060_v31 }
  0x82   : > { %2869 = vmatmul.mubr.msk.bf16.gmra.mrb[24].mxu0 %vm872_vm0, %v3061_v32  ;;  %2911 = vmatmul.mubr.msk.bf16.gmra.mrb[24].mxu1 %vm872_vm0, %v3062_v33 }
  0x83   : > { %2872 = vmatprep.mubr.msk.bf16.mxu0 %vm872_vm0, %v3063_v34  ;;  %2914 = vmatprep.mubr.msk.bf16.mxu1 %vm872_vm0, %v3064_v35 }
  0x8a   : > { %2873 = vmatmul.mubr.msk.bf16.gmra.mrb[28].mxu0 %vm872_vm0, %v3065_v36  ;;  %2915 = vmatmul.mubr.msk.bf16.gmra.mrb[28].mxu1 %vm872_vm0, %v3066_v37 }
  0x8b   : > { %2928 = vmatprep.mubr.msk.bf16.mxu0 %vm872_vm0, %v3067_v38  ;;  %2970 = vmatprep.mubr.msk.bf16.mxu1 %vm872_vm0, %v3068_v39 }
  0x92   : > { %2929 = vmatmul.mubr.msk.bf16.vlgmr.msra.gmra.mrb[32].mxu0 %vm872_vm0, %v3069_v40  ;;  %2971 = vmatmul.mubr.msk.bf16.vlgmr.msra.gmra.mrb[32].mxu1 %vm872_vm0, %v3070_v41 }
  0x93   : > { %2932 = vmatprep.mubr.msk.bf16.mxu0 %vm872_vm0, %v3071_v42  ;;  %2974 = vmatprep.mubr.msk.bf16.mxu1 %vm872_vm0, %v3072_v43 }
  0x9a   : > { %2933 = vmatmul.mubr.msk.bf16.gmra.mrb[36].mxu0 %vm872_vm0, %v3073_v44  ;;  %2975 = vmatmul.mubr.msk.bf16.gmra.mrb[36].mxu1 %vm872_vm0, %v3074_v45 }
  0x9b   : > { %2936 = vmatprep.mubr.msk.bf16.mxu0 %vm872_vm0, %v3075_v46  ;;  %2978 = vmatprep.mubr.msk.bf16.mxu1 %vm872_vm0, %v3076_v47 }
  0xa2   : > { %2937 = vmatmul.mubr.msk.bf16.gmra.mrb[40].mxu0 %vm872_vm0, %v3077_v48  ;;  %2979 = vmatmul.mubr.msk.bf16.gmra.mrb[40].mxu1 %vm872_vm0, %v3078_v49 }
  0xa3   : > { %2940 = vmatprep.mubr.msk.bf16.mxu0 %vm872_vm0, %v3079_v50  ;;  %2982 = vmatprep.mubr.msk.bf16.mxu1 %vm872_vm0, %v3080_v51 }
  0xaa   : > { %2941 = vmatmul.mubr.msk.bf16.gmra.mrb[44].mxu0 %vm872_vm0, %v3081_v52  ;;  %2983 = vmatmul.mubr.msk.bf16.gmra.mrb[44].mxu1 %vm872_vm0, %v3082_v53 }
  0xab   : > { %2944 = vmatprep.mubr.msk.bf16.mxu0 %vm872_vm0, %v3083_v54  ;;  %2986 = vmatprep.mubr.msk.bf16.mxu1 %vm872_vm0, %v3084_v55 }
  0xb2   : > { %2945 = vmatmul.mubr.msk.bf16.gmra.mrb[48].mxu0 %vm872_vm0, %v3085_v56  ;;  %2987 = vmatmul.mubr.msk.bf16.gmra.mrb[48].mxu1 %vm872_vm0, %v3086_v57 }
  0xb3   : > { %2948 = vmatprep.mubr.msk.bf16.mxu0 %vm872_vm0, %v3087_v58  ;;  %2990 = vmatprep.mubr.msk.bf16.mxu1 %vm872_vm0, %v3088_v59 }
  0xba   : > { %2949 = vmatmul.mubr.msk.bf16.gmra.mrb[52].mxu0 %vm872_vm0, %v3089_v60  ;;  %2991 = vmatmul.mubr.msk.bf16.gmra.mrb[52].mxu1 %vm872_vm0, %v3090_v61 }
  0xbb   : > { %2952 = vmatprep.mubr.msk.bf16.mxu0 %vm872_vm0, %v3091_v62  ;;  %2994 = vmatprep.mubr.msk.bf16.mxu1 %vm872_vm0, %v3092_v63  ;;  %v3662_v62 = vld [vmem:[%s3870_s2] ss:$0 sm:$0xff] }
  0xc2   : > { %2953 = vmatmul.mubr.msk.bf16.gmra.mrb[56].mxu0 %vm872_vm0, %v3093_v0  ;;  %2995 = vmatmul.mubr.msk.bf16.gmra.mrb[56].mxu1 %vm872_vm0, %v3094_v1 }
  0xc3   : > { %2956 = vmatprep.mubr.msk.bf16.mxu0 %vm872_vm0, %v3095_v2  ;;  %2998 = vmatprep.mubr.msk.bf16.mxu1 %vm872_vm0, %v3096_v3 }
  0xca   : > { %2957 = vmatmul.mubr.msk.bf16.gmra.mrb[60].mxu0 %vm872_vm0, %v3097_v4  ;;  %2999 = vmatmul.mubr.msk.bf16.gmra.mrb[60].mxu1 %vm872_vm0, %v3098_v5 }
 0x125   : > { %v3462_v6 = vpop.f32.mrb[0].mxu0  ;;  %v3464_v7 = vpop.f32.mrb[0].mxu1 }
 0x126   : > { %v3468_v9 = vpop.f32.mrb[1].mxu0  ;;  %v3470_v10 = vpop.f32.mrb[1].mxu1  ;;  %v3906_v4 = vmax.f32 %v3462_v6, %v3464_v7 }
 0x127   : > { %v3474_v12 = vpop.f32.mrb[2].mxu0  ;;  %v3476_v13 = vpop.f32.mrb[2].mxu1 }
 0x128   : > { %v3480_v15 = vpop.f32.mrb[3].mxu0  ;;  %v3482_v16 = vpop.f32.mrb[3].mxu1 }
 0x12d   : > { %v3486_v18 = vpop.f32.mrb[4].mxu0  ;;  %v3488_v19 = vpop.f32.mrb[4].mxu1 }
 0x12e   : > { %v3492_v21 = vpop.f32.mrb[5].mxu0  ;;  %v3494_v22 = vpop.f32.mrb[5].mxu1 }
 0x12f   : > { %v3498_v24 = vpop.f32.mrb[6].mxu0  ;;  %v3500_v25 = vpop.f32.mrb[6].mxu1 }
 0x130   : > { %v3504_v27 = vpop.f32.mrb[7].mxu0  ;;  %v3506_v28 = vpop.f32.mrb[7].mxu1 }
 0x135   : > { %v3510_v30 = vpop.f32.mrb[8].mxu0  ;;  %v3512_v31 = vpop.f32.mrb[8].mxu1 }
 0x136   : > { %v3516_v33 = vpop.f32.mrb[9].mxu0  ;;  %v3518_v34 = vpop.f32.mrb[9].mxu1 }
 0x137   : > { %v3522_v36 = vpop.f32.mrb[10].mxu0  ;;  %v3524_v37 = vpop.f32.mrb[10].mxu1 }
 0x138   : > { %v3528_v39 = vpop.f32.mrb[11].mxu0  ;;  %v3530_v40 = vpop.f32.mrb[11].mxu1 }
 0x13d   : > { %v3534_v42 = vpop.f32.mrb[12].mxu0  ;;  %v3536_v43 = vpop.f32.mrb[12].mxu1 }
 0x13e   : > { %v3540_v45 = vpop.f32.mrb[13].mxu0  ;;  %v3542_v46 = vpop.f32.mrb[13].mxu1 }
 0x13f   : > { %v3546_v48 = vpop.f32.mrb[14].mxu0  ;;  %v3548_v49 = vpop.f32.mrb[14].mxu1 }
 0x140   : > { %v3552_v51 = vpop.f32.mrb[15].mxu0  ;;  %v3554_v52 = vpop.f32.mrb[15].mxu1 }
 0x145   : > { %v3558_v54 = vpop.f32.mrb[16].mxu0  ;;  %v3560_v55 = vpop.f32.mrb[16].mxu1 }
 0x146   : > { %v3564_v57 = vpop.f32.mrb[17].mxu0  ;;  %v3566_v58 = vpop.f32.mrb[17].mxu1 }
 0x147   : > { %v3570_v60 = vpop.f32.mrb[18].mxu0  ;;  %v3572_v61 = vpop.f32.mrb[18].mxu1 }
 0x148   : > { %v3576_v63 = vpop.f32.mrb[19].mxu0  ;;  %v3578_v0 = vpop.f32.mrb[19].mxu1 }
 0x14d   : > { %v3582_v2 = vpop.f32.mrb[20].mxu0  ;;  %v3584_v3 = vpop.f32.mrb[20].mxu1 }
 0x14e   : > { %v3588_v5 = vpop.f32.mrb[21].mxu0  ;;  %v3590_v59 = vpop.f32.mrb[21].mxu1 }
 0x14f   : > { %v3594_v56 = vpop.f32.mrb[22].mxu0  ;;  %v3596_v53 = vpop.f32.mrb[22].mxu1 }
 0x150   : > { %v3600_v50 = vpop.f32.mrb[23].mxu0  ;;  %v3602_v47 = vpop.f32.mrb[23].mxu1 }
 0x151   : > { %3889 = vst [vmem:[#allocation3_spill] sm:$0xff] %v3602_v47 }
 0x155   : > { %v3606_v44 = vpop.f32.mrb[24].mxu0  ;;  %v3608_v41 = vpop.f32.mrb[24].mxu1 }
 0x156   : > { %3890 = vst [vmem:[#allocation4_spill] sm:$0xff] %v3606_v44  ;;  %3891 = vst [vmem:[#allocation5_spill] sm:$0xff] %v3608_v41  ;;  %v3612_v38 = vpop.f32.mrb[25].mxu0  ;;  %v3614_v35 = vpop.f32.mrb[25].mxu1 }
 0x157   : > { %3892 = vst [vmem:[#allocation6_spill] sm:$0xff] %v3612_v38  ;;  %3893 = vst [vmem:[#allocation7_spill] sm:$0xff] %v3614_v35  ;;  %v3618_v32 = vpop.f32.mrb[26].mxu0  ;;  %v3620_v29 = vpop.f32.mrb[26].mxu1  ;;  %v3908_v35 = vmax.f32 %v3474_v12, %v3476_v13  ;;  %v3909_v38 = vmax.f32 %v3480_v15, %v3482_v16 }
 0x158   : > { %3894 = vst [vmem:[#allocation8_spill] sm:$0xff] %v3618_v32  ;;  %3895 = vst [vmem:[#allocation9_spill] sm:$0xff] %v3620_v29  ;;  %v3624_v26 = vpop.f32.mrb[27].mxu0  ;;  %v3626_v23 = vpop.f32.mrb[27].mxu1 }
 0x159   : > { %3896 = vst [vmem:[#allocation10_spill] sm:$0xff] %v3624_v26  ;;  %3897 = vst [vmem:[#allocation11_spill] sm:$0xff] %v3626_v23 }
 0x15d   : > { %v3630_v20 = vpop.f32.mrb[28].mxu0  ;;  %v3632_v17 = vpop.f32.mrb[28].mxu1 }
 0x15e   : > { %3898 = vst [vmem:[#allocation12_spill] sm:$0xff] %v3630_v20  ;;  %3899 = vst [vmem:[#allocation13_spill] sm:$0xff] %v3632_v17  ;;  %v3636_v14 = vpop.f32.mrb[29].mxu0  ;;  %v3638_v11 = vpop.f32.mrb[29].mxu1 }
 0x15f   : > { %3900 = vst [vmem:[#allocation14_spill] sm:$0xff] %v3636_v14  ;;  %3901 = vst [vmem:[#allocation15_spill] sm:$0xff] %v3638_v11  ;;  %v3642_v8 = vpop.f32.mrb[30].mxu0  ;;  %v3644_v29 = vpop.f32.mrb[30].mxu1 }
 0x160   : > { %3902 = vst [vmem:[#allocation16_spill] sm:$0xff] %v3642_v8  ;;  %3903 = vst [vmem:[#allocation17_spill] sm:$0xff] %v3644_v29  ;;  %v3650_v23 = vpop.f32.mrb[31].mxu0  ;;  %v3652_v26 = vpop.f32.mrb[31].mxu1  ;;  %v3907_v29 = vmax.f32 %v3468_v9, %v3470_v10 }
 0x161   : > { %3904 = vst [vmem:[#allocation18_spill] sm:$0xff] %v3650_v23  ;;  %3905 = vst [vmem:[#allocation19_spill] sm:$0xff] %v3652_v26 }
 0x165   : > { %v2930_v17 = vpop.f32.mrb[32].mxu0  ;;  %v2972_v20 = vpop.f32.mrb[32].mxu1 }
 0x166   : > { %v1764_v11 = vmax.f32 %v3906_v4, %v2930_v17  ;;  %v1635_v14 = vpop.f32.mrb[33].mxu0  ;;  %v1989_v32 = vpop.f32.mrb[33].mxu1 }
 0x167   : > { %v1762_v8 = vmax.f32 %v3907_v29, %v1635_v14  ;;  %v2931_v1 = vpop.f32.mrb[34].mxu0  ;;  %v2973_v26 = vpop.f32.mrb[34].mxu1 }
 0x168   : > { %v2118_v23 = vmax.f32 %v1764_v11, %v2972_v20  ;;  %v1765_v6 = vmax.f32 %v3908_v35, %v2931_v1  ;;  %v1638_v7 = vpop.f32.mrb[35].mxu0  ;;  %v1992_v17 = vpop.f32.mrb[35].mxu1 }
 0x169   : > { %v2116_v4 = vmax.f32 %v1762_v8, %v1989_v32  ;;  %v1763_v41 = vmax.f32 %v3909_v38, %v1638_v7 }
 0x16a   : > { %v2157_v44 = vadd.f32 %v3662_v62, %v2118_v23  ;;  %v2119_v47 = vmax.f32 %v1765_v6, %v2973_v26  ;;  %v3910_v23 = vmax.f32 %v3486_v18, %v3488_v19  ;;  %v3912_v18 = vmax.f32 %v3498_v24, %v3500_v25 }
 0x16b   : > { %v2155_v9 = vadd.f32 %v3662_v62, %v2116_v4  ;;  %v2117_v10 = vmax.f32 %v1763_v41, %v1992_v17  ;;  %v3911_v41 = vmax.f32 %v3492_v21, %v3494_v22  ;;  %v3913_v21 = vmax.f32 %v3504_v27, %v3506_v28 }
 0x16c   : > { %v2189_v14 = vmax.f32 %v2157_v44, 0.0  ;;  %v2158_v11 = vadd.f32 %v3662_v62, %v2119_v47 }
 0x16d   : > { %v2187_v8 = vmax.f32 %v2155_v9, 0.0  ;;  %v2156_v12 = vadd.f32 %v3662_v62, %v2117_v10  ;;  %v2934_v13 = vpop.f32.mrb[36].mxu0  ;;  %v2976_v15 = vpop.f32.mrb[36].mxu1 }
 0x16e   : > { %v2720_v16 = vpack.c.bf16 %v2189_v14, %v2189_v14  ;;  %v2190_v20 = vmax.f32 %v2158_v11, 0.0  ;;  %v1768_v26 = vmax.f32 %v3910_v23, %v2934_v13  ;;  %v1651_v29 = vpop.f32.mrb[37].mxu0  ;;  %v2005_v32 = vpop.f32.mrb[37].mxu1  ;;  %v3914_v23 = vmax.f32 %v3510_v30, %v3512_v31 }
 0x16f   : > { %v2718_v35 = vpack.c.bf16 %v2187_v8, %v2187_v8  ;;  %v2188_v38 = vmax.f32 %v2156_v12, 0.0  ;;  %v1766_v44 = vmax.f32 %v3911_v41, %v1651_v29  ;;  %v2935_v47 = vpop.f32.mrb[38].mxu0  ;;  %v2977_v1 = vpop.f32.mrb[38].mxu1  ;;  %v3915_v41 = vmax.f32 %v3516_v33, %v3518_v34 }
 0x170   : > { %2350 = vst.msk [vmem:[%s3679_s22 + $0x8] sm:$0xf] %vm2347_vm2, %v2720_v16  ;;  %v2721_v6 = vpack.c.bf16 %v2190_v20, %v2190_v20  ;;  %v2122_v7 = vmax.f32 %v1768_v26, %v2976_v15  ;;  %v1769_v19 = vmax.f32 %v3912_v18, %v2935_v47  ;;  %v1654_v17 = vpop.f32.mrb[39].mxu0  ;;  %v2008_v4 = vpop.f32.mrb[39].mxu1  ;;  %v3916_v30 = vmax.f32 %v3522_v36, %v3524_v37 }
 0x171   : > { %2348 = vst.msk [vmem:[%s3679_s22] sm:$0xf] %vm2347_vm2, %v2718_v35  ;;  %v2719_v9 = vpack.c.bf16 %v2188_v38, %v2188_v38  ;;  %v2120_v10 = vmax.f32 %v1766_v44, %v2005_v32  ;;  %v1767_v22 = vmax.f32 %v3913_v21, %v1654_v17  ;;  %v3917_v33 = vmax.f32 %v3528_v39, %v3530_v40 }
 0x172   : > { %2351 = vst.msk [vmem:[%s3679_s22 + $0xc] sm:$0xf] %vm2347_vm2, %v2721_v6  ;;  %v2161_v14 = vadd.f32 %v3662_v62, %v2122_v7  ;;  %v2123_v11 = vmax.f32 %v1769_v19, %v2977_v1 }
 0x173   : > { %2349 = vst.msk [vmem:[%s3679_s22 + $0x4] sm:$0xf] %vm2347_vm2, %v2719_v9  ;;  %v2159_v24 = vadd.f32 %v3662_v62, %v2120_v10  ;;  %v2121_v25 = vmax.f32 %v1767_v22, %v2008_v4 }
 0x174   : > { %v2193_v8 = vmax.f32 %v2161_v14, 0.0  ;;  %v2162_v12 = vadd.f32 %v3662_v62, %v2123_v11 }
 0x175   : > { %v2191_v13 = vmax.f32 %v2159_v24, 0.0  ;;  %v2160_v15 = vadd.f32 %v3662_v62, %v2121_v25  ;;  %v2938_v16 = vpop.f32.mrb[40].mxu0  ;;  %v2980_v27 = vpop.f32.mrb[40].mxu1 }
 0x176   : > { %v2724_v28 = vpack.c.bf16 %v2193_v8, %v2193_v8  ;;  %v2194_v20 = vmax.f32 %v2162_v12, 0.0  ;;  %v1772_v26 = vmax.f32 %v3914_v23, %v2938_v16  ;;  %v1667_v29 = vpop.f32.mrb[41].mxu0  ;;  %v2021_v32 = vpop.f32.mrb[41].mxu1  ;;  %v3918_v8 = vmax.f32 %v3534_v42, %v3536_v43 }
 0x177   : > { %v2722_v35 = vpack.c.bf16 %v2191_v13, %v2191_v13  ;;  %v2192_v38 = vmax.f32 %v2160_v15, 0.0  ;;  %v1770_v44 = vmax.f32 %v3915_v41, %v1667_v29  ;;  %v2939_v47 = vpop.f32.mrb[42].mxu0  ;;  %v2981_v1 = vpop.f32.mrb[42].mxu1  ;;  %v3920_v42 = vmax.f32 %v3546_v48, %v3548_v49 }
 0x178   : > { %2354 = vst.msk [vmem:[%s3679_s22 + $0x18] sm:$0xf] %vm2347_vm2, %v2724_v28  ;;  %v2725_v6 = vpack.c.bf16 %v2194_v20, %v2194_v20  ;;  %v2126_v7 = vmax.f32 %v1772_v26, %v2980_v27  ;;  %v1773_v31 = vmax.f32 %v3916_v30, %v2939_v47  ;;  %v1670_v18 = vpop.f32.mrb[43].mxu0  ;;  %v2024_v19 = vpop.f32.mrb[43].mxu1  ;;  %v3919_v28 = vmax.f32 %v3540_v45, %v3542_v46 }
 0x179   : > { %2352 = vst.msk [vmem:[%s3679_s22 + $0x10] sm:$0xf] %vm2347_vm2, %v2722_v35  ;;  %v2723_v17 = vpack.c.bf16 %v2192_v38, %v2192_v38  ;;  %v2124_v4 = vmax.f32 %v1770_v44, %v2021_v32  ;;  %v1771_v34 = vmax.f32 %v3917_v33, %v1670_v18  ;;  %v3921_v45 = vmax.f32 %v3552_v51, %v3554_v52 }
 0x17a   : > { %2355 = vst.msk [vmem:[%s3679_s22 + $0x1c] sm:$0xf] %vm2347_vm2, %v2725_v6  ;;  %v2165_v9 = vadd.f32 %v3662_v62, %v2126_v7  ;;  %v2127_v10 = vmax.f32 %v1773_v31, %v2981_v1 }
 0x17b   : > { %2353 = vst.msk [vmem:[%s3679_s22 + $0x14] sm:$0xf] %vm2347_vm2, %v2723_v17  ;;  %v2163_v36 = vadd.f32 %v3662_v62, %v2124_v4  ;;  %v2125_v37 = vmax.f32 %v1771_v34, %v2024_v19  ;;  %v3922_v17 = vmax.f32 %v3558_v54, %v3560_v55  ;;  %v3924_v54 = vmax.f32 %v3570_v60, %v3572_v61 }
 0x17c   : > { %v2197_v21 = vmax.f32 %v2165_v9, 0.0  ;;  %v2166_v22 = vadd.f32 %v3662_v62, %v2127_v10 }
 0x17d   : > { %v2195_v14 = vmax.f32 %v2163_v36, 0.0  ;;  %v2164_v11 = vadd.f32 %v3662_v62, %v2125_v37  ;;  %v2942_v24 = vpop.f32.mrb[44].mxu0  ;;  %v2984_v39 = vpop.f32.mrb[44].mxu1  ;;  %v3923_v36 = vmax.f32 %v3564_v57, %v3566_v58  ;;  %v3925_v57 = vmax.f32 %v3576_v63, %v3578_v0 }
 0x17e   : > { %v2728_v40 = vpack.c.bf16 %v2197_v21, %v2197_v21  ;;  %v2198_v25 = vmax.f32 %v2166_v22, 0.0  ;;  %v1776_v12 = vmax.f32 %v3918_v8, %v2942_v24  ;;  %v1683_v13 = vpop.f32.mrb[45].mxu0  ;;  %v2037_v15 = vpop.f32.mrb[45].mxu1 }
 0x17f   : > { %v2726_v16 = vpack.c.bf16 %v2195_v14, %v2195_v14  ;;  %v2196_v27 = vmax.f32 %v2164_v11, 0.0  ;;  %v1774_v20 = vmax.f32 %v3919_v28, %v1683_v13  ;;  %v2943_v23 = vpop.f32.mrb[46].mxu0  ;;  %v2985_v26 = vpop.f32.mrb[46].mxu1 }
 0x180   : > { %2358 = vst.msk [vmem:[%s3679_s22 + $0x28] sm:$0xf] %vm2347_vm2, %v2728_v40  ;;  %v2729_v29 = vpack.c.bf16 %v2198_v25, %v2198_v25  ;;  %v2130_v32 = vmax.f32 %v1776_v12, %v2984_v39  ;;  %v1777_v43 = vmax.f32 %v3920_v42, %v2943_v23  ;;  %v1686_v35 = vpop.f32.mrb[47].mxu0  ;;  %v2040_v38 = vpop.f32.mrb[47].mxu1  ;;  %v3926_v23 = vmax.f32 %v3582_v2, %v3584_v3 }
 0x181   : > { %2356 = vst.msk [vmem:[%s3679_s22 + $0x20] sm:$0xf] %vm2347_vm2, %v2726_v16  ;;  %v2727_v41 = vpack.c.bf16 %v2196_v27, %v2196_v27  ;;  %v2128_v44 = vmax.f32 %v1774_v20, %v2037_v15  ;;  %v1775_v46 = vmax.f32 %v3921_v45, %v1686_v35  ;;  %v3927_v35 = vmax.f32 %v3588_v5, %v3590_v59  ;;  %v3929_v59 = vld [vmem:[#allocation3_spill] sm:$0xff] }
 0x182   : > { %2359 = vst.msk [vmem:[%s3679_s22 + $0x2c] sm:$0xf] %vm2347_vm2, %v2729_v29  ;;  %v2169_v47 = vadd.f32 %v3662_v62, %v2130_v32  ;;  %v2131_v1 = vmax.f32 %v1777_v43, %v2985_v26  ;;  %v3928_v2 = vmax.f32 %v3594_v56, %v3596_v53  ;;  %v3930_v5 = vmax.f32 %v3600_v50, %v3929_v59  ;;  %v3946_v59 = vld [vmem:[#allocation14_spill] sm:$0xff] }
 0x183   : > { %2357 = vst.msk [vmem:[%s3679_s22 + $0x24] sm:$0xf] %vm2347_vm2, %v2727_v41  ;;  %v2167_v48 = vadd.f32 %v3662_v62, %v2128_v44  ;;  %v2129_v49 = vmax.f32 %v1775_v46, %v2040_v38 }
 0x184   : > { %v2201_v6 = vmax.f32 %v2169_v47, 0.0  ;;  %v2170_v7 = vadd.f32 %v3662_v62, %v2131_v1 }
 0x185   : > { %v2199_v30 = vmax.f32 %v2167_v48, 0.0  ;;  %v2168_v31 = vadd.f32 %v3662_v62, %v2129_v49  ;;  %v2946_v18 = vpop.f32.mrb[48].mxu0  ;;  %v2988_v51 = vpop.f32.mrb[48].mxu1 }
 0x186   : > { %v2732_v52 = vpack.c.bf16 %v2201_v6, %v2201_v6  ;;  %v2202_v19 = vmax.f32 %v2170_v7, 0.0  ;;  %v1780_v4 = vmax.f32 %v3922_v17, %v2946_v18  ;;  %v1699_v33 = vpop.f32.mrb[49].mxu0  ;;  %v2053_v34 = vpop.f32.mrb[49].mxu1 }
 0x187   : > { %v2730_v9 = vpack.c.bf16 %v2199_v30, %v2199_v30  ;;  %v2200_v10 = vmax.f32 %v2168_v31, 0.0  ;;  %v1778_v37 = vmax.f32 %v3923_v36, %v1699_v33  ;;  %v2947_v21 = vpop.f32.mrb[50].mxu0  ;;  %v2989_v22 = vpop.f32.mrb[50].mxu1  ;;  %v3931_v33 = vld [vmem:[#allocation4_spill] sm:$0xff] }
 0x188   : > { %2362 = vst.msk [vmem:[%s3679_s22 + $0x38] sm:$0xf] %vm2347_vm2, %v2732_v52  ;;  %v2733_v14 = vpack.c.bf16 %v2202_v19, %v2202_v19  ;;  %v2134_v11 = vmax.f32 %v1780_v4, %v2988_v51  ;;  %v1781_v55 = vmax.f32 %v3924_v54, %v2947_v21  ;;  %v1702_v24 = vpop.f32.mrb[51].mxu0  ;;  %v2056_v39 = vpop.f32.mrb[51].mxu1 }
 0x189   : > { %2360 = vst.msk [vmem:[%s3679_s22 + $0x30] sm:$0xf] %vm2347_vm2, %v2730_v9  ;;  %v2731_v40 = vpack.c.bf16 %v2200_v10, %v2200_v10  ;;  %v2132_v25 = vmax.f32 %v1778_v37, %v2053_v34  ;;  %v1779_v58 = vmax.f32 %v3925_v57, %v1702_v24  ;;  %v3932_v34 = vld [vmem:[#allocation5_spill] sm:$0xff]  ;;  %v3937_v57 = vld [vmem:[#allocation8_spill] sm:$0xff] }
 0x18a   : > { %2363 = vst.msk [vmem:[%s3679_s22 + $0x3c] sm:$0xf] %vm2347_vm2, %v2733_v14  ;;  %v2173_v8 = vadd.f32 %v3662_v62, %v2134_v11  ;;  %v2135_v12 = vmax.f32 %v1781_v55, %v2989_v22  ;;  %v3933_v9 = vmax.f32 %v3931_v33, %v3932_v34  ;;  %v3934_v14 = vld [vmem:[#allocation6_spill] sm:$0xff]  ;;  %v3935_v11 = vld [vmem:[#allocation7_spill] sm:$0xff] }
 0x18b   : > { %2361 = vst.msk [vmem:[%s3679_s22 + $0x34] sm:$0xf] %vm2347_vm2, %v2731_v40  ;;  %v2171_v60 = vadd.f32 %v3662_v62, %v2132_v25  ;;  %v2133_v61 = vmax.f32 %v1779_v58, %v2056_v39  ;;  %v3936_v54 = vmax.f32 %v3934_v14, %v3935_v11  ;;  %v3938_v58 = vld [vmem:[#allocation9_spill] sm:$0xff]  ;;  %v3952_v34 = vld [vmem:[#allocation18_spill] sm:$0xff] }
 0x18c   : > { %v2205_v13 = vmax.f32 %v2173_v8, 0.0  ;;  %v2174_v15 = vadd.f32 %v3662_v62, %v2135_v12  ;;  %v3939_v8 = vmax.f32 %v3937_v57, %v3938_v58 }
 0x18d   : > { %v2203_v16 = vmax.f32 %v2171_v60, 0.0  ;;  %v2172_v27 = vadd.f32 %v3662_v62, %v2133_v61  ;;  %v2950_v28 = vpop.f32.mrb[52].mxu0  ;;  %v2992_v63 = vpop.f32.mrb[52].mxu1 }
 0x18e   : > { %v2736_v0 = vpack.c.bf16 %v2205_v13, %v2205_v13  ;;  %v2206_v20 = vmax.f32 %v2174_v15, 0.0  ;;  %v1784_v26 = vmax.f32 %v3926_v23, %v2950_v28  ;;  %v1715_v29 = vpop.f32.mrb[53].mxu0  ;;  %v2069_v32 = vpop.f32.mrb[53].mxu1 }
 0x18f   : > { %v2734_v42 = vpack.c.bf16 %v2203_v16, %v2203_v16  ;;  %v2204_v43 = vmax.f32 %v2172_v27, 0.0  ;;  %v1782_v38 = vmax.f32 %v3927_v35, %v1715_v29  ;;  %v2951_v41 = vpop.f32.mrb[54].mxu0  ;;  %v2993_v44 = vpop.f32.mrb[54].mxu1  ;;  %v3940_v16 = vld [vmem:[#allocation10_spill] sm:$0xff]  ;;  %v3941_v27 = vld [vmem:[#allocation11_spill] sm:$0xff] }
 0x190   : > { %2366 = vst.msk [vmem:[%s3679_s22 + $0x48] sm:$0xf] %vm2347_vm2, %v2736_v0  ;;  %v2737_v45 = vpack.c.bf16 %v2206_v20, %v2206_v20  ;;  %v2138_v46 = vmax.f32 %v1784_v26, %v2992_v63  ;;  %v1785_v3 = vmax.f32 %v3928_v2, %v2951_v41  ;;  %v1718_v47 = vpop.f32.mrb[55].mxu0  ;;  %v2072_v1 = vpop.f32.mrb[55].mxu1  ;;  %v3942_v28 = vmax.f32 %v3940_v16, %v3941_v27 }
 0x191   : > { %2364 = vst.msk [vmem:[%s3679_s22 + $0x40] sm:$0xf] %vm2347_vm2, %v2734_v42  ;;  %v2735_v48 = vpack.c.bf16 %v2204_v43, %v2204_v43  ;;  %v2136_v49 = vmax.f32 %v1782_v38, %v2069_v32  ;;  %v1783_v6 = vmax.f32 %v3930_v5, %v1718_v47  ;;  %v3947_v5 = vld [vmem:[#allocation15_spill] sm:$0xff] }
 0x192   : > { %2367 = vst.msk [vmem:[%s3679_s22 + $0x4c] sm:$0xf] %vm2347_vm2, %v2737_v45  ;;  %v2177_v7 = vadd.f32 %v3662_v62, %v2138_v46  ;;  %v2139_v30 = vmax.f32 %v1785_v3, %v2993_v44  ;;  %v3943_v45 = vld [vmem:[#allocation12_spill] sm:$0xff]  ;;  %v3944_v46 = vld [vmem:[#allocation13_spill] sm:$0xff] }
 0x193   : > { %2365 = vst.msk [vmem:[%s3679_s22 + $0x44] sm:$0xf] %vm2347_vm2, %v2735_v48  ;;  %v2175_v53 = vadd.f32 %v3662_v62, %v2136_v49  ;;  %v2137_v56 = vmax.f32 %v1783_v6, %v2072_v1  ;;  %v3945_v2 = vmax.f32 %v3943_v45, %v3944_v46  ;;  %v3948_v6 = vmax.f32 %v3946_v59, %v3947_v5 }
 0x194   : > { %v2209_v31 = vmax.f32 %v2177_v7, 0.0  ;;  %v2178_v18 = vadd.f32 %v3662_v62, %v2139_v30 }
 0x195   : > { %v2207_v51 = vmax.f32 %v2175_v53, 0.0  ;;  %v2176_v52 = vadd.f32 %v3662_v62, %v2137_v56  ;;  %v2954_v19 = vpop.f32.mrb[56].mxu0  ;;  %v2996_v50 = vpop.f32.mrb[56].mxu1 }
 0x196   : > { %v2740_v17 = vpack.c.bf16 %v2209_v31, %v2209_v31  ;;  %v2210_v4 = vmax.f32 %v2178_v18, 0.0  ;;  %v1788_v10 = vmax.f32 %v3933_v9, %v2954_v19  ;;  %v1731_v36 = vpop.f32.mrb[57].mxu0  ;;  %v2085_v37 = vpop.f32.mrb[57].mxu1  ;;  %v3949_v18 = vld [vmem:[#allocation16_spill] sm:$0xff]  ;;  %v3953_v9 = vld [vmem:[#allocation19_spill] sm:$0xff] }
 0x197   : > { %v2738_v21 = vpack.c.bf16 %v2207_v51, %v2207_v51  ;;  %v2208_v22 = vmax.f32 %v2176_v52, 0.0  ;;  %v1786_v55 = vmax.f32 %v3936_v54, %v1731_v36  ;;  %v2955_v24 = vpop.f32.mrb[58].mxu0  ;;  %v2997_v39 = vpop.f32.mrb[58].mxu1  ;;  %v3950_v51 = vld [vmem:[#allocation17_spill] sm:$0xff] }
 0x198   : > { %2370 = vst.msk [vmem:[%s3679_s22 + $0x58] sm:$0xf] %vm2347_vm2, %v2740_v17  ;;  %v2741_v40 = vpack.c.bf16 %v2210_v4, %v2210_v4  ;;  %v2142_v25 = vmax.f32 %v1788_v10, %v2996_v50  ;;  %v1789_v12 = vmax.f32 %v3939_v8, %v2955_v24  ;;  %v1734_v60 = vpop.f32.mrb[59].mxu0  ;;  %v2088_v61 = vpop.f32.mrb[59].mxu1  ;;  %v3951_v52 = vmax.f32 %v3949_v18, %v3950_v51 }
 0x199   : > { %2368 = vst.msk [vmem:[%s3679_s22 + $0x50] sm:$0xf] %vm2347_vm2, %v2738_v21  ;;  %v2739_v13 = vpack.c.bf16 %v2208_v22, %v2208_v22  ;;  %v2140_v15 = vmax.f32 %v1786_v55, %v2085_v37  ;;  %v1787_v63 = vmax.f32 %v3942_v28, %v1734_v60  ;;  %v3954_v10 = vmax.f32 %v3952_v34, %v3953_v9 }
 0x19a   : > { %2371 = vst.msk [vmem:[%s3679_s22 + $0x5c] sm:$0xf] %vm2347_vm2, %v2741_v40  ;;  %v2181_v0 = vadd.f32 %v3662_v62, %v2142_v25  ;;  %v2143_v20 = vmax.f32 %v1789_v12, %v2997_v39 }
 0x19b   : > { %2369 = vst.msk [vmem:[%s3679_s22 + $0x54] sm:$0xf] %vm2347_vm2, %v2739_v13  ;;  %v2179_v23 = vadd.f32 %v3662_v62, %v2140_v15  ;;  %v2141_v26 = vmax.f32 %v1787_v63, %v2088_v61 }
 0x19c   : > { %v2213_v29 = vmax.f32 %v2181_v0, 0.0  ;;  %v2182_v32 = vadd.f32 %v3662_v62, %v2143_v20 }
 0x19d   : > { %v2211_v42 = vmax.f32 %v2179_v23, 0.0  ;;  %v2180_v43 = vadd.f32 %v3662_v62, %v2141_v26  ;;  %v2958_v35 = vpop.f32.mrb[60].mxu0  ;;  %v3000_v38 = vpop.f32.mrb[60].mxu1 }
 0x19e   : > { %v2744_v41 = vpack.c.bf16 %v2213_v29, %v2213_v29  ;;  %v2214_v44 = vmax.f32 %v2182_v32, 0.0  ;;  %v1792_v3 = vmax.f32 %v3945_v2, %v2958_v35  ;;  %v1747_v47 = vpop.f32.mrb[61].mxu0  ;;  %v2101_v1 = vpop.f32.mrb[61].mxu1 }
 0x19f   : > { %v2742_v48 = vpack.c.bf16 %v2211_v42, %v2211_v42  ;;  %v2212_v49 = vmax.f32 %v2180_v43, 0.0  ;;  %v1790_v7 = vmax.f32 %v3948_v6, %v1747_v47  ;;  %v2959_v30 = vpop.f32.mrb[62].mxu0  ;;  %v3001_v53 = vpop.f32.mrb[62].mxu1 }
 0x1a0   : > { %2374 = vst.msk [vmem:[%s3679_s22 + $0x68] sm:$0xf] %vm2347_vm2, %v2744_v41  ;;  %v2745_v56 = vpack.c.bf16 %v2214_v44, %v2214_v44  ;;  %v2146_v31 = vmax.f32 %v1792_v3, %v3000_v38  ;;  %v1793_v19 = vmax.f32 %v3951_v52, %v2959_v30  ;;  %v1750_v50 = vpop.f32.mrb[63].mxu0  ;;  %v2104_v17 = vpop.f32.mrb[63].mxu1 }
 0x1a1   : > { %2372 = vst.msk [vmem:[%s3679_s22 + $0x60] sm:$0xf] %vm2347_vm2, %v2742_v48  ;;  %v2743_v4 = vpack.c.bf16 %v2212_v49, %v2212_v49  ;;  %v2144_v33 = vmax.f32 %v1790_v7, %v2101_v1  ;;  %v1791_v36 = vmax.f32 %v3954_v10, %v1750_v50 }
 0x1a2   : > { %2375 = vst.msk [vmem:[%s3679_s22 + $0x6c] sm:$0xf] %vm2347_vm2, %v2745_v56  ;;  %v2185_v37 = vadd.f32 %v3662_v62, %v2146_v31  ;;  %v2147_v21 = vmax.f32 %v1793_v19, %v3001_v53 }
 0x1a3   : > { %2373 = vst.msk [vmem:[%s3679_s22 + $0x64] sm:$0xf] %vm2347_vm2, %v2743_v4  ;;  %v2183_v22 = vadd.f32 %v3662_v62, %v2144_v33  ;;  %v2145_v14 = vmax.f32 %v1791_v36, %v2104_v17 }
 0x1a4   : > { %v2217_v11 = vmax.f32 %v2185_v37, 0.0  ;;  %v2186_v54 = vadd.f32 %v3662_v62, %v2147_v21 }
 0x1a5   : > { %v2215_v55 = vmax.f32 %v2183_v22, 0.0  ;;  %v2184_v24 = vadd.f32 %v3662_v62, %v2145_v14 }
 0x1a6   : > { %v2748_v39 = vpack.c.bf16 %v2217_v11, %v2217_v11  ;;  %v2218_v40 = vmax.f32 %v2186_v54, 0.0 }
 0x1a7   : > { %v2746_v25 = vpack.c.bf16 %v2215_v55, %v2215_v55  ;;  %v2216_v57 = vmax.f32 %v2184_v24, 0.0 }
 0x1a8   : > { %2378 = vst.msk [vmem:[%s3679_s22 + $0x78] sm:$0xf] %vm2347_vm2, %v2748_v39  ;;  %v2749_v58 = vpack.c.bf16 %v2218_v40, %v2218_v40 }
 0x1a9   : > { %2376 = vst.msk [vmem:[%s3679_s22 + $0x70] sm:$0xf] %vm2347_vm2, %v2746_v25  ;;  %v2747_v8 = vpack.c.bf16 %v2216_v57, %v2216_v57 }
 0x1aa   : > { %2379 = vst.msk [vmem:[%s3679_s22 + $0x7c] sm:$0xf] %vm2347_vm2, %v2749_v58 }
 0x1ab   : > { %2377 = vst.msk [vmem:[%s3679_s22 + $0x74] sm:$0xf] %vm2347_vm2, %v2747_v8 }
 0x1ac PF: > { %p10_p9 = scmp.ge.s32.totalorder %s3160_s16, 4   ;;  %s3955_s12 = smov %s3117_s13 }
 0x1ad   : > { %s3956_s13 = smov %s3169_s19  ;;  %s3957_s14 = smov %s3160_s16 }
 0x1ae   :  { %12 = sbr.rel (!%p10_p9) target bundleno = 2 (0x2), region = 111 }

// kernel: bayesian_cnn_forward.9
= control target key start
LH: loop header
LB: loop body
LE: loop exit
PB: predicated region body
PF: predicated region fallthrough
CT: control target
= control target key end

     0   :  { %s1038_s12 = smov 0   ;;  %s1214_s0 = inlined_call_operand.vmem [shape: bf16[512,72], index: 0, kind: input, shape index: {}]   ;;  %s1215_s1 = inlined_call_operand.vmem [shape: bf16[72,16], index: 1, kind: input, shape index: {}]   ;;  %s1216_s2 = inlined_call_operand.vmem [shape: f32[1,16], index: 2, kind: input, shape index: {}]   ;;  %s1217_s3 = inlined_call_operand.vmem [shape: bf16[512,16], index: 3, kind: output, shape index: {}]  }
   0x1 LB: > { %s793_s13 = sadd.s32 4294967295, %s1016_s12   ;;  %p797_p0 = scmp.ge.s32.totalorder %s1016_s12, 1  ;;  %s1016_s12 = sphi %s1038_s12, %s13_s12  }
   0x2   : > { %p138_p1 = scmp.lt.s32.totalorder %s1016_s12, 3 }
   0x4   : > { %p139_p2 = pnand %p797_p0, %p138_p1 }
   0x5   : > { %v989_v0 = vld [vmem:[%s1215_s1] sm:$0xff] (!%p139_p2)   ;;  %v990_v1 = vld [vmem:[%s1215_s1 + $0x8] sm:$0xff] (!%p139_p2)   ;;  %s798_s18 = sshll.u32 (!%p139_p2), %s793_s13, 5  ;;  %v991_v2 = vld [vmem:[%s1215_s1 + $0x10] sm:$0xff] (!%p139_p2)   ;;  %vm330_vm0 = vcmask (!%p139_p2), 588800   ;;  %vm379_vm1 = vcmask (!%p139_p2), 1043456  }
   0x6   : > { %142 = sbr.rel (%p139_p2) target bundleno = 272 (0x110), region = 32  ;;  %927 = vmatprep.subr.bf16.mxu0 (!%p139_p2), %v989_v0  ;;  %969 = vmatprep.subr.bf16.mxu1 (!%p139_p2), %v989_v0  ;;  %p163_p3 = scmp.lt.s32.totalorder (!%p139_p2), %s798_s18, 63  ;;  %v992_v3 = vld [vmem:[%s1215_s1 + $0x18] sm:$0xff] (!%p139_p2)   ;;  %v993_v6 = vld [vmem:[%s1215_s1 + $0x20] ss:$0 sps:$4 sm:$0xff] (!%p139_p2)   ;;  %vm704_vm2 = vcmask (!%p139_p2), 125952  }
   0x7   : > { %928 = vmatpush3.bf16.msra.mxu0 (!%p139_p2), %v989_v0  ;;  %974 = vmatpush3.bf16.msra.mxu1 (!%p139_p2), %v989_v0  ;;  %v381_v7 = vsel (!%p139_p2), %vm379_vm1, %v993_v6, 0  ;;  %v1106_v22 = vld [vmem:[%s1216_s2] ss:$0 sm:$0xff] (!%p139_p2) }
   0x8   : > { %929 = vmatprep.subr.bf16.mxu0 (!%p139_p2), %v990_v1  ;;  %970 = vmatprep.subr.bf16.mxu1 (!%p139_p2), %v990_v1 }
   0xb   : > { %930 = vmatpush3.bf16.msra.mxu0 (!%p139_p2), %v990_v1  ;;  %975 = vmatpush3.bf16.msra.mxu1 (!%p139_p2), %v990_v1 }
   0xc   : > { %931 = vmatprep.subr.bf16.mxu0 (!%p139_p2), %v991_v2  ;;  %971 = vmatprep.subr.bf16.mxu1 (!%p139_p2), %v991_v2 }
   0xd   : > { %s1219_s18 = smov (!%p163_p3, %s798_s18), 63 }
   0xe   : > { %s799_s21 = sshll.u32 %s1219_s18, 2 }
   0xf   : > { %s1066_s26 = scalar_lea.vmem %s1214_s0, %s799_s21  ;;  %932 = vmatpush3.bf16.msra.mxu0 %v991_v2  ;;  %976 = vmatpush3.bf16.msra.mxu1 %v991_v2  ;;  %s1119_s6 = scalar_lea.vmem %s1217_s3, %s799_s21 }
  0x10   : > { %v994_v4 = vld [vmem:[%s1066_s26] sm:$0xff]   ;;  %933 = vmatprep.subr.bf16.mxu0 %v992_v3  ;;  %972 = vmatprep.subr.bf16.mxu1 %v992_v3  ;;  %v996_v8 = vld [vmem:[%s1066_s26 + $0x8] sm:$0xff]   ;;  %v998_v10 = vld [vmem:[%s1066_s26 + $0x10] sm:$0xff]  }
  0x11   : > { %v995_v5 = vld [vmem:[%s1066_s26 + $0x40] sm:$0xff]   ;;  %937 = vmatprep.mubr.msk.bf16.mxu0 %vm330_vm0, %v994_v4  ;;  %v997_v9 = vld [vmem:[%s1066_s26 + $0x48] sm:$0xff]   ;;  %v999_v11 = vld [vmem:[%s1066_s26 + $0x50] sm:$0xff]  }
  0x12   : > { %953 = vmatprep.mubr.msk.bf16.mxu1 %vm330_vm0, %v995_v5  ;;  %v1000_v12 = vld [vmem:[%s1066_s26 + $0x18] sm:$0xff]   ;;  %v1002_v14 = vld [vmem:[%s1066_s26 + $0x20] sm:$0xff]   ;;  %v1004_v16 = vld [vmem:[%s1066_s26 + $0x28] sm:$0xff]  }
  0x13   : > { %934 = vmatpush3.bf16.msra.mxu0 %v992_v3  ;;  %977 = vmatpush3.bf16.msra.mxu1 %v992_v3  ;;  %v1001_v13 = vld [vmem:[%s1066_s26 + $0x58] sm:$0xff]   ;;  %v1003_v15 = vld [vmem:[%s1066_s26 + $0x60] sm:$0xff]   ;;  %v1005_v17 = vld [vmem:[%s1066_s26 + $0x68] sm:$0xff]  }
  0x14   : > { %979 = vmatprep.subr.msk.bf16.mxu0 %vm379_vm1, %v993_v6  ;;  %980 = vmatprep.subr.msk.bf16.mxu1 %vm379_vm1, %v993_v6  ;;  %v1006_v18 = vld [vmem:[%s1066_s26 + $0x30] sm:$0xff]   ;;  %v1008_v20 = vld [vmem:[%s1066_s26 + $0x38] sm:$0xff]  }
  0x15   : > { %v1007_v19 = vld [vmem:[%s1066_s26 + $0x70] sm:$0xff]   ;;  %v1009_v21 = vld [vmem:[%s1066_s26 + $0x78] sm:$0xff]  }
  0x17   : > { %936 = vmatpush3.bf16.msra.mxu0 %v381_v7  ;;  %978 = vmatpush3.bf16.msra.mxu1 %v381_v7 }
  0x1a   : > { %938 = vmatmul.mubr.msk.bf16.vlgmr.msra.gmra.mrb[0].mxu0 %vm330_vm0, %v996_v8  ;;  %954 = vmatmul.mubr.msk.bf16.vlgmr.msra.gmra.mrb[0].mxu1 %vm330_vm0, %v997_v9 }
  0x1b   : > { %941 = vmatprep.mubr.msk.bf16.mxu0 %vm330_vm0, %v998_v10  ;;  %957 = vmatprep.mubr.msk.bf16.mxu1 %vm330_vm0, %v999_v11 }
  0x22   : > { %942 = vmatmul.mubr.msk.bf16.gmra.mrb[4].mxu0 %vm330_vm0, %v1000_v12  ;;  %958 = vmatmul.mubr.msk.bf16.gmra.mrb[4].mxu1 %vm330_vm0, %v1001_v13 }
  0x23   : > { %945 = vmatprep.mubr.msk.bf16.mxu0 %vm330_vm0, %v1002_v14  ;;  %961 = vmatprep.mubr.msk.bf16.mxu1 %vm330_vm0, %v1003_v15 }
  0x2a   : > { %946 = vmatmul.mubr.msk.bf16.gmra.mrb[8].mxu0 %vm330_vm0, %v1004_v16  ;;  %962 = vmatmul.mubr.msk.bf16.gmra.mrb[8].mxu1 %vm330_vm0, %v1005_v17 }
  0x2b   : > { %949 = vmatprep.mubr.msk.bf16.mxu0 %vm330_vm0, %v1006_v18  ;;  %965 = vmatprep.mubr.msk.bf16.mxu1 %vm330_vm0, %v1007_v19 }
  0x32   : > { %950 = vmatmul.mubr.msk.bf16.gmra.mrb[12].mxu0 %vm330_vm0, %v1008_v20  ;;  %966 = vmatmul.mubr.msk.bf16.gmra.mrb[12].mxu1 %vm330_vm0, %v1009_v21 }
  0xed   : > { %v939_v23 = vpop.f32.mrb[0].mxu0  ;;  %v955_v24 = vpop.f32.mrb[0].mxu1 }
  0xee   : > { %v426_v25 = vadd.f32 %v939_v23, %v1106_v22  ;;  %v490_v26 = vadd.f32 %v955_v24, %v1106_v22  ;;  %v417_v27 = vpop.f32.mrb[1].mxu0  ;;  %v481_v28 = vpop.f32.mrb[1].mxu1 }
  0xef   : > { %v418_v29 = vadd.f32 %v1106_v22, %v417_v27  ;;  %v482_v30 = vadd.f32 %v1106_v22, %v481_v28  ;;  %v940_v31 = vpop.f32.mrb[2].mxu0  ;;  %v956_v32 = vpop.f32.mrb[2].mxu1 }
  0xf0   : > { %v546_v33 = vmax.f32 %v426_v25, 0.0  ;;  %v562_v34 = vmax.f32 %v490_v26, 0.0  ;;  %v429_v35 = vadd.f32 %v940_v31, %v1106_v22  ;;  %v493_v36 = vadd.f32 %v956_v32, %v1106_v22  ;;  %v420_v37 = vpop.f32.mrb[3].mxu0  ;;  %v484_v38 = vpop.f32.mrb[3].mxu1 }
  0xf1   : > { %v544_v39 = vmax.f32 %v418_v29, 0.0  ;;  %v560_v40 = vmax.f32 %v482_v30, 0.0  ;;  %v421_v41 = vadd.f32 %v1106_v22, %v420_v37  ;;  %v485_v42 = vadd.f32 %v1106_v22, %v484_v38 }
  0xf2   : > { %v876_v43 = vpack.c.bf16 %v546_v33, %v546_v33  ;;  %v892_v44 = vpack.c.bf16 %v562_v34, %v562_v34  ;;  %v547_v45 = vmax.f32 %v429_v35, 0.0  ;;  %v563_v46 = vmax.f32 %v493_v36, 0.0 }
  0xf3   : > { %v874_v47 = vpack.c.bf16 %v544_v39, %v544_v39  ;;  %v890_v48 = vpack.c.bf16 %v560_v40, %v560_v40  ;;  %v545_v49 = vmax.f32 %v421_v41, 0.0  ;;  %v561_v50 = vmax.f32 %v485_v42, 0.0 }
  0xf4   : > { %707 = vst.msk [vmem:[%s1119_s6 + $0x8] sm:$0xf] %vm704_vm2, %v876_v43  ;;  %723 = vst.msk [vmem:[%s1119_s6 + $0x48] sm:$0xf] %vm704_vm2, %v892_v44  ;;  %v877_v51 = vpack.c.bf16 %v547_v45, %v547_v45  ;;  %v893_v52 = vpack.c.bf16 %v563_v46, %v563_v46 }
  0xf5   : > { %705 = vst.msk [vmem:[%s1119_s6] sm:$0xf] %vm704_vm2, %v874_v47  ;;  %721 = vst.msk [vmem:[%s1119_s6 + $0x40] sm:$0xf] %vm704_vm2, %v890_v48  ;;  %v875_v53 = vpack.c.bf16 %v545_v49, %v545_v49  ;;  %v891_v54 = vpack.c.bf16 %v561_v50, %v561_v50  ;;  %v943_v55 = vpop.f32.mrb[4].mxu0  ;;  %v959_v56 = vpop.f32.mrb[4].mxu1 }
  0xf6   : > { %708 = vst.msk [vmem:[%s1119_s6 + $0xc] sm:$0xf] %vm704_vm2, %v877_v51  ;;  %724 = vst.msk [vmem:[%s1119_s6 + $0x4c] sm:$0xf] %vm704_vm2, %v893_v52  ;;  %v442_v57 = vadd.f32 %v943_v55, %v1106_v22  ;;  %v506_v58 = vadd.f32 %v959_v56, %v1106_v22  ;;  %v433_v59 = vpop.f32.mrb[5].mxu0  ;;  %v497_v60 = vpop.f32.mrb[5].mxu1 }
  0xf7   : > { %706 = vst.msk [vmem:[%s1119_s6 + $0x4] sm:$0xf] %vm704_vm2, %v875_v53  ;;  %722 = vst.msk [vmem:[%s1119_s6 + $0x44] sm:$0xf] %vm704_vm2, %v891_v54  ;;  %v434_v61 = vadd.f32 %v1106_v22, %v433_v59  ;;  %v498_v62 = vadd.f32 %v1106_v22, %v497_v60  ;;  %v944_v63 = vpop.f32.mrb[6].mxu0  ;;  %v960_v0 = vpop.f32.mrb[6].mxu1 }
  0xf8   : > { %v550_v1 = vmax.f32 %v442_v57, 0.0  ;;  %v566_v2 = vmax.f32 %v506_v58, 0.0  ;;  %v445_v3 = vadd.f32 %v944_v63, %v1106_v22  ;;  %v509_v4 = vadd.f32 %v960_v0, %v1106_v22  ;;  %v436_v5 = vpop.f32.mrb[7].mxu0  ;;  %v500_v6 = vpop.f32.mrb[7].mxu1 }
  0xf9   : > { %v548_v7 = vmax.f32 %v434_v61, 0.0  ;;  %v564_v8 = vmax.f32 %v498_v62, 0.0  ;;  %v437_v9 = vadd.f32 %v1106_v22, %v436_v5  ;;  %v501_v10 = vadd.f32 %v1106_v22, %v500_v6 }
  0xfa   : > { %v880_v11 = vpack.c.bf16 %v550_v1, %v550_v1  ;;  %v896_v12 = vpack.c.bf16 %v566_v2, %v566_v2  ;;  %v551_v13 = vmax.f32 %v445_v3, 0.0  ;;  %v567_v14 = vmax.f32 %v509_v4, 0.0 }
  0xfb   : > { %v878_v15 = vpack.c.bf16 %v548_v7, %v548_v7  ;;  %v894_v16 = vpack.c.bf16 %v564_v8, %v564_v8  ;;  %v549_v17 = vmax.f32 %v437_v9, 0.0  ;;  %v565_v18 = vmax.f32 %v501_v10, 0.0 }
  0xfc   : > { %711 = vst.msk [vmem:[%s1119_s6 + $0x18] sm:$0xf] %vm704_vm2, %v880_v11  ;;  %727 = vst.msk [vmem:[%s1119_s6 + $0x58] sm:$0xf] %vm704_vm2, %v896_v12  ;;  %v881_v19 = vpack.c.bf16 %v551_v13, %v551_v13  ;;  %v897_v20 = vpack.c.bf16 %v567_v14, %v567_v14 }
  0xfd   : > { %709 = vst.msk [vmem:[%s1119_s6 + $0x10] sm:$0xf] %vm704_vm2, %v878_v15  ;;  %725 = vst.msk [vmem:[%s1119_s6 + $0x50] sm:$0xf] %vm704_vm2, %v894_v16  ;;  %v879_v21 = vpack.c.bf16 %v549_v17, %v549_v17  ;;  %v895_v23 = vpack.c.bf16 %v565_v18, %v565_v18  ;;  %v947_v24 = vpop.f32.mrb[8].mxu0  ;;  %v963_v25 = vpop.f32.mrb[8].mxu1 }
  0xfe   : > { %712 = vst.msk [vmem:[%s1119_s6 + $0x1c] sm:$0xf] %vm704_vm2, %v881_v19  ;;  %728 = vst.msk [vmem:[%s1119_s6 + $0x5c] sm:$0xf] %vm704_vm2, %v897_v20  ;;  %v458_v26 = vadd.f32 %v947_v24, %v1106_v22  ;;  %v522_v27 = vadd.f32 %v963_v25, %v1106_v22  ;;  %v449_v28 = vpop.f32.mrb[9].mxu0  ;;  %v513_v29 = vpop.f32.mrb[9].mxu1 }
  0xff   : > { %710 = vst.msk [vmem:[%s1119_s6 + $0x14] sm:$0xf] %vm704_vm2, %v879_v21  ;;  %726 = vst.msk [vmem:[%s1119_s6 + $0x54] sm:$0xf] %vm704_vm2, %v895_v23  ;;  %v450_v30 = vadd.f32 %v1106_v22, %v449_v28  ;;  %v514_v31 = vadd.f32 %v1106_v22, %v513_v29  ;;  %v948_v32 = vpop.f32.mrb[10].mxu0  ;;  %v964_v33 = vpop.f32.mrb[10].mxu1 }
 0x100   : > { %v554_v34 = vmax.f32 %v458_v26, 0.0  ;;  %v570_v35 = vmax.f32 %v522_v27, 0.0  ;;  %v461_v36 = vadd.f32 %v948_v32, %v1106_v22  ;;  %v525_v37 = vadd.f32 %v964_v33, %v1106_v22  ;;  %v452_v38 = vpop.f32.mrb[11].mxu0  ;;  %v516_v39 = vpop.f32.mrb[11].mxu1 }
 0x101   : > { %v552_v40 = vmax.f32 %v450_v30, 0.0  ;;  %v568_v41 = vmax.f32 %v514_v31, 0.0  ;;  %v453_v42 = vadd.f32 %v1106_v22, %v452_v38  ;;  %v517_v43 = vadd.f32 %v1106_v22, %v516_v39 }
 0x102   : > { %v884_v44 = vpack.c.bf16 %v554_v34, %v554_v34  ;;  %v900_v45 = vpack.c.bf16 %v570_v35, %v570_v35  ;;  %v555_v46 = vmax.f32 %v461_v36, 0.0  ;;  %v571_v47 = vmax.f32 %v525_v37, 0.0 }
 0x103   : > { %v882_v48 = vpack.c.bf16 %v552_v40, %v552_v40  ;;  %v898_v49 = vpack.c.bf16 %v568_v41, %v568_v41  ;;  %v553_v50 = vmax.f32 %v453_v42, 0.0  ;;  %v569_v51 = vmax.f32 %v517_v43, 0.0 }
 0x104   : > { %715 = vst.msk [vmem:[%s1119_s6 + $0x28] sm:$0xf] %vm704_vm2, %v884_v44  ;;  %731 = vst.msk [vmem:[%s1119_s6 + $0x68] sm:$0xf] %vm704_vm2, %v900_v45  ;;  %v885_v52 = vpack.c.bf16 %v555_v46, %v555_v46  ;;  %v901_v53 = vpack.c.bf16 %v571_v47, %v571_v47 }
 0x105   : > { %713 = vst.msk [vmem:[%s1119_s6 + $0x20] sm:$0xf] %vm704_vm2, %v882_v48  ;;  %729 = vst.msk [vmem:[%s1119_s6 + $0x60] sm:$0xf] %vm704_vm2, %v898_v49  ;;  %v883_v54 = vpack.c.bf16 %v553_v50, %v553_v50  ;;  %v899_v55 = vpack.c.bf16 %v569_v51, %v569_v51  ;;  %v951_v56 = vpop.f32.mrb[12].mxu0  ;;  %v967_v57 = vpop.f32.mrb[12].mxu1 }
 0x106   : > { %716 = vst.msk [vmem:[%s1119_s6 + $0x2c] sm:$0xf] %vm704_vm2, %v885_v52  ;;  %732 = vst.msk [vmem:[%s1119_s6 + $0x6c] sm:$0xf] %vm704_vm2, %v901_v53  ;;  %v474_v58 = vadd.f32 %v951_v56, %v1106_v22  ;;  %v538_v59 = vadd.f32 %v967_v57, %v1106_v22  ;;  %v465_v60 = vpop.f32.mrb[13].mxu0  ;;  %v529_v61 = vpop.f32.mrb[13].mxu1 }
 0x107   : > { %714 = vst.msk [vmem:[%s1119_s6 + $0x24] sm:$0xf] %vm704_vm2, %v883_v54  ;;  %730 = vst.msk [vmem:[%s1119_s6 + $0x64] sm:$0xf] %vm704_vm2, %v899_v55  ;;  %v466_v62 = vadd.f32 %v1106_v22, %v465_v60  ;;  %v530_v63 = vadd.f32 %v1106_v22, %v529_v61  ;;  %v952_v0 = vpop.f32.mrb[14].mxu0  ;;  %v968_v1 = vpop.f32.mrb[14].mxu1 }
 0x108   : > { %v558_v2 = vmax.f32 %v474_v58, 0.0  ;;  %v574_v3 = vmax.f32 %v538_v59, 0.0  ;;  %v477_v4 = vadd.f32 %v952_v0, %v1106_v22  ;;  %v541_v5 = vadd.f32 %v968_v1, %v1106_v22  ;;  %v468_v6 = vpop.f32.mrb[15].mxu0  ;;  %v532_v7 = vpop.f32.mrb[15].mxu1 }
 0x109   : > { %v556_v8 = vmax.f32 %v466_v62, 0.0  ;;  %v572_v9 = vmax.f32 %v530_v63, 0.0  ;;  %v469_v10 = vadd.f32 %v1106_v22, %v468_v6  ;;  %v533_v11 = vadd.f32 %v1106_v22, %v532_v7 }
 0x10a   : > { %v888_v12 = vpack.c.bf16 %v558_v2, %v558_v2  ;;  %v904_v13 = vpack.c.bf16 %v574_v3, %v574_v3  ;;  %v559_v14 = vmax.f32 %v477_v4, 0.0  ;;  %v575_v15 = vmax.f32 %v541_v5, 0.0 }
 0x10b   : > { %v886_v16 = vpack.c.bf16 %v556_v8, %v556_v8  ;;  %v902_v17 = vpack.c.bf16 %v572_v9, %v572_v9  ;;  %v557_v18 = vmax.f32 %v469_v10, 0.0  ;;  %v573_v19 = vmax.f32 %v533_v11, 0.0 }
 0x10c   : > { %719 = vst.msk [vmem:[%s1119_s6 + $0x38] sm:$0xf] %vm704_vm2, %v888_v12  ;;  %735 = vst.msk [vmem:[%s1119_s6 + $0x78] sm:$0xf] %vm704_vm2, %v904_v13  ;;  %v889_v20 = vpack.c.bf16 %v559_v14, %v559_v14  ;;  %v905_v21 = vpack.c.bf16 %v575_v15, %v575_v15 }
 0x10d   : > { %717 = vst.msk [vmem:[%s1119_s6 + $0x30] sm:$0xf] %vm704_vm2, %v886_v16  ;;  %733 = vst.msk [vmem:[%s1119_s6 + $0x70] sm:$0xf] %vm704_vm2, %v902_v17  ;;  %v887_v22 = vpack.c.bf16 %v557_v18, %v557_v18  ;;  %v903_v23 = vpack.c.bf16 %v573_v19, %v573_v19 }
 0x10e   : > { %720 = vst.msk [vmem:[%s1119_s6 + $0x3c] sm:$0xf] %vm704_vm2, %v889_v20  ;;  %736 = vst.msk [vmem:[%s1119_s6 + $0x7c] sm:$0xf] %vm704_vm2, %v905_v21 }
 0x10f   : > { %718 = vst.msk [vmem:[%s1119_s6 + $0x34] sm:$0xf] %vm704_vm2, %v887_v22  ;;  %734 = vst.msk [vmem:[%s1119_s6 + $0x74] sm:$0xf] %vm704_vm2, %v903_v23 }
 0x110 PF: > { %s13_s12 = sadd.s32 1, %s1016_s12  }
 0x111   : > { %p10_p4 = scmp.ge.s32.totalorder %s13_s12, 4  }
 0x113   :  { %12 = sbr.rel (!%p10_p4) target bundleno = 1 (0x1), region = 62 }

// kernel: bayesian_cnn_forward.10
= control target key start
LH: loop header
LB: loop body
LE: loop exit
PB: predicated region body
PF: predicated region fallthrough
CT: control target
= control target key end

     0   :  { %s1285_s12 = smov 0   ;;  %s1287_s13 = smov 0   ;;  %s1633_s0 = inlined_call_operand.vmem [shape: bf16[4,128,144], index: 0, kind: input, shape index: {}]   ;;  %s1634_s1 = inlined_call_operand.vmem [shape: bf16[144,16], index: 1, kind: input, shape index: {}]   ;;  %s1635_s2 = inlined_call_operand.vmem [shape: f32[1,16], index: 2, kind: input, shape index: {}]   ;;  %s1636_s3 = inlined_call_operand.vmem [shape: bf16[128,16], index: 3, kind: output, shape index: {}]  }
   0x1   :  { %s1289_s14 = smov 0  }
   0x2 LB: > { %s1044_s15 = sadd.s32 4294967295, %s1262_s14   ;;  %s1302_s16 = sadd.s32 1, %s1262_s14   ;;  %s1262_s14 = sphi %s1289_s14, %s1639_s14   ;;  %s1258_s13 = sphi %s1287_s13, %s1638_s13   ;;  %s1254_s12 = sphi %s1285_s12, %s1637_s12  }
   0x3   : > { %s17_s17 = ssub.s32 %s1262_s14, %s1302_s16  ;;  %s20_s18 = sadd.s32 1, %s1258_s13 }
   0x4   : > { %p18_p0 = scmp.eq.s32.totalorder %s17_s17, 0  ;;  %p27_p1 = scmp.ne.s32.totalorder %s1258_s13, %s1254_s12 }
   0x5   : > { %p28_p2 = scmp.eq.s32.totalorder %s1262_s14, 0  ;;  %p1047_p4 = scmp.ge.s32.totalorder %s1262_s14, 2 }
   0x6   : > { %s1311_s19 = scalar_select %p18_p0, %s1258_s13, %s20_s18  }
   0x7   : > { %p29_p3 = por %p28_p2, %p27_p1  ;;  %127 = sbr.rel (%p1047_p4) target bundleno = 34 (0x22), region = 24 }
   0xe   : > { %130 = sbr.rel (!%p29_p3) target bundleno = 34 (0x22), region = 28  ;;  %s132_s20 = sand.u32 (%p29_p3), 1, %s1258_s13  }
   0xf   : > { %s1149_s21 = sshll.u32 (%p29_p3), %s1262_s14, 6  ;;  %s1048_s22 = sshll.u32 (%p29_p3), %s132_s20, 8 }
  0x10   : > { %s1319_s25 = scalar_lea.vmem (%p29_p3), %s1633_s0, %s1149_s21  ;;  %s1324_s26 = scalar_lea.vmem (%p29_p3), [#allocation2], %s1048_s22 }
  0x11   : > { %v228_v0 = vld [vmem:[%s1319_s25] sm:$0xff] (%p29_p3)  ;;  %v230_v1 = vld [vmem:[%s1319_s25 + $0x8] sm:$0xff] (%p29_p3)  ;;  %v232_v2 = vld [vmem:[%s1319_s25 + $0x10] sm:$0xff] (%p29_p3) }
  0x12   : > { %229 = vst [vmem:[%s1324_s26] sm:$0xff] (%p29_p3), %v228_v0  ;;  %231 = vst [vmem:[%s1324_s26 + $0x8] sm:$0xff] (%p29_p3), %v230_v1  ;;  %v234_v3 = vld [vmem:[%s1319_s25 + $0x18] sm:$0xff] (%p29_p3)  ;;  %v236_v4 = vld [vmem:[%s1319_s25 + $0x20] sm:$0xff] (%p29_p3) }
  0x13   : > { %233 = vst [vmem:[%s1324_s26 + $0x10] sm:$0xff] (%p29_p3), %v232_v2  ;;  %v238_v5 = vld [vmem:[%s1319_s25 + $0x28] sm:$0xff] (%p29_p3)  ;;  %235 = vst [vmem:[%s1324_s26 + $0x18] sm:$0xff] (%p29_p3), %v234_v3  ;;  %v240_v6 = vld [vmem:[%s1319_s25 + $0x30] sm:$0xff] (%p29_p3) }
  0x14   : > { %237 = vst [vmem:[%s1324_s26 + $0x20] sm:$0xff] (%p29_p3), %v236_v4  ;;  %239 = vst [vmem:[%s1324_s26 + $0x28] sm:$0xff] (%p29_p3), %v238_v5  ;;  %v242_v7 = vld [vmem:[%s1319_s25 + $0x38] sm:$0xff] (%p29_p3)  ;;  %v244_v8 = vld [vmem:[%s1319_s25 + $0x80] sm:$0xff] (%p29_p3) }
  0x15   : > { %241 = vst [vmem:[%s1324_s26 + $0x30] sm:$0xff] %v240_v6  ;;  %243 = vst [vmem:[%s1324_s26 + $0x38] sm:$0xff] %v242_v7  ;;  %v246_v9 = vld [vmem:[%s1319_s25 + $0x88] sm:$0xff]  ;;  %v248_v10 = vld [vmem:[%s1319_s25 + $0x90] sm:$0xff] }
  0x16   : > { %245 = vst [vmem:[%s1324_s26 + $0x40] sm:$0xff] %v244_v8  ;;  %v250_v11 = vld [vmem:[%s1319_s25 + $0x98] sm:$0xff]  ;;  %247 = vst [vmem:[%s1324_s26 + $0x48] sm:$0xff] %v246_v9  ;;  %v252_v12 = vld [vmem:[%s1319_s25 + $0xa0] sm:$0xff] }
  0x17   : > { %249 = vst [vmem:[%s1324_s26 + $0x50] sm:$0xff] %v248_v10  ;;  %251 = vst [vmem:[%s1324_s26 + $0x58] sm:$0xff] %v250_v11  ;;  %v254_v13 = vld [vmem:[%s1319_s25 + $0xa8] sm:$0xff]  ;;  %v256_v14 = vld [vmem:[%s1319_s25 + $0xb0] sm:$0xff] }
  0x18   : > { %253 = vst [vmem:[%s1324_s26 + $0x60] sm:$0xff] %v252_v12  ;;  %255 = vst [vmem:[%s1324_s26 + $0x68] sm:$0xff] %v254_v13  ;;  %v258_v15 = vld [vmem:[%s1319_s25 + $0xb8] sm:$0xff]  ;;  %v260_v16 = vld [vmem:[%s1319_s25 + $0x100] sm:$0xff] }
  0x19   : > { %257 = vst [vmem:[%s1324_s26 + $0x70] sm:$0xff] %v256_v14  ;;  %v262_v17 = vld [vmem:[%s1319_s25 + $0x108] sm:$0xff]  ;;  %259 = vst [vmem:[%s1324_s26 + $0x78] sm:$0xff] %v258_v15  ;;  %v264_v18 = vld [vmem:[%s1319_s25 + $0x110] sm:$0xff] }
  0x1a   : > { %261 = vst [vmem:[%s1324_s26 + $0x80] sm:$0xff] %v260_v16  ;;  %263 = vst [vmem:[%s1324_s26 + $0x88] sm:$0xff] %v262_v17  ;;  %v266_v19 = vld [vmem:[%s1319_s25 + $0x118] sm:$0xff]  ;;  %v268_v20 = vld [vmem:[%s1319_s25 + $0x120] sm:$0xff] }
  0x1b   : > { %265 = vst [vmem:[%s1324_s26 + $0x90] sm:$0xff] %v264_v18  ;;  %267 = vst [vmem:[%s1324_s26 + $0x98] sm:$0xff] %v266_v19  ;;  %v270_v21 = vld [vmem:[%s1319_s25 + $0x128] sm:$0xff]  ;;  %v272_v22 = vld [vmem:[%s1319_s25 + $0x130] sm:$0xff] }
  0x1c   : > { %269 = vst [vmem:[%s1324_s26 + $0xa0] sm:$0xff] %v268_v20  ;;  %v274_v23 = vld [vmem:[%s1319_s25 + $0x138] sm:$0xff]  ;;  %271 = vst [vmem:[%s1324_s26 + $0xa8] sm:$0xff] %v270_v21  ;;  %v276_v24 = vld [vmem:[%s1319_s25 + $0x180] sm:$0xff] }
  0x1d   : > { %273 = vst [vmem:[%s1324_s26 + $0xb0] sm:$0xff] %v272_v22  ;;  %275 = vst [vmem:[%s1324_s26 + $0xb8] sm:$0xff] %v274_v23  ;;  %v278_v25 = vld [vmem:[%s1319_s25 + $0x188] sm:$0xff]  ;;  %v280_v26 = vld [vmem:[%s1319_s25 + $0x190] sm:$0xff] }
  0x1e   : > { %277 = vst [vmem:[%s1324_s26 + $0xc0] sm:$0xff] %v276_v24  ;;  %279 = vst [vmem:[%s1324_s26 + $0xc8] sm:$0xff] %v278_v25  ;;  %v282_v27 = vld [vmem:[%s1319_s25 + $0x198] sm:$0xff]  ;;  %v284_v28 = vld [vmem:[%s1319_s25 + $0x1a0] sm:$0xff] }
  0x1f   : > { %281 = vst [vmem:[%s1324_s26 + $0xd0] sm:$0xff] %v280_v26  ;;  %v286_v29 = vld [vmem:[%s1319_s25 + $0x1a8] sm:$0xff]  ;;  %283 = vst [vmem:[%s1324_s26 + $0xd8] sm:$0xff] %v282_v27  ;;  %v288_v30 = vld [vmem:[%s1319_s25 + $0x1b0] sm:$0xff] }
  0x20   : > { %285 = vst [vmem:[%s1324_s26 + $0xe0] sm:$0xff] %v284_v28  ;;  %287 = vst [vmem:[%s1324_s26 + $0xe8] sm:$0xff] %v286_v29  ;;  %v290_v31 = vld [vmem:[%s1319_s25 + $0x1b8] sm:$0xff] }
  0x21   : > { %289 = vst [vmem:[%s1324_s26 + $0xf0] sm:$0xff] %v288_v30  ;;  %291 = vst [vmem:[%s1324_s26 + $0xf8] sm:$0xff] %v290_v31 }
  0x22 PF: > { %p1052_p5 = scmp.ge.s32.totalorder %s1262_s14, 1  ;;  %p296_p6 = scmp.lt.s32.totalorder %s1262_s14, 3 }
  0x24   : > { %p297_p7 = pnand %p1052_p5, %p296_p6 }
  0x25   : > { %v1183_v32 = vld [vmem:[%s1634_s1] sm:$0xff] (!%p297_p7)   ;;  %v1264_v33 = vmov (!%p297_p7), 0   ;;  %s303_s29 = sand.u32 (!%p297_p7), 1, %s1254_s12   ;;  %v1398_v34 = vld [vmem:[%s1634_s1 + $0x8] sm:$0xff] (!%p297_p7)   ;;  %v1407_v35 = vld [vmem:[%s1634_s1 + $0x10] sm:$0xff] (!%p297_p7)   ;;  %vm450_vm0 = vcmask (!%p297_p7), 130048  }
  0x26   : > { %300 = sbr.rel (%p297_p7) target bundleno = 359 (0x167), region = 66  ;;  %463 = vmatprep.subr.bf16.mxu0 (!%p297_p7), %v1264_v33  ;;  %585 = vmatprep.subr.bf16.mxu1 (!%p297_p7), %v1264_v33  ;;  %s1053_s5 = sshll.u32 (!%p297_p7), %s303_s29, 8  ;;  %v1414_v36 = vld [vmem:[%s1634_s1 + $0x18] sm:$0xff] (!%p297_p7)   ;;  %v1431_v39 = vld [vmem:[%s1634_s1 + $0x20] sm:$0xff] (!%p297_p7)   ;;  %v1440_v40 = vld [vmem:[%s1634_s1 + $0x28] sm:$0xff] (!%p297_p7)   ;;  %vm973_vm1 = vcmask (!%p297_p7), 125952  }
  0x27   : > { %464 = vmatpush1.bf16.msra.mxu0 (!%p297_p7), %v1183_v32  ;;  %586 = vmatpush1.bf16.msra.mxu1 (!%p297_p7), %v1183_v32  ;;  %s1416_s10 = scalar_lea.vmem (!%p297_p7), [#allocation2], %s1053_s5  ;;  %v1449_v41 = vld [vmem:[%s1634_s1 + $0x30] sm:$0xff] (!%p297_p7)   ;;  %v1458_v42 = vld [vmem:[%s1634_s1 + $0x38] sm:$0xff] (!%p297_p7)   ;;  %v1467_v43 = vld [vmem:[%s1634_s1 + $0x40] sm:$0xff] (!%p297_p7)   ;;  %s1054_s26 = sshll.u32 (!%p297_p7), %s1044_s15, 3 }
  0x28   : > { %465 = vmatprep.subr.bf16.mxu0 (!%p297_p7), %v1264_v33  ;;  %587 = vmatprep.subr.bf16.mxu1 (!%p297_p7), %v1264_v33  ;;  %v1194_v37 = vld [vmem:[%s1416_s10 + $0x4] ss:$8 sps:$4 sm:$0xff] (!%p297_p7)   ;;  %v1192_v44 = vld [vmem:[%s1416_s10] ss:$8 sps:$4 sm:$0xff] (!%p297_p7)   ;;  %v1198_v46 = vld [vmem:[%s1416_s10 + $0x14] ss:$8 sps:$4 sm:$0xff] (!%p297_p7)  }
  0x29   : > { %v1197_v38 = vld [vmem:[%s1416_s10 + $0x44] ss:$8 sps:$4 sm:$0xff] (!%p297_p7)   ;;  %1073 = vmatprep.mubr.msk.bf16.mxu0 (!%p297_p7), %vm450_vm0, %v1194_v37  ;;  %v1195_v45 = vld [vmem:[%s1416_s10 + $0x40] ss:$8 sps:$4 sm:$0xff] (!%p297_p7)   ;;  %v1201_v47 = vld [vmem:[%s1416_s10 + $0x54] ss:$8 sps:$4 sm:$0xff] (!%p297_p7)  }
  0x2a   : > { %1093 = vmatprep.mubr.msk.bf16.mxu1 (!%p297_p7), %vm450_vm0, %v1197_v38  ;;  %v1200_v48 = vld [vmem:[%s1416_s10 + $0x10] ss:$8 sps:$4 sm:$0xff] (!%p297_p7)   ;;  %v1204_v50 = vld [vmem:[%s1416_s10 + $0x24] ss:$8 sps:$4 sm:$0xff] (!%p297_p7)   ;;  %v1206_v52 = vld [vmem:[%s1416_s10 + $0x20] ss:$8 sps:$4 sm:$0xff] (!%p297_p7)  }
  0x2b   : > { %466 = vmatpush1.bf16.msra.mxu0 (!%p297_p7), %v1398_v34  ;;  %588 = vmatpush1.bf16.msra.mxu1 (!%p297_p7), %v1398_v34  ;;  %v1203_v49 = vld [vmem:[%s1416_s10 + $0x50] ss:$8 sps:$4 sm:$0xff] (!%p297_p7)   ;;  %v1207_v51 = vld [vmem:[%s1416_s10 + $0x64] ss:$8 sps:$4 sm:$0xff] (!%p297_p7)   ;;  %v1209_v53 = vld [vmem:[%s1416_s10 + $0x60] ss:$8 sps:$4 sm:$0xff] (!%p297_p7)  }
  0x2c   : > { %467 = vmatprep.subr.bf16.mxu0 (!%p297_p7), %v1264_v33  ;;  %589 = vmatprep.subr.bf16.mxu1 (!%p297_p7), %v1264_v33  ;;  %v1210_v54 = vld [vmem:[%s1416_s10 + $0x34] ss:$8 sps:$4 sm:$0xff] (!%p297_p7)   ;;  %v1212_v56 = vld [vmem:[%s1416_s10 + $0x30] ss:$8 sps:$4 sm:$0xff] (!%p297_p7)   ;;  %v1218_v58 = vld [vmem:[%s1416_s10 + $0x84] ss:$8 sps:$4 sm:$0xff] (!%p297_p7)  }
  0x2d   : > { %v1213_v55 = vld [vmem:[%s1416_s10 + $0x74] ss:$8 sps:$4 sm:$0xff]   ;;  %v1215_v57 = vld [vmem:[%s1416_s10 + $0x70] ss:$8 sps:$4 sm:$0xff]   ;;  %v1221_v59 = vld [vmem:[%s1416_s10 + $0xc4] ss:$8 sps:$4 sm:$0xff]  }
  0x2e   : > { %v1216_v60 = vld [vmem:[%s1416_s10 + $0x80] ss:$8 sps:$4 sm:$0xff]   ;;  %v1222_v62 = vld [vmem:[%s1416_s10 + $0x94] ss:$8 sps:$4 sm:$0xff]   ;;  %v1226_v0 = vld [vmem:[%s1416_s10 + $0x90] ss:$8 sps:$4 sm:$0xff]  }
  0x2f   : > { %468 = vmatpush1.bf16.msra.mxu0 %v1407_v35  ;;  %590 = vmatpush1.bf16.msra.mxu1 %v1407_v35  ;;  %v1219_v61 = vld [vmem:[%s1416_s10 + $0xc0] ss:$8 sps:$4 sm:$0xff]   ;;  %v1224_v63 = vld [vmem:[%s1416_s10 + $0xd4] ss:$8 sps:$4 sm:$0xff]   ;;  %v1227_v1 = vld [vmem:[%s1416_s10 + $0xd0] ss:$8 sps:$4 sm:$0xff]  }
  0x30   : > { %469 = vmatprep.subr.bf16.mxu0 %v1264_v33  ;;  %591 = vmatprep.subr.bf16.mxu1 %v1264_v33  ;;  %v1228_v2 = vld [vmem:[%s1416_s10 + $0xa4] ss:$8 sps:$4 sm:$0xff]   ;;  %v1232_v4 = vld [vmem:[%s1416_s10 + $0xa0] ss:$8 sps:$4 sm:$0xff]   ;;  %v1234_v6 = vld [vmem:[%s1416_s10 + $0xb4] ss:$8 sps:$4 sm:$0xff]  }
  0x31   : > { %v1230_v3 = vld [vmem:[%s1416_s10 + $0xe4] ss:$8 sps:$4 sm:$0xff]   ;;  %v1233_v5 = vld [vmem:[%s1416_s10 + $0xe0] ss:$8 sps:$4 sm:$0xff]   ;;  %v1236_v7 = vld [vmem:[%s1416_s10 + $0xf4] ss:$8 sps:$4 sm:$0xff]  }
  0x32   : > { %v1238_v8 = vld [vmem:[%s1416_s10 + $0xb0] ss:$8 sps:$4 sm:$0xff]   ;;  %p328_p8 = scmp.lt.s32.totalorder %s1054_s26, 15 }
  0x33   : > { %470 = vmatpush1.bf16.msra.mxu0 %v1414_v36  ;;  %592 = vmatpush1.bf16.msra.mxu1 %v1414_v36  ;;  %v1239_v9 = vld [vmem:[%s1416_s10 + $0xf0] ss:$8 sps:$4 sm:$0xff]  }
  0x34   : > { %471 = vmatprep.subr.bf16.mxu0 %v1264_v33  ;;  %593 = vmatprep.subr.bf16.mxu1 %v1264_v33  ;;  %s1641_s26 = smov (!%p328_p8, %s1054_s26), 15 }
  0x35   : > { %s1055_s14 = sshll.u32 %s1641_s26, 2 }
  0x36   : > { %s1587_s30 = scalar_lea.vmem %s1636_s3, %s1055_s14 }
  0x37   : > { %472 = vmatpush1.bf16.msra.mxu0 %v1431_v39  ;;  %594 = vmatpush1.bf16.msra.mxu1 %v1431_v39 }
  0x38   : > { %473 = vmatprep.subr.bf16.mxu0 %v1264_v33  ;;  %595 = vmatprep.subr.bf16.mxu1 %v1264_v33 }
  0x3b   : > { %474 = vmatpush1.bf16.msra.mxu0 %v1440_v40  ;;  %596 = vmatpush1.bf16.msra.mxu1 %v1440_v40 }
  0x3c   : > { %475 = vmatprep.subr.bf16.mxu0 %v1264_v33  ;;  %597 = vmatprep.subr.bf16.mxu1 %v1264_v33 }
  0x3f   : > { %476 = vmatpush1.bf16.msra.mxu0 %v1449_v41  ;;  %598 = vmatpush1.bf16.msra.mxu1 %v1449_v41 }
  0x40   : > { %477 = vmatprep.subr.bf16.mxu0 %v1264_v33  ;;  %599 = vmatprep.subr.bf16.mxu1 %v1264_v33 }
  0x43   : > { %478 = vmatpush1.bf16.msra.mxu0 %v1458_v42  ;;  %600 = vmatpush1.bf16.msra.mxu1 %v1458_v42 }
  0x44   : > { %479 = vmatprep.subr.bf16.mxu0 %v1264_v33  ;;  %601 = vmatprep.subr.bf16.mxu1 %v1264_v33 }
  0x47   : > { %480 = vmatpush1.bf16.msra.mxu0 %v1467_v43  ;;  %602 = vmatpush1.bf16.msra.mxu1 %v1467_v43 }
  0x48   : > { %715 = vmatprep.subr.bf16.mxu0 %v1264_v33  ;;  %845 = vmatprep.subr.bf16.mxu1 %v1264_v33 }
  0x4a   : > { %496 = vmatmul.mubr.bf16.vlgmr.msra.gmra.mrb[0].mxu0 %v1192_v44  ;;  %618 = vmatmul.mubr.bf16.vlgmr.msra.gmra.mrb[0].mxu1 %v1195_v45 }
  0x4b   : > { %716 = vmatpush1.bf16.msra.mxu0 %v1183_v32  ;;  %846 = vmatpush1.bf16.msra.mxu1 %v1183_v32 }
  0x4c   : > { %717 = vmatprep.subr.bf16.mxu0 %v1264_v33  ;;  %847 = vmatprep.subr.bf16.mxu1 %v1264_v33 }
  0x4d   : > { %1074 = vmatprep.mubr.msk.bf16.mxu0 %vm450_vm0, %v1198_v46  ;;  %1094 = vmatprep.mubr.msk.bf16.mxu1 %vm450_vm0, %v1201_v47 }
  0x4f   : > { %718 = vmatpush1.bf16.msra.mxu0 %v1398_v34  ;;  %848 = vmatpush1.bf16.msra.mxu1 %v1398_v34 }
  0x50   : > { %719 = vmatprep.subr.bf16.mxu0 %v1264_v33  ;;  %849 = vmatprep.subr.bf16.mxu1 %v1264_v33 }
  0x52   : > { %504 = vmatmul.mubr.bf16.gmra.mrb[4].mxu0 %v1200_v48  ;;  %626 = vmatmul.mubr.bf16.gmra.mrb[4].mxu1 %v1203_v49 }
  0x53   : > { %720 = vmatpush1.bf16.msra.mxu0 %v1407_v35  ;;  %850 = vmatpush1.bf16.msra.mxu1 %v1407_v35 }
  0x54   : > { %721 = vmatprep.subr.bf16.mxu0 %v1264_v33  ;;  %851 = vmatprep.subr.bf16.mxu1 %v1264_v33 }
  0x55   : > { %1075 = vmatprep.mubr.msk.bf16.mxu0 %vm450_vm0, %v1204_v50  ;;  %1095 = vmatprep.mubr.msk.bf16.mxu1 %vm450_vm0, %v1207_v51 }
  0x57   : > { %722 = vmatpush1.bf16.msra.mxu0 %v1414_v36  ;;  %852 = vmatpush1.bf16.msra.mxu1 %v1414_v36 }
  0x58   : > { %723 = vmatprep.subr.bf16.mxu0 %v1264_v33  ;;  %853 = vmatprep.subr.bf16.mxu1 %v1264_v33 }
  0x5a   : > { %512 = vmatmul.mubr.bf16.gmra.mrb[8].mxu0 %v1206_v52  ;;  %634 = vmatmul.mubr.bf16.gmra.mrb[8].mxu1 %v1209_v53 }
  0x5b   : > { %724 = vmatpush1.bf16.msra.mxu0 %v1431_v39  ;;  %854 = vmatpush1.bf16.msra.mxu1 %v1431_v39 }
  0x5c   : > { %725 = vmatprep.subr.bf16.mxu0 %v1264_v33  ;;  %855 = vmatprep.subr.bf16.mxu1 %v1264_v33 }
  0x5d   : > { %1076 = vmatprep.mubr.msk.bf16.mxu0 %vm450_vm0, %v1210_v54  ;;  %1096 = vmatprep.mubr.msk.bf16.mxu1 %vm450_vm0, %v1213_v55  ;;  %v1580_v55 = vld [vmem:[%s1635_s2] ss:$0 sm:$0xff] }
  0x5f   : > { %726 = vmatpush1.bf16.msra.mxu0 %v1440_v40  ;;  %856 = vmatpush1.bf16.msra.mxu1 %v1440_v40 }
  0x60   : > { %727 = vmatprep.subr.bf16.mxu0 %v1264_v33  ;;  %857 = vmatprep.subr.bf16.mxu1 %v1264_v33 }
  0x62   : > { %520 = vmatmul.mubr.bf16.gmra.mrb[12].mxu0 %v1212_v56  ;;  %642 = vmatmul.mubr.bf16.gmra.mrb[12].mxu1 %v1215_v57 }
  0x63   : > { %728 = vmatpush1.bf16.msra.mxu0 %v1449_v41  ;;  %858 = vmatpush1.bf16.msra.mxu1 %v1449_v41 }
  0x64   : > { %729 = vmatprep.subr.bf16.mxu0 %v1264_v33  ;;  %859 = vmatprep.subr.bf16.mxu1 %v1264_v33 }
  0x65   : > { %1113 = vmatprep.mubr.msk.bf16.mxu0 %vm450_vm0, %v1218_v58  ;;  %1133 = vmatprep.mubr.msk.bf16.mxu1 %vm450_vm0, %v1221_v59 }
  0x67   : > { %730 = vmatpush1.bf16.msra.mxu0 %v1458_v42  ;;  %860 = vmatpush1.bf16.msra.mxu1 %v1458_v42 }
  0x68   : > { %731 = vmatprep.subr.bf16.mxu0 %v1264_v33  ;;  %861 = vmatprep.subr.bf16.mxu1 %v1264_v33 }
  0x6b   : > { %732 = vmatpush1.bf16.msra.mxu0 %v1467_v43  ;;  %862 = vmatpush1.bf16.msra.mxu1 %v1467_v43 }
  0x6e   : > { %748 = vmatmul.mubr.bf16.vlgmr.msra.gmra.mrb[16].mxu0 %v1216_v60  ;;  %878 = vmatmul.mubr.bf16.vlgmr.msra.gmra.mrb[16].mxu1 %v1219_v61 }
  0x6f   : > { %1114 = vmatprep.mubr.msk.bf16.mxu0 %vm450_vm0, %v1222_v62  ;;  %1134 = vmatprep.mubr.msk.bf16.mxu1 %vm450_vm0, %v1224_v63 }
  0x76   : > { %756 = vmatmul.mubr.bf16.gmra.mrb[20].mxu0 %v1226_v0  ;;  %886 = vmatmul.mubr.bf16.gmra.mrb[20].mxu1 %v1227_v1 }
  0x77   : > { %1115 = vmatprep.mubr.msk.bf16.mxu0 %vm450_vm0, %v1228_v2  ;;  %1135 = vmatprep.mubr.msk.bf16.mxu1 %vm450_vm0, %v1230_v3 }
  0x7e   : > { %764 = vmatmul.mubr.bf16.gmra.mrb[24].mxu0 %v1232_v4  ;;  %894 = vmatmul.mubr.bf16.gmra.mrb[24].mxu1 %v1233_v5 }
  0x7f   : > { %1116 = vmatprep.mubr.msk.bf16.mxu0 %vm450_vm0, %v1234_v6  ;;  %1136 = vmatprep.mubr.msk.bf16.mxu1 %vm450_vm0, %v1236_v7 }
  0x86   : > { %772 = vmatmul.mubr.bf16.gmra.mrb[28].mxu0 %v1238_v8  ;;  %902 = vmatmul.mubr.bf16.gmra.mrb[28].mxu1 %v1239_v9 }
 0x11d   : > { %v497_v10 = vpop.f32.mrb[0].mxu0  ;;  %v619_v11 = vpop.f32.mrb[0].mxu1 }
 0x11e   : > { %v650_v12 = vmax.f32 %v497_v10, %v619_v11  ;;  %v499_v13 = vpop.f32.mrb[1].mxu0  ;;  %v621_v14 = vpop.f32.mrb[1].mxu1 }
 0x11f   : > { %v500_v15 = vpop.f32.mrb[2].mxu0  ;;  %v622_v16 = vpop.f32.mrb[2].mxu1 }
 0x120   : > { %v651_v17 = vmax.f32 %v500_v15, %v622_v16  ;;  %v502_v18 = vpop.f32.mrb[3].mxu0  ;;  %v624_v19 = vpop.f32.mrb[3].mxu1 }
 0x125   : > { %v505_v20 = vpop.f32.mrb[4].mxu0  ;;  %v627_v21 = vpop.f32.mrb[4].mxu1 }
 0x126   : > { %v507_v22 = vpop.f32.mrb[5].mxu0  ;;  %v652_v23 = vmax.f32 %v505_v20, %v627_v21  ;;  %v629_v24 = vpop.f32.mrb[5].mxu1 }
 0x127   : > { %v508_v25 = vpop.f32.mrb[6].mxu0  ;;  %v630_v26 = vpop.f32.mrb[6].mxu1 }
 0x128   : > { %v510_v27 = vpop.f32.mrb[7].mxu0  ;;  %v653_v28 = vmax.f32 %v508_v25, %v630_v26  ;;  %v632_v29 = vpop.f32.mrb[7].mxu1 }
 0x12d   : > { %v1551_v30 = vpop.f32.mrb[8].mxu0  ;;  %v1553_v31 = vpop.f32.mrb[8].mxu1 }
 0x12e   : > { %v515_v32 = vpop.f32.mrb[9].mxu0  ;;  %v654_v33 = vmax.f32 %v1551_v30, %v1553_v31  ;;  %v637_v34 = vpop.f32.mrb[9].mxu1 }
 0x12f   : > { %v1557_v35 = vpop.f32.mrb[10].mxu0  ;;  %v1559_v36 = vpop.f32.mrb[10].mxu1 }
 0x130   : > { %v518_v37 = vpop.f32.mrb[11].mxu0  ;;  %v655_v38 = vmax.f32 %v1557_v35, %v1559_v36  ;;  %v640_v39 = vpop.f32.mrb[11].mxu1 }
 0x135   : > { %v1563_v40 = vpop.f32.mrb[12].mxu0  ;;  %v1565_v41 = vpop.f32.mrb[12].mxu1 }
 0x136   : > { %v523_v42 = vpop.f32.mrb[13].mxu0  ;;  %v656_v43 = vmax.f32 %v1563_v40, %v1565_v41  ;;  %v645_v44 = vpop.f32.mrb[13].mxu1 }
 0x137   : > { %v1569_v45 = vpop.f32.mrb[14].mxu0  ;;  %v1571_v46 = vpop.f32.mrb[14].mxu1 }
 0x138   : > { %v526_v47 = vpop.f32.mrb[15].mxu0  ;;  %v657_v48 = vmax.f32 %v1569_v45, %v1571_v46  ;;  %v648_v49 = vpop.f32.mrb[15].mxu1 }
 0x141   : > { %v749_v50 = vpop.f32.mrb[16].mxu0  ;;  %v879_v51 = vpop.f32.mrb[16].mxu1 }
 0x142   : > { %v780_v52 = vmax.f32 %v650_v12, %v749_v50  ;;  %v751_v53 = vpop.f32.mrb[17].mxu0  ;;  %v881_v54 = vpop.f32.mrb[17].mxu1 }
 0x143   : > { %v752_v56 = vpop.f32.mrb[18].mxu0  ;;  %v882_v57 = vpop.f32.mrb[18].mxu1 }
 0x144   : > { %v910_v58 = vmax.f32 %v780_v52, %v879_v51  ;;  %v781_v59 = vmax.f32 %v651_v17, %v752_v56  ;;  %v754_v60 = vpop.f32.mrb[19].mxu0  ;;  %v884_v61 = vpop.f32.mrb[19].mxu1 }
 0x146   : > { %v925_v62 = vadd.f32 %v1580_v55, %v910_v58  ;;  %v911_v63 = vmax.f32 %v781_v59, %v882_v57 }
 0x148   : > { %v933_v0 = vmax.f32 %v925_v62, 0.0  ;;  %v926_v1 = vadd.f32 %v1580_v55, %v911_v63 }
 0x149   : > { %v757_v2 = vpop.f32.mrb[20].mxu0  ;;  %v887_v3 = vpop.f32.mrb[20].mxu1 }
 0x14a   : > { %v1150_v4 = vpack.c.bf16 %v933_v0, %v933_v0  ;;  %v934_v5 = vmax.f32 %v926_v1, 0.0  ;;  %v782_v6 = vmax.f32 %v652_v23, %v757_v2  ;;  %v759_v7 = vpop.f32.mrb[21].mxu0  ;;  %v889_v8 = vpop.f32.mrb[21].mxu1 }
 0x14b   : > { %v760_v9 = vpop.f32.mrb[22].mxu0  ;;  %v890_v10 = vpop.f32.mrb[22].mxu1 }
 0x14c   : > { %974 = vst.msk [vmem:[%s1587_s30] sm:$0xf] %vm973_vm1, %v1150_v4  ;;  %v1151_v11 = vpack.c.bf16 %v934_v5, %v934_v5  ;;  %v912_v12 = vmax.f32 %v782_v6, %v887_v3  ;;  %v783_v13 = vmax.f32 %v653_v28, %v760_v9  ;;  %v762_v14 = vpop.f32.mrb[23].mxu0  ;;  %v892_v15 = vpop.f32.mrb[23].mxu1 }
 0x14e   : > { %975 = vst.msk [vmem:[%s1587_s30 + $0x4] sm:$0xf] %vm973_vm1, %v1151_v11  ;;  %v927_v16 = vadd.f32 %v1580_v55, %v912_v12  ;;  %v913_v17 = vmax.f32 %v783_v13, %v890_v10 }
 0x150   : > { %v935_v18 = vmax.f32 %v927_v16, 0.0  ;;  %v928_v19 = vadd.f32 %v1580_v55, %v913_v17 }
 0x151   : > { %v765_v20 = vpop.f32.mrb[24].mxu0  ;;  %v895_v21 = vpop.f32.mrb[24].mxu1 }
 0x152   : > { %v1152_v22 = vpack.c.bf16 %v935_v18, %v935_v18  ;;  %v936_v23 = vmax.f32 %v928_v19, 0.0  ;;  %v784_v24 = vmax.f32 %v654_v33, %v765_v20  ;;  %v767_v25 = vpop.f32.mrb[25].mxu0  ;;  %v897_v26 = vpop.f32.mrb[25].mxu1 }
 0x153   : > { %v768_v27 = vpop.f32.mrb[26].mxu0  ;;  %v898_v28 = vpop.f32.mrb[26].mxu1 }
 0x154   : > { %976 = vst.msk [vmem:[%s1587_s30 + $0x8] sm:$0xf] %vm973_vm1, %v1152_v22  ;;  %v1153_v29 = vpack.c.bf16 %v936_v23, %v936_v23  ;;  %v914_v32 = vmax.f32 %v784_v24, %v895_v21  ;;  %v785_v34 = vmax.f32 %v655_v38, %v768_v27  ;;  %v770_v37 = vpop.f32.mrb[27].mxu0  ;;  %v900_v39 = vpop.f32.mrb[27].mxu1 }
 0x156   : > { %977 = vst.msk [vmem:[%s1587_s30 + $0xc] sm:$0xf] %vm973_vm1, %v1153_v29  ;;  %v929_v30 = vadd.f32 %v1580_v55, %v914_v32  ;;  %v915_v31 = vmax.f32 %v785_v34, %v898_v28 }
 0x158   : > { %v937_v33 = vmax.f32 %v929_v30, 0.0  ;;  %v930_v42 = vadd.f32 %v1580_v55, %v915_v31 }
 0x159   : > { %v773_v44 = vpop.f32.mrb[28].mxu0  ;;  %v903_v47 = vpop.f32.mrb[28].mxu1 }
 0x15a   : > { %v1154_v49 = vpack.c.bf16 %v937_v33, %v937_v33  ;;  %v938_v50 = vmax.f32 %v930_v42, 0.0  ;;  %v786_v35 = vmax.f32 %v656_v43, %v773_v44  ;;  %v775_v36 = vpop.f32.mrb[29].mxu0  ;;  %v905_v38 = vpop.f32.mrb[29].mxu1 }
 0x15b   : > { %v776_v51 = vpop.f32.mrb[30].mxu0  ;;  %v906_v52 = vpop.f32.mrb[30].mxu1 }
 0x15c   : > { %978 = vst.msk [vmem:[%s1587_s30 + $0x10] sm:$0xf] %vm973_vm1, %v1154_v49  ;;  %v1155_v53 = vpack.c.bf16 %v938_v50, %v938_v50  ;;  %v916_v54 = vmax.f32 %v786_v35, %v903_v47  ;;  %v787_v56 = vmax.f32 %v657_v48, %v776_v51  ;;  %v778_v57 = vpop.f32.mrb[31].mxu0  ;;  %v908_v58 = vpop.f32.mrb[31].mxu1 }
 0x15e   : > { %979 = vst.msk [vmem:[%s1587_s30 + $0x14] sm:$0xf] %vm973_vm1, %v1155_v53  ;;  %v931_v40 = vadd.f32 %v1580_v55, %v916_v54  ;;  %v917_v41 = vmax.f32 %v787_v56, %v906_v52 }
 0x160   : > { %v939_v43 = vmax.f32 %v931_v40, 0.0  ;;  %v932_v59 = vadd.f32 %v1580_v55, %v917_v41 }
 0x162   : > { %v1156_v60 = vpack.c.bf16 %v939_v43, %v939_v43  ;;  %v940_v61 = vmax.f32 %v932_v59, 0.0 }
 0x164   : > { %980 = vst.msk [vmem:[%s1587_s30 + $0x18] sm:$0xf] %vm973_vm1, %v1156_v60  ;;  %v1157_v62 = vpack.c.bf16 %v940_v61, %v940_v61 }
 0x166   : > { %981 = vst.msk [vmem:[%s1587_s30 + $0x1c] sm:$0xf] %vm973_vm1, %v1157_v62 }
 0x167 PF: > { %p10_p9 = scmp.ge.s32.totalorder %s1302_s16, 4   ;;  %s1637_s12 = smov %s1258_s13 }
 0x168   : > { %s1638_s13 = smov %s1311_s19  ;;  %s1639_s14 = smov %s1302_s16 }
 0x169   :  { %12 = sbr.rel (!%p10_p9) target bundleno = 2 (0x2), region = 108 }

// kernel: bayesian_cnn_forward.11
= control target key start
LH: loop header
LB: loop body
LE: loop exit
PB: predicated region body
PF: predicated region fallthrough
CT: control target
= control target key end

     0   :  { %v169_v28 = vlaneseq  ;;  %v1344_v36 = vmov 1966171168   ;;  %s1682_s0 = inlined_call_operand.vmem [shape: bf16[2,1024], index: 0, kind: input, shape index: {}]   ;;  %s1683_s1 = inlined_call_operand.vmem [shape: bf16[1024,100], index: 1, kind: input, shape index: {}]   ;;  %s1684_s2 = inlined_call_operand.vmem [shape: f32[1,100], index: 2, kind: input, shape index: {}]   ;;  %s1685_s3 = inlined_call_operand.vmem [shape: bf16[100,100], index: 3, kind: input, shape index: {}]   ;;  %s1686_s4 = inlined_call_operand.vmem [shape: f32[1,100], index: 4, kind: input, shape index: {}]   ;;  %s1687_s5 = inlined_call_operand.vmem [shape: bf16[100,10], index: 5, kind: input, shape index: {}]   ;;  %s1688_s6 = inlined_call_operand.vmem [shape: f32[1,10], index: 6, kind: input, shape index: {}]   ;;  %s1689_s7 = inlined_call_operand.hbm [shape: f32[2,10], index: 7, kind: output, shape index: {}]  }
   0x1   :  { %v1237_v0 = vld [vmem:[%s1683_s1 + $0x40] sm:$0xff]   ;;  %v1241_v4 = vld [vmem:[%s1683_s1 + $0x48] sm:$0xff]   ;;  %v1245_v8 = vld [vmem:[%s1683_s1 + $0x50] sm:$0xff]   ;;  %v167_v37 = vunpack.c.l.s4 %v1344_v36 }
   0x2   :  { %v1238_v1 = vld [vmem:[%s1683_s1 + $0xc0] sm:$0xff]   ;;  %1093 = vmatprep.subr.bf16.mxu0 %v1237_v0  ;;  %v1242_v5 = vld [vmem:[%s1683_s1 + $0xc8] sm:$0xff]   ;;  %v1246_v9 = vld [vmem:[%s1683_s1 + $0xd0] sm:$0xff]   ;;  %v170_v33 = vshrl.u32 %v169_v28, 7 }
   0x3   :  { %v1239_v2 = vld [vmem:[%s1683_s1] sm:$0xff]   ;;  %1115 = vmatprep.subr.bf16.mxu1 %v1238_v1  ;;  %v1243_v6 = vld [vmem:[%s1683_s1 + $0x8] sm:$0xff]   ;;  %v1247_v10 = vld [vmem:[%s1683_s1 + $0x10] sm:$0xff]   ;;  %v168_v40 = vunpack.c.0.s8 %v167_v37 }
   0x4   :  { %v1240_v3 = vld [vmem:[%s1683_s1 + $0x80] sm:$0xff]   ;;  %1094 = vmatpush3.bf16.msra.mxu0 %v1239_v2  ;;  %v1244_v7 = vld [vmem:[%s1683_s1 + $0x88] sm:$0xff]   ;;  %v1248_v11 = vld [vmem:[%s1683_s1 + $0x90] sm:$0xff]  }
   0x5   :  { %1116 = vmatpush3.bf16.msra.mxu1 %v1240_v3  ;;  %1095 = vmatprep.subr.bf16.mxu0 %v1241_v4  ;;  %v1249_v12 = vld [vmem:[%s1683_s1 + $0x58] sm:$0xff]   ;;  %v1253_v16 = vld [vmem:[%s1683_s1 + $0x60] sm:$0xff]   ;;  %v1257_v20 = vld [vmem:[%s1683_s1 + $0x68] sm:$0xff]   ;;  %v1493_v41 = vsub.s32 %v168_v40, %v170_v33 }
   0x6   :  { %1117 = vmatprep.subr.bf16.mxu1 %v1242_v5  ;;  %v1250_v13 = vld [vmem:[%s1683_s1 + $0xd8] sm:$0xff]   ;;  %v1254_v17 = vld [vmem:[%s1683_s1 + $0xe0] sm:$0xff]   ;;  %v1258_v21 = vld [vmem:[%s1683_s1 + $0xe8] sm:$0xff]  }
   0x7   :  { %v1251_v14 = vld [vmem:[%s1683_s1 + $0x18] sm:$0xff]   ;;  %v1255_v18 = vld [vmem:[%s1683_s1 + $0x20] sm:$0xff]   ;;  %v1259_v22 = vld [vmem:[%s1683_s1 + $0x28] sm:$0xff]  }
   0x8   :  { %1096 = vmatpush3.bf16.msra.mxu0 %v1243_v6  ;;  %v1252_v15 = vld [vmem:[%s1683_s1 + $0x98] sm:$0xff]   ;;  %v1256_v19 = vld [vmem:[%s1683_s1 + $0xa0] sm:$0xff]   ;;  %v1260_v23 = vld [vmem:[%s1683_s1 + $0xa8] sm:$0xff]  }
   0x9   :  { %1118 = vmatpush3.bf16.msra.mxu1 %v1244_v7  ;;  %1097 = vmatprep.subr.bf16.mxu0 %v1245_v8  ;;  %v1261_v24 = vld [vmem:[%s1683_s1 + $0x70] sm:$0xff]   ;;  %v1265_v29 = vld [vmem:[%s1683_s1 + $0x78] sm:$0xff]   ;;  %v28_v34 = vld [vmem:[%s1682_s0] sm:$0xff] }
   0xa   :  { %1119 = vmatprep.subr.bf16.mxu1 %v1246_v9  ;;  %v1262_v25 = vld [vmem:[%s1683_s1 + $0xf0] sm:$0xff]   ;;  %v1266_v30 = vld [vmem:[%s1683_s1 + $0xf8] sm:$0xff]   ;;  %v1270_v35 = vld [vmem:[%s1683_s1 + $0x140] sm:$0xff]   ;;  %v165_v39 = vcombine.high %v28_v34, %v28_v34  ;;  %v172_v42 = vrot.slane %v28_v34, %v1493_v41 }
   0xb   :  { %v1263_v26 = vld [vmem:[%s1683_s1 + $0x30] sm:$0xff]   ;;  %v1267_v31 = vld [vmem:[%s1683_s1 + $0x38] sm:$0xff]   ;;  %v1271_v38 = vld [vmem:[%s1683_s1 + $0x1c0] sm:$0xff]  }
   0xc   :  { %1098 = vmatpush3.bf16.msra.mxu0 %v1247_v10  ;;  %v1264_v27 = vld [vmem:[%s1683_s1 + $0xb0] sm:$0xff]   ;;  %v1268_v32 = vld [vmem:[%s1683_s1 + $0xb8] sm:$0xff]   ;;  %v1497_v43 = vrot.slane %v165_v39, %v1493_v41  ;;  %v180_v44 = vcombine.high %v172_v42, %v172_v42  ;;  %v188_v45 = vrot.slane %v172_v42, %v1493_v41  ;;  %v1272_v47 = vld [vmem:[%s1683_s1 + $0x100] sm:$0xff]  }
   0xd   :  { %1120 = vmatpush3.bf16.msra.mxu1 %v1248_v11  ;;  %1099 = vmatprep.subr.bf16.mxu0 %v1249_v12  ;;  %v1273_v49 = vld [vmem:[%s1683_s1 + $0x180] sm:$0xff]   ;;  %v1274_v52 = vld [vmem:[%s1683_s1 + $0x148] sm:$0xff]   ;;  %v1278_v58 = vld [vmem:[%s1683_s1 + $0x150] sm:$0xff]  }
   0xe   :  { %1121 = vmatprep.subr.bf16.mxu1 %v1250_v13  ;;  %v181_v46 = vcombine.high %v1497_v43, %v1497_v43  ;;  %v202_v48 = vrot.slane %v180_v44, %v1493_v41  ;;  %v210_v51 = vcombine.high %v188_v45, %v188_v45  ;;  %v1275_v54 = vld [vmem:[%s1683_s1 + $0x1c8] sm:$0xff]   ;;  %v1279_v59 = vld [vmem:[%s1683_s1 + $0x1d0] sm:$0xff]   ;;  %v1282_v62 = vld [vmem:[%s1683_s1 + $0x158] sm:$0xff]  }
   0xf   :  { %v1276_v55 = vld [vmem:[%s1683_s1 + $0x108] sm:$0xff]   ;;  %v1280_v60 = vld [vmem:[%s1683_s1 + $0x110] sm:$0xff]   ;;  %v1283_v63 = vld [vmem:[%s1683_s1 + $0x1d8] sm:$0xff]  }
  0x10   :  { %1100 = vmatpush3.bf16.msra.mxu0 %v1251_v14  ;;  %v209_v50 = vrot.slane %v181_v46, %v1493_v41  ;;  %638 = vmatprep.mubr.bf16.mxu0 %v202_v48  ;;  %v212_v53 = vcombine.high %v202_v48, %v202_v48  ;;  %v1277_v57 = vld [vmem:[%s1683_s1 + $0x188] sm:$0xff]   ;;  %v1281_v61 = vld [vmem:[%s1683_s1 + $0x190] sm:$0xff]   ;;  %v1284_v0 = vld [vmem:[%s1683_s1 + $0x118] sm:$0xff]  }
  0x11   :  { %1122 = vmatpush3.bf16.msra.mxu1 %v1252_v15  ;;  %1101 = vmatprep.subr.bf16.mxu0 %v1253_v16  ;;  %v1285_v1 = vld [vmem:[%s1683_s1 + $0x198] sm:$0xff]   ;;  %v1286_v2 = vld [vmem:[%s1683_s1 + $0x160] sm:$0xff]   ;;  %v1290_v6 = vld [vmem:[%s1683_s1 + $0x168] sm:$0xff]  }
  0x12   :  { %1123 = vmatprep.subr.bf16.mxu1 %v1254_v17  ;;  %v213_v56 = vcombine.high %v209_v50, %v209_v50  ;;  %678 = vmatprep.mubr.bf16.mxu1 %v212_v53  ;;  %v1287_v3 = vld [vmem:[%s1683_s1 + $0x1e0] sm:$0xff]   ;;  %v1291_v7 = vld [vmem:[%s1683_s1 + $0x1e8] sm:$0xff]   ;;  %v1294_v10 = vld [vmem:[%s1683_s1 + $0x170] sm:$0xff]   ;;  %v195_v17 = vrot.slane %v1497_v43, %v1493_v41 }
  0x13   :  { %v1288_v4 = vld [vmem:[%s1683_s1 + $0x120] sm:$0xff]   ;;  %v1292_v8 = vld [vmem:[%s1683_s1 + $0x128] sm:$0xff]   ;;  %v1295_v11 = vld [vmem:[%s1683_s1 + $0x1f0] sm:$0xff]  }
  0x14   :  { %1102 = vmatpush3.bf16.msra.mxu0 %v1255_v18  ;;  %v1289_v5 = vld [vmem:[%s1683_s1 + $0x1a0] sm:$0xff]   ;;  %v1293_v9 = vld [vmem:[%s1683_s1 + $0x1a8] sm:$0xff]   ;;  %v1296_v12 = vld [vmem:[%s1683_s1 + $0x130] sm:$0xff]  }
  0x15   :  { %1124 = vmatpush3.bf16.msra.mxu1 %v1256_v19  ;;  %1103 = vmatprep.subr.bf16.mxu0 %v1257_v20  ;;  %v1298_v13 = vld [vmem:[%s1683_s1 + $0x178] sm:$0xff]   ;;  %v1297_v14 = vld [vmem:[%s1683_s1 + $0x1b0] sm:$0xff]  }
  0x16   :  { %1125 = vmatprep.subr.bf16.mxu1 %v1258_v21  ;;  %v1299_v15 = vld [vmem:[%s1683_s1 + $0x1f8] sm:$0xff]  }
  0x17   :  { %v1300_v16 = vld [vmem:[%s1683_s1 + $0x138] sm:$0xff]  }
  0x18   :  { %1104 = vmatpush3.bf16.msra.mxu0 %v1259_v22  ;;  %v1301_v18 = vld [vmem:[%s1683_s1 + $0x1b8] sm:$0xff]  }
  0x19   :  { %1126 = vmatpush3.bf16.msra.mxu1 %v1260_v23  ;;  %1105 = vmatprep.subr.bf16.mxu0 %v1261_v24 }
  0x1a   :  { %1127 = vmatprep.subr.bf16.mxu1 %v1262_v25 }
  0x1c   :  { %1106 = vmatpush3.bf16.msra.mxu0 %v1263_v26 }
  0x1d   :  { %1128 = vmatpush3.bf16.msra.mxu1 %v1264_v27  ;;  %1107 = vmatprep.subr.bf16.mxu0 %v1265_v29 }
  0x1e   :  { %1129 = vmatprep.subr.bf16.mxu1 %v1266_v30 }
  0x20   :  { %1108 = vmatpush3.bf16.msra.mxu0 %v1267_v31 }
  0x21   :  { %1130 = vmatpush3.bf16.msra.mxu1 %v1268_v32  ;;  %1137 = vmatprep.subr.bf16.mxu0 %v1270_v35 }
  0x22   :  { %1159 = vmatprep.subr.bf16.mxu1 %v1271_v38 }
  0x23   :  { %639 = vmatmul.mubr.bf16.vlgmr.msra.gmra.mrb[0].mxu0 %v188_v45 }
  0x24   :  { %1138 = vmatpush3.bf16.msra.mxu0 %v1272_v47  ;;  %679 = vmatmul.mubr.bf16.vlgmr.msra.gmra.mrb[0].mxu1 %v210_v51 }
  0x25   :  { %1139 = vmatprep.subr.bf16.mxu0 %v1274_v52  ;;  %1160 = vmatpush3.bf16.msra.mxu1 %v1273_v49 }
  0x26   :  { %718 = vmatprep.mubr.bf16.mxu0 %v209_v50  ;;  %1161 = vmatprep.subr.bf16.mxu1 %v1275_v54 }
  0x27   :  { %758 = vmatprep.mubr.bf16.mxu1 %v213_v56 }
  0x28   :  { %1140 = vmatpush3.bf16.msra.mxu0 %v1276_v55 }
  0x29   :  { %1141 = vmatprep.subr.bf16.mxu0 %v1278_v58  ;;  %1162 = vmatpush3.bf16.msra.mxu1 %v1277_v57 }
  0x2a   :  { %1163 = vmatprep.subr.bf16.mxu1 %v1279_v59 }
  0x2c   :  { %1142 = vmatpush3.bf16.msra.mxu0 %v1280_v60 }
  0x2d   :  { %1143 = vmatprep.subr.bf16.mxu0 %v1282_v62  ;;  %1164 = vmatpush3.bf16.msra.mxu1 %v1281_v61 }
  0x2e   :  { %1165 = vmatprep.subr.bf16.mxu1 %v1283_v63 }
  0x30   :  { %1144 = vmatpush3.bf16.msra.mxu0 %v1284_v0 }
  0x31   :  { %1145 = vmatprep.subr.bf16.mxu0 %v1286_v2  ;;  %1166 = vmatpush3.bf16.msra.mxu1 %v1285_v1 }
  0x32   :  { %1167 = vmatprep.subr.bf16.mxu1 %v1287_v3 }
  0x34   :  { %1146 = vmatpush3.bf16.msra.mxu0 %v1288_v4 }
  0x35   :  { %1147 = vmatprep.subr.bf16.mxu0 %v1290_v6  ;;  %1168 = vmatpush3.bf16.msra.mxu1 %v1289_v5 }
  0x36   :  { %1169 = vmatprep.subr.bf16.mxu1 %v1291_v7 }
  0x38   :  { %1148 = vmatpush3.bf16.msra.mxu0 %v1292_v8 }
  0x39   :  { %1149 = vmatprep.subr.bf16.mxu0 %v1294_v10  ;;  %1170 = vmatpush3.bf16.msra.mxu1 %v1293_v9 }
  0x3a   :  { %1171 = vmatprep.subr.bf16.mxu1 %v1295_v11 }
  0x3c   :  { %1150 = vmatpush3.bf16.msra.mxu0 %v1296_v12 }
  0x3d   :  { %1151 = vmatprep.subr.bf16.mxu0 %v1298_v13  ;;  %1172 = vmatpush3.bf16.msra.mxu1 %v1297_v14 }
  0x3e   :  { %12 = vsyncpa [#allocation3], 0  ;;  %1173 = vmatprep.subr.bf16.mxu1 %v1299_v15  ;;  %v211_v19 = vcombine.high %v195_v17, %v195_v17  ;;  %v1302_v20 = vld [vmem:[%s1685_s3] sm:$0xff]   ;;  %v1345_v21 = vmov 0.0   ;;  %v1303_v22 = vld [vmem:[%s1685_s3 + $0x8] sm:$0xff]   ;;  %vm831_vm0 = vcmask 1041408  }
  0x3f   :  { %v1304_v23 = vld [vmem:[%s1685_s3 + $0x10] sm:$0xff]   ;;  %v1305_v24 = vld [vmem:[%s1685_s3 + $0x18] sm:$0xff]   ;;  %v1306_v25 = vld [vmem:[%s1685_s3 + $0x20] sm:$0xff]   ;;  %vm1346_vm1 = vmmov 0   ;;  %vm827_vm2 = vcmask 818176   ;;  %vm982_vm3 = vcmask 74752  }
  0x40   :  { %1152 = vmatpush3.bf16.msra.mxu0 %v1300_v16  ;;  %v1307_v26 = vld [vmem:[%s1685_s3 + $0x28] sm:$0xff]   ;;  %v1308_v27 = vld [vmem:[%s1685_s3 + $0x30] ss:$0 sps:$4 sm:$0x33]   ;;  %v1309_v29 = vld [vmem:[%s1687_s5] sm:$0xff]  }
  0x41   :  { %1174 = vmatpush3.bf16.msra.mxu1 %v1301_v18  ;;  %1197 = vmatprep.subr.bf16.mxu0 %v1345_v21  ;;  %v833_v28 = vsel %vm831_vm0, %v1308_v27, 0  ;;  %v1310_v30 = vld [vmem:[%s1687_s5 + $0x8] sm:$0xff]   ;;  %v1311_v31 = vld [vmem:[%s1687_s5 + $0x10] sm:$0xff]   ;;  %v1312_v32 = vld [vmem:[%s1687_s5 + $0x18] sm:$0xff]  }
  0x42   :  { %1215 = vmatprep.subr.bf16.mxu1 %v1345_v21  ;;  %v1313_v33 = vld [vmem:[%s1687_s5 + $0x20] sm:$0xff]   ;;  %v1314_v61 = vld [vmem:[%s1687_s5 + $0x28] sm:$0xff]   ;;  %v1315_v62 = vld [vmem:[%s1687_s5 + $0x30] ss:$0 sps:$4 sm:$0x33]  }
  0x43   :  { %719 = vmatmul.mubr.bf16.vlgmr.msra.gmra.mrb[4].mxu0 %v195_v17  ;;  %v1010_v35 = vld [vmem:[%s1684_s2] ss:$0 sm:$0xff]  ;;  %v940_v63 = vsel %vm831_vm0, %v1315_v62, 0 }
  0x44   :  { %759 = vmatmul.mubr.bf16.vlgmr.msra.gmra.mrb[4].mxu1 %v211_v19  ;;  %1198 = vmatpush3.bf16.msra.mxu0 %v1302_v20  ;;  %v1075_v0 = vld [vmem:[%s1686_s4] ss:$0 sm:$0xff]  ;;  %s1347_s4 = smov [#allocation2]  }
  0x45   :  { %1199 = vmatprep.subr.bf16.mxu0 %v1345_v21  ;;  %1211 = vmatprep.mubr.msk.bf16.mxu0 %vm1346_vm1, %v1345_v21  ;;  %v1084_v8 = vld [vmem:[%s1688_s6] ss:$0 sm:$0xff]  ;;  %s1002_s5 = sshll.u32 %s1347_s4, 4  ;;  %s1003_s5 = int_to_ptr.vmem [resolvable:$true] %s1002_s5 }
  0x46   :  { %1229 = vmatprep.mubr.msk.bf16.mxu1 %vm1346_vm1, %v1345_v21  ;;  %1216 = vmatpush3.bf16.msra.mxu1 %v1309_v29  ;;  %s1320_s6 = scalar_lea.vmem %s1003_s5, 32  ;;  %p1325_p1 = scmp.lt.s32.totalorder %s1003_s5, %s1003_s5 }
  0x47   :  { %1217 = vmatprep.subr.bf16.mxu1 %v1345_v21  ;;  %p1321_p0 = scmp.ne.s32.totalorder %s1003_s5, %s1320_s6  ;;  %p1326_p2 = scmp.lt.s32.totalorder %s1320_s6, %s1320_s6 }
  0x48   :  { %1200 = vmatpush3.bf16.msra.mxu0 %v1303_v22 }
  0x49   :  { %1201 = vmatprep.subr.bf16.mxu0 %v1345_v21  ;;  %p1327_p3 = por %p1326_p2, %p1325_p1 }
  0x4a   :  { %1218 = vmatpush3.bf16.msra.mxu1 %v1310_v30 }
  0x4b   :  { %1219 = vmatprep.subr.bf16.mxu1 %v1345_v21  ;;  %p1328_p4 = pnand %p1327_p3, %p1321_p0 }
  0x4c   :  { %1202 = vmatpush3.bf16.msra.mxu0 %v1304_v23 }
  0x4d   :  { %1203 = vmatprep.subr.bf16.mxu0 %v1345_v21 }
  0x4e   :  { %1220 = vmatpush3.bf16.msra.mxu1 %v1311_v31 }
  0x4f   :  { %1221 = vmatprep.subr.bf16.mxu1 %v1345_v21 }
  0x50   :  { %1204 = vmatpush3.bf16.msra.mxu0 %v1305_v24 }
  0x51   :  { %1205 = vmatprep.subr.bf16.mxu0 %v1345_v21 }
  0x52   :  { %1222 = vmatpush3.bf16.msra.mxu1 %v1312_v32 }
  0x53   :  { %1223 = vmatprep.subr.bf16.mxu1 %v1345_v21 }
  0x54   :  { %1206 = vmatpush3.bf16.msra.mxu0 %v1306_v25 }
  0x55   :  { %1207 = vmatprep.subr.bf16.mxu0 %v1345_v21 }
  0x56   :  { %1224 = vmatpush3.bf16.msra.mxu1 %v1313_v33 }
  0x57   :  { %1225 = vmatprep.subr.bf16.mxu1 %v1345_v21 }
  0x58   :  { %1208 = vmatpush3.bf16.msra.mxu0 %v1307_v26 }
  0x59   :  { %1209 = vmatprep.subr.bf16.mxu0 %v1345_v21 }
  0x5a   :  { %1226 = vmatpush3.bf16.msra.mxu1 %v1314_v61 }
  0x5b   :  { %1227 = vmatprep.subr.bf16.mxu1 %v1345_v21 }
  0x5c   :  { %1210 = vmatpush3.bf16.msra.mxu0 %v833_v28 }
  0x5e   :  { %1228 = vmatpush3.bf16.msra.mxu1 %v940_v63 }
  0xf6   :  { %v1109_v34 = vpop.f32.mrb[0].mxu0 }
  0xf7   :  { %v1110_v36 = vpop.f32.mrb[1].mxu0  ;;  %v1131_v37 = vpop.f32.mrb[0].mxu1 }
  0xf8   :  { %v1111_v38 = vadd.f32 %v1110_v36, %v1109_v34  ;;  %v1112_v39 = vpop.f32.mrb[2].mxu0  ;;  %v1132_v40 = vpop.f32.mrb[1].mxu1 }
  0xf9   :  { %v1113_v41 = vpop.f32.mrb[3].mxu0  ;;  %v1133_v43 = vadd.f32 %v1132_v40, %v1131_v37  ;;  %v1134_v44 = vpop.f32.mrb[2].mxu1 }
  0xfa   :  { %v641_v42 = vadd.f32 %v1111_v38, %v1010_v35  ;;  %v1135_v45 = vpop.f32.mrb[3].mxu1 }
  0xfc   :  { %v681_v46 = vadd.f32 %v1133_v43, %v641_v42 }
 0x116   :  { %v1153_v47 = vpop.f32.mrb[4].mxu0 }
 0x117   :  { %v1154_v48 = vpop.f32.mrb[5].mxu0  ;;  %v1175_v49 = vpop.f32.mrb[4].mxu1 }
 0x118   :  { %v1155_v50 = vadd.f32 %v1154_v48, %v1153_v47  ;;  %v1156_v51 = vpop.f32.mrb[6].mxu0  ;;  %v1176_v52 = vpop.f32.mrb[5].mxu1 }
 0x119   :  { %v1157_v53 = vpop.f32.mrb[7].mxu0  ;;  %v1177_v55 = vadd.f32 %v1176_v52, %v1175_v49  ;;  %v1178_v56 = vpop.f32.mrb[6].mxu1 }
 0x11a   :  { %v721_v54 = vadd.f32 %v1155_v50, %v681_v46  ;;  %v1179_v57 = vpop.f32.mrb[7].mxu1 }
 0x11c   :  { %v761_v58 = vadd.f32 %v1177_v55, %v721_v54 }
 0x11e   :  { %v766_v59 = vmax.f32 %v761_v58, 0.0 }
 0x120   :  { %v767_v60 = vpack.c.bf16 %v766_v59, %v766_v59 }
 0x122   :  { %1212 = vmatmul.mubr.msk.bf16.vlgmr.msra.gmra.mrb[8].mxu0 %vm827_vm2, %v767_v60 }
 0x1f5   :  { %v869_v1 = vpop.f32.mrb[8].mxu0 }
 0x1f6   :  { %v870_v2 = vadd.f32 %v1075_v0, %v869_v1  ;;  %v1213_v3 = vpop.f32.mrb[9].mxu0 }
 0x1f7   :  { %v872_v4 = vpop.f32.mrb[10].mxu0 }
 0x1f8   :  { %v875_v5 = vmax.f32 %v870_v2, 0.0  ;;  %v1214_v6 = vpop.f32.mrb[11].mxu0 }
 0x1fa   :  { %v876_v7 = vpack.c.bf16 %v875_v5, %v875_v5 }
 0x1fc   :  { %1230 = vmatmul.mubr.msk.bf16.vlgmr.msra.gmra.mrb[8].mxu1 %vm827_vm2, %v876_v7 }
 0x2cf   :  { %v976_v9 = vpop.f32.mrb[8].mxu1 }
 0x2d0   :  { %v977_v10 = vadd.f32 %v1084_v8, %v976_v9  ;;  %v1231_v11 = vpop.f32.mrb[9].mxu1 }
 0x2d1   :  { %v979_v12 = vpop.f32.mrb[10].mxu1 }
 0x2d2   :  { %v1232_v13 = vpop.f32.mrb[11].mxu1  ;;  %v983_v14 = vsel %vm982_vm3, %v977_v10, -inf }
 0x2d3   :  { %984 = vmax.xlane.f32.xlu0 %v983_v14 }
 0x360   :  { %v985_v15 = vpop.xlane.xlu0 %984 }
 0x361   :  { %v986_v16 = vsub.f32 %v977_v10, %v985_v15 }
 0x363   :  { %v987_v17 = vmul.f32 1.442695, %v986_v16 }
 0x365   :  { %1316 = vpow2.f32 %v987_v17 }
 0x36f   :  { %v1317_v18 = vpop.eup %1316 }
 0x370   :  { %v989_v19 = vsel %vm982_vm3, %v1317_v18, 0.0 }
 0x371   :  { %990 = vadd.xlane.f32.xlu0 %v989_v19 }
 0x3fe   :  { %v991_v20 = vpop.xlane.xlu0 %990 }
 0x3ff   :  { %1318 = vlog2.f32 %v991_v20 }
 0x409   :  { %v1319_v21 = vpop.eup %1318 }
 0x40a   :  { %v993_v22 = vmul.f32 0.6931472, %v1319_v21 }
 0x40c   :  { %v994_v23 = vsub.f32 %v986_v16, %v993_v22 }
 0x40e   :  { %995 = vst.msk [vmem:[#allocation2] sm:$0x3] %vm982_vm3, %v994_v23 }
 0x40f   :  { %1331 = shalt.err (!%p1328_p4)
}
 0x410   :  { %s1332_s21 = scalar_lea.hbm %s1689_s7, 32 }
 0x411   :  { %p1333_p5 = scmp.ne.s32.totalorder %s1689_s7, %s1332_s21  ;;  %p1336_p6 = scmp.lt.u32.totalorder %s1332_s21, %s1689_s7 }
 0x413   :  { %p1338_p7 = pnand %p1336_p6, %p1333_p5 }
 0x415   :  { %1341 = shalt.err (!%p1338_p7)
}
 0x416   :  { %1005 = dma.vmem_to_hbm [thread:$0]  %s1003_s5, 32, %s1689_s7, [#allocation3]  }
 0x417   :  { %1342 = dma.done.wait [#allocation3], 32  }
 0x418   :  { %1343 = vsyncadd [#allocation3], 4294967264 }
 0x419   :  { %1009 = vsyncpa [#allocation3], 1 }

</bundles_post_ra>
